<compile_context>
chip_gen: v5e
topology: v5e:2x2
jax: 0.10.0
libtpu: 0.0.40
codegen_flags: <defaults>
</compile_context>

<pallas_src>
import numpy as np
import jax
import jax.numpy as jnp
from jax.experimental import pallas as pl
from jax.experimental.pallas import tpu as pltpu


def afm_kernel(hp_ref, ww_ref, aux_ref, lin_ref, out_ref):
    # hp_ref : (Bc*P, E)  hadamard products of field pairs for Bc batch rows
    # ww_ref : (E, A)     attention layer-1 weight
    # aux_ref: (3, E)     row 0 = bw (padded), row 1 = Wh^T (padded), row 2 = Wp^T
    # lin_ref: (1, 1, Bc) first-order linear term (+ lin_bias + bp), lane-dense
    # out_ref: (1, 1, Bc) lane-dense output row
    BP, E = hp_ref.shape
    Bc = out_ref.shape[-1]
    P = BP // Bc
    A = ww_ref.shape[1]

    hp = hp_ref[...]                                                   # (Bc*P, E)
    bw = aux_ref[0:1, 0:A]                                             # (1, A)
    wh = aux_ref[1:2, 0:A]                                             # (1, A) = Wh^T
    wp = aux_ref[2:3, 0:E]                                             # (1, E) = Wp^T

    # attention MLP layer 1 on the MXU (M = Bc*P, K = E, N = A)
    attn = jnp.maximum(
        jnp.dot(hp, ww_ref[...], preferred_element_type=jnp.float32) + bw,
        0.0)                                                           # (Bc*P, A)

    # layer 2 (A -> 1) on the VPU; bh omitted (softmax over pairs is
    # shift-invariant, so it cancels exactly)
    s = jnp.sum(attn * wh, axis=-1, keepdims=True)                     # (Bc*P, 1)

    # softmax over the P pairs of each batch row with a PER-ROW max, so one
    # row's scores can never underflow to an all-zero (0/0 = NaN) row.
    s3 = s.reshape(Bc, P, 1)                   # tile-aligned: P is a multiple of 8
    m = jnp.max(s3, axis=1, keepdims=True)                             # (Bc, 1, 1)
    e = jnp.exp(s3 - m)                                                # (Bc, P, 1)

    # per-batch-row reductions: plain sublane sums (no segment matmul)
    hp3 = hp.reshape(Bc, P, E)                                         # (Bc, P, E)
    num = jnp.sum(e * hp3, axis=1)                                     # (Bc, E)
    den = jnp.sum(e, axis=1)                                           # (Bc, 1)

    # final projection E -> 1 on the VPU, deferred softmax normalization,
    # add the precomputed first-order linear term, one lane-dense store.
    proj = jnp.sum(num * wp, axis=-1, keepdims=True) / den             # (Bc, 1)
    out_ref[0, 0, :] = proj[:, 0] + lin_ref[0, 0, :]


def _default_batch_chunks():
    # Two TensorCores per chip only on v7x; on v5e/v6e the grid is a sequential
    # loop on a single TC, so extra grid steps are pure per-step/DMA overhead.
    try:
        kind = jax.devices()[0].device_kind.lower()
    except Exception:
        return 1
    return 2 if ("v7" in kind or "7x" in kind) else 1


def afm_forward(x_id, x_value, params, batch_chunks=None):
    B, F = x_id.shape
    E = params["emb"].shape[1]
    A = params["Ww"].shape[1]

    if batch_chunks is None:
        batch_chunks = _default_batch_chunks()
    if B % batch_chunks != 0:
        batch_chunks = 1
    Bc = B // batch_chunks

    # --- glue (plain JAX): embedding lookup, pair gather, hadamard product ---
    emb = params["emb"][x_id] * x_value[..., None]                     # (B, F, E)
    vi_idx, vj_idx = np.triu_indices(F, k=1)                           # static pairs
    P = int(vi_idx.shape[0])
    assert P % 8 == 0, "P must be a multiple of 8 for the tile-aligned in-kernel reshape"
    hp = (emb[:, vi_idx] * emb[:, vj_idx]).reshape(B * P, E).astype(jnp.float32)

    # first-order linear term; fold both scalar biases (lin_bias and attn_p bias)
    lin = (jnp.sum(params["lin"][x_id][..., 0] * x_value, axis=1)
           + params["lin_bias"][0, 0] + params["bp"][0, 0])
    lin = lin.reshape(batch_chunks, 1, Bc).astype(jnp.float32)         # lane-dense rows

    # pack the three tiny row vectors into ONE operand (one DMA, one VMEM tile)
    aux = jnp.zeros((3, E), jnp.float32)
    aux = aux.at[0, :A].set(params["bw"][0])                           # bw
    aux = aux.at[1, :A].set(params["Wh"][:, 0])                        # Wh^T
    aux = aux.at[2, :].set(params["Wp"][:, 0])                         # Wp^T

    out = pl.pallas_call(
        afm_kernel,
        out_shape=jax.ShapeDtypeStruct((batch_chunks, 1, Bc), jnp.float32),
        grid=(batch_chunks,),
        in_specs=[
            pl.BlockSpec((Bc * P, E), lambda c: (c, 0)),     # hp (batch-chunked)
            pl.BlockSpec((E, A), lambda c: (0, 0)),          # Ww
            pl.BlockSpec((3, E), lambda c: (0, 0)),          # aux = [bw; Wh^T; Wp^T]
            pl.BlockSpec((1, 1, Bc), lambda c: (c, 0, 0)),   # lin (+ lin_bias + bp)
        ],
        out_specs=pl.BlockSpec((1, 1, Bc), lambda c: (c, 0, 0)),
        compiler_params=pltpu.CompilerParams(
            dimension_semantics=("parallel",)),
    )(hp, params["Ww"], aux, lin)

    return out.reshape(B)                                              # (B,)


def ref_forward(x_id, x_value, params):
    """Pure-JAX reference mirroring the PyTorch forward (eval mode, dropout=0)."""
    emb = params["emb"][x_id] * x_value[..., None]                     # (B, F, E)
    F = x_id.shape[1]
    vi_idx, vj_idx = np.triu_indices(F, k=1)
    hp = emb[:, vi_idx] * emb[:, vj_idx]                               # (B, P, E)
    attn = jax.nn.relu(hp @ params["Ww"] + params["bw"])               # (B, P, A)
    s = attn @ params["Wh"] + params["bh"]                             # (B, P, 1)
    w = jax.nn.softmax(s, axis=1)
    afm = jnp.sum(w * hp, axis=1)                                      # (B, E)
    proj = afm @ params["Wp"] + params["bp"]                           # (B, 1)
    lin = jnp.sum(params["lin"][x_id][..., 0] * x_value, axis=1) + params["lin_bias"][0, 0]
    return lin + proj[:, 0]


def init_params(key, nfeat, nemb, nattn):
    ks = jax.random.split(key, 6)
    scale_emb = 1.0 / np.sqrt(nemb)
    return {
        "emb": jax.random.uniform(ks[0], (nfeat, nemb), jnp.float32, -scale_emb, scale_emb),
        "lin": jax.random.uniform(ks[1], (nfeat, 1), jnp.float32, -1.0, 1.0),
        "lin_bias": jnp.zeros((1, 1), jnp.float32),
        "Ww": jax.random.normal(ks[2], (nemb, nattn), jnp.float32) * (1.0 / np.sqrt(nemb)),
        "bw": jax.random.normal(ks[3], (1, nattn), jnp.float32) * 0.01,
        "Wh": jax.random.normal(ks[4], (nattn, 1), jnp.float32) * (1.0 / np.sqrt(nattn)),
        # nonzero bh: the kernel drops it (softmax shift-invariance), ref keeps it.
        "bh": jnp.full((1, 1), 0.3, jnp.float32),
        "Wp": jax.random.normal(ks[5], (nemb, 1), jnp.float32) * (1.0 / np.sqrt(nemb)),
        "bp": jnp.zeros((1, 1), jnp.float32),
    }


if __name__ == "__main__":
    B, F, NFEAT, NEMB, NATTN = 8, 16, 100, 16, 8   # dropout p = 0 (eval mode)

    key = jax.random.PRNGKey(0)
    k_id, k_val, k_par = jax.random.split(key, 3)
    x_id = jax.random.randint(k_id, (B, F), 0, NFEAT, dtype=jnp.int32)
    x_value = jax.random.uniform(k_val, (B, F), jnp.float32, 0.0, 1.0)
    params = init_params(k_par, NFEAT, NEMB, NATTN)

    y = jax.block_until_ready(afm_forward(x_id, x_value, params))

    y_ref = jax.block_until_ready(ref_forward(x_id, x_value, params))
    np.testing.assert_allclose(np.asarray(y), np.asarray(y_ref), rtol=1e-4, atol=1e-4)

    print("KERNEL_OK")
</pallas_src>

<mosaic_0001>
module attributes {stable_mosaic.version = 11 : i64} {
  func.func @afm_kernel(%arg0: i32, %arg1: memref<960x16xf32, #tpu.memory_space<vmem>>, %arg2: memref<16x8xf32, #tpu.memory_space<vmem>>, %arg3: memref<3x16xf32, #tpu.memory_space<vmem>>, %arg4: memref<1x1x8xf32, #tpu.memory_space<vmem>>, %arg5: memref<1x1x8xf32, #tpu.memory_space<vmem>>) attributes {dimension_semantics = [#tpu.dimension_semantics<parallel>], iteration_bounds = array<i64: 1>, scalar_prefetch = 0 : i64, scratch_operands = 0 : i64, tpu.core_type = #tpu.core_type<tc>, window_params = [{transform_indices = @transform_0, window_bounds = array<i64: 960, 16>}, {pipeline_mode = #tpu.pipeline_mode<synchronous>, transform_indices = @transform_1, window_bounds = array<i64: 16, 8>}, {pipeline_mode = #tpu.pipeline_mode<synchronous>, transform_indices = @transform_2, window_bounds = array<i64: 3, 16>}, {transform_indices = @transform_3, window_bounds = array<i64: 1, 1, 8>}, {transform_indices = @transform_4, window_bounds = array<i64: 1, 1, 8>}]} {
    %c0 = arith.constant 0 : index
    %c0_0 = arith.constant 0 : index
    %0 = vector.load %arg1[%c0, %c0_0] : memref<960x16xf32, #tpu.memory_space<vmem>>, vector<960x16xf32>
    %c0_1 = arith.constant 0 : index
    %c0_2 = arith.constant 0 : index
    %1 = vector.load %arg3[%c0_1, %c0_2] : memref<3x16xf32, #tpu.memory_space<vmem>>, vector<1x8xf32>
    %c1 = arith.constant 1 : index
    %c0_3 = arith.constant 0 : index
    %2 = vector.load %arg3[%c1, %c0_3] : memref<3x16xf32, #tpu.memory_space<vmem>>, vector<1x8xf32>
    %c2 = arith.constant 2 : index
    %c0_4 = arith.constant 0 : index
    %3 = vector.load %arg3[%c2, %c0_4] : memref<3x16xf32, #tpu.memory_space<vmem>>, vector<1x16xf32>
    %c0_5 = arith.constant 0 : index
    %c0_6 = arith.constant 0 : index
    %4 = vector.load %arg2[%c0_5, %c0_6] : memref<16x8xf32, #tpu.memory_space<vmem>>, vector<16x8xf32>
    %cst = arith.constant dense<0.000000e+00> : vector<960x8xf32>
    %5 = tpu.matmul %0, %4, %cst {dimension_numbers = #tpu.dot_dimension_numbers<[1], [0], [0], [1], [0, 0, 1, 1], [], []>} : vector<960x16xf32>, vector<16x8xf32>, vector<960x8xf32> -> vector<960x8xf32>
    %6 = vector.broadcast %1 : vector<1x8xf32> to vector<960x8xf32>
    %7 = arith.addf %5, %6 : vector<960x8xf32>
    %cst_7 = arith.constant 0.000000e+00 : f32
    %8 = vector.broadcast %cst_7 : f32 to vector<960x8xf32>
    %9 = arith.maximumf %7, %8 : vector<960x8xf32>
    %10 = vector.broadcast %2 : vector<1x8xf32> to vector<960x8xf32>
    %11 = arith.mulf %9, %10 : vector<960x8xf32>
    %cst_8 = arith.constant dense<0.000000e+00> : vector<960xf32>
    %12 = vector.multi_reduction <add>, %11, %cst_8 [1] : vector<960x8xf32> to vector<960xf32>
    %13 = vector.shape_cast %12 : vector<960xf32> to vector<960x1xf32>
    %14 = vector.shape_cast %13 : vector<960x1xf32> to vector<8x120x1xf32>
    %cst_9 = arith.constant dense<0xFF800000> : vector<8x1xf32>
    %15 = vector.multi_reduction <maximumf>, %14, %cst_9 [1] : vector<8x120x1xf32> to vector<8x1xf32>
    %16 = vector.shape_cast %15 : vector<8x1xf32> to vector<8x1x1xf32>
    %17 = vector.broadcast %16 : vector<8x1x1xf32> to vector<8x120x1xf32>
    %18 = arith.subf %14, %17 : vector<8x120x1xf32>
    %19 = math.exp %18 : vector<8x120x1xf32>
    %20 = vector.shape_cast %0 : vector<960x16xf32> to vector<8x120x16xf32>
    %21 = vector.broadcast %19 : vector<8x120x1xf32> to vector<8x120x16xf32>
    %22 = arith.mulf %21, %20 : vector<8x120x16xf32>
    %cst_10 = arith.constant dense<0.000000e+00> : vector<8x16xf32>
    %23 = vector.multi_reduction <add>, %22, %cst_10 [1] : vector<8x120x16xf32> to vector<8x16xf32>
    %cst_11 = arith.constant dense<0.000000e+00> : vector<8x1xf32>
    %24 = vector.multi_reduction <add>, %19, %cst_11 [1] : vector<8x120x1xf32> to vector<8x1xf32>
    %25 = vector.broadcast %3 : vector<1x16xf32> to vector<8x16xf32>
    %26 = arith.mulf %23, %25 : vector<8x16xf32>
    %cst_12 = arith.constant dense<0.000000e+00> : vector<8xf32>
    %27 = vector.multi_reduction <add>, %26, %cst_12 [1] : vector<8x16xf32> to vector<8xf32>
    %28 = vector.shape_cast %27 : vector<8xf32> to vector<8x1xf32>
    %29 = arith.divf %28, %24 : vector<8x1xf32>
    %30 = vector.shape_cast %29 : vector<8x1xf32> to vector<8xf32>
    %c0_13 = arith.constant 0 : index
    %c0_14 = arith.constant 0 : index
    %c0_15 = arith.constant 0 : index
    %31 = vector.load %arg4[%c0_13, %c0_14, %c0_15] : memref<1x1x8xf32, #tpu.memory_space<vmem>>, vector<1x1x8xf32>
    %32 = vector.shape_cast %31 : vector<1x1x8xf32> to vector<8xf32>
    %33 = arith.addf %30, %32 : vector<8xf32>
    %c0_16 = arith.constant 0 : index
    %c0_17 = arith.constant 0 : index
    %c0_18 = arith.constant 0 : index
    %34 = vector.load %arg5[%c0_16, %c0_17, %c0_18] : memref<1x1x8xf32, #tpu.memory_space<vmem>>, vector<1x1x8xf32>
    %35 = vector.shape_cast %34 : vector<1x1x8xf32> to vector<8xf32>
    %36 = vector.shape_cast %33 : vector<8xf32> to vector<1x1x8xf32>
    tpu.vector_store %arg5[%c0_16, %c0_17, %c0_18], %36 {strides = array<i32>} : memref<1x1x8xf32, #tpu.memory_space<vmem>>, vector<1x1x8xf32>,
    return
  }
  func.func @transform_0(%arg0: i32) -> (i32, i32) {
    %c0_i32 = arith.constant 0 : i32
    %c0_i32_0 = arith.constant 0 : i32
    return %arg0, %c0_i32 : i32, i32
  }
  func.func @transform_1(%arg0: i32) -> (i32, i32) {
    %c0_i32 = arith.constant 0 : i32
    %c0_i32_0 = arith.constant 0 : i32
    %c0_i32_1 = arith.constant 0 : i32
    return %c0_i32, %c0_i32_0 : i32, i32
  }
  func.func @transform_2(%arg0: i32) -> (i32, i32) {
    %c0_i32 = arith.constant 0 : i32
    %c0_i32_0 = arith.constant 0 : i32
    %c0_i32_1 = arith.constant 0 : i32
    return %c0_i32, %c0_i32_0 : i32, i32
  }
  func.func @transform_3(%arg0: i32) -> (i32, i32, i32) {
    %c0_i32 = arith.constant 0 : i32
    %c0_i32_0 = arith.constant 0 : i32
    %c0_i32_1 = arith.constant 0 : i32
    return %arg0, %c0_i32, %c0_i32_0 : i32, i32, i32
  }
  func.func @transform_4(%arg0: i32) -> (i32, i32, i32) {
    %c0_i32 = arith.constant 0 : i32
    %c0_i32_0 = arith.constant 0 : i32
    %c0_i32_1 = arith.constant 0 : i32
    return %arg0, %c0_i32, %c0_i32_0 : i32, i32, i32
  }
}

</mosaic_0001>

<bundles_post_ra>
// kernel: tpu_custom_call.1
= control target key start
LH: loop header
LB: loop body
LE: loop exit
PB: predicated region body
PF: predicated region fallthrough
CT: control target
= control target key end

     0   :  { %vm144_vm0 = vcmask 130048   ;;  %s5717_s0 = inlined_call_operand.vmem [shape: f32[960,16], index: 0, kind: input, shape index: {}]   ;;  %s5718_s1 = inlined_call_operand.vmem [shape: f32[16,8], index: 1, kind: input, shape index: {}]   ;;  %s5719_s2 = inlined_call_operand.vmem [shape: f32[3,16], index: 2, kind: input, shape index: {}]   ;;  %s5720_s3 = inlined_call_operand.vmem [shape: f32[1,1,8], index: 3, kind: input, shape index: {}]   ;;  %s5721_s4 = inlined_call_operand.hbm [shape: f32[1,1,8], index: 4, kind: output, shape index: {}]  }
   0x1   :  { %v142_v0 = vld [vmem:[%s5718_s1 + $0x8] sm:$0xff]  ;;  %v141_v1 = vld [vmem:[%s5718_s1] sm:$0xff]  ;;  %v48_v4 = vld [vmem:[%s5717_s0 + $0xf0] sm:$0xff] }
   0x2   :  { %519 = vmatpush.msra.mxu0 %v142_v0  ;;  %2795 = vmatpush.msra.mxu2 %v142_v0  ;;  %v18_v2 = vld [vmem:[%s5717_s0] sm:$0xff]  ;;  %v108_v5 = vld [vmem:[%s5717_s0 + $0x2d0] sm:$0xff] }
   0x3   :  { %v78_v3 = vld [vmem:[%s5717_s0 + $0x1e0] sm:$0xff]  ;;  %2794 = vmatpush.msra.mxu1 %v142_v0  ;;  %2796 = vmatpush.msra.mxu3 %v142_v0 }
   0x4   :  { %520 = vmatpush.msra.mxu0 %v141_v1  ;;  %2798 = vmatpush.msra.mxu2 %v141_v1 }
   0x5   :  { %2674 = vmatmul.msk.f32.vlgmr.msra.gmra.mxu0 %vm144_vm0, %v18_v2  ;;  %2734 = vmatmul.msk.f32.vlgmr.msra.gmra.mxu2 %vm144_vm0, %v78_v3 }
   0x6   :  { %2797 = vmatpush.msra.mxu1 %v141_v1  ;;  %2799 = vmatpush.msra.mxu3 %v141_v1 }
   0x7   :  { %2704 = vmatmul.msk.f32.vlgmr.msra.gmra.mxu1 %vm144_vm0, %v48_v4  ;;  %2764 = vmatmul.msk.f32.vlgmr.msra.gmra.mxu3 %vm144_vm0, %v108_v5 }
   0x8   :  { %9 = vsyncpa [#allocation3], 0  ;;  %v79_v6 = vld [vmem:[%s5717_s0 + $0x1e8] sm:$0xff]  ;;  %v49_v8 = vld [vmem:[%s5717_s0 + $0xf8] sm:$0xff]  ;;  %vm1123_vm1 = vcmask 64512   ;;  %vm2582_vm2 = vcmask 1041409  }
   0x9   :  { %v19_v7 = vld [vmem:[%s5717_s0 + $0x8] sm:$0xff]  ;;  %v109_v9 = vld [vmem:[%s5717_s0 + $0x2d8] sm:$0xff]  ;;  %v80_v10 = vld [vmem:[%s5717_s0 + $0x1f0] sm:$0xff]  ;;  %vm2585_vm3 = vcmask 1042434   ;;  %vm2588_vm4 = vcmask 1043459   ;;  %vm2591_vm5 = vcmask 1044484  }
   0xa   :  { %v20_v11 = vld [vmem:[%s5717_s0 + $0x10] sm:$0xff]  ;;  %v50_v12 = vld [vmem:[%s5717_s0 + $0x100] sm:$0xff]  ;;  %v81_v14 = vld [vmem:[%s5717_s0 + $0x1f8] sm:$0xff]  ;;  %vm2594_vm6 = vcmask 1045509   ;;  %vm2597_vm7 = vcmask 1046534   ;;  %vm2600_vm8 = vcmask 1047559  }
   0xb   :  { %v110_v13 = vld [vmem:[%s5717_s0 + $0x2e0] sm:$0xff]  ;;  %v21_v15 = vld [vmem:[%s5717_s0 + $0x18] sm:$0xff]  ;;  %v111_v16 = vld [vmem:[%s5717_s0 + $0x2e8] sm:$0xff]  ;;  %s2665_s5 = sshll.u32 %s5721_s4, 4  ;;  %vm2656_vm13 = vcmask 57344   ;;  %s2666_s5 = int_to_ptr.hbm [resolvable:$true] %s2665_s5 }
   0xc   :  { %v51_v17 = vld [vmem:[%s5717_s0 + $0x108] sm:$0xff]  ;;  %v82_v18 = vld [vmem:[%s5717_s0 + $0x200] sm:$0xff]  ;;  %v112_v20 = vld [vmem:[%s5717_s0 + $0x2f0] sm:$0xff] }
   0xd   :  { %2735 = vmatmul.msk.f32.gmra.mxu2 %vm144_vm0, %v79_v6  ;;  %2675 = vmatmul.msk.f32.gmra.mxu0 %vm144_vm0, %v19_v7  ;;  %v22_v19 = vld [vmem:[%s5717_s0 + $0x20] sm:$0xff]  ;;  %v52_v21 = vld [vmem:[%s5717_s0 + $0x110] sm:$0xff]  ;;  %v83_v22 = vld [vmem:[%s5717_s0 + $0x208] sm:$0xff] }
   0xe   :  { %v23_v23 = vld [vmem:[%s5717_s0 + $0x28] sm:$0xff]  ;;  %v113_v24 = vld [vmem:[%s5717_s0 + $0x2f8] sm:$0xff]  ;;  %v84_v26 = vld [vmem:[%s5717_s0 + $0x210] sm:$0xff] }
   0xf   :  { %2705 = vmatmul.msk.f32.gmra.mxu1 %vm144_vm0, %v49_v8  ;;  %2765 = vmatmul.msk.f32.gmra.mxu3 %vm144_vm0, %v109_v9  ;;  %v53_v25 = vld [vmem:[%s5717_s0 + $0x118] sm:$0xff]  ;;  %v24_v27 = vld [vmem:[%s5717_s0 + $0x30] sm:$0xff]  ;;  %v114_v28 = vld [vmem:[%s5717_s0 + $0x300] sm:$0xff] }
  0x10   :  { %v54_v29 = vld [vmem:[%s5717_s0 + $0x120] sm:$0xff]  ;;  %v85_v30 = vld [vmem:[%s5717_s0 + $0x218] sm:$0xff]  ;;  %v115_v32 = vld [vmem:[%s5717_s0 + $0x308] sm:$0xff] }
  0x11   :  { %v25_v31 = vld [vmem:[%s5717_s0 + $0x38] sm:$0xff]  ;;  %v55_v33 = vld [vmem:[%s5717_s0 + $0x128] sm:$0xff]  ;;  %v86_v34 = vld [vmem:[%s5717_s0 + $0x220] sm:$0xff] }
  0x12   :  { %v26_v35 = vld [vmem:[%s5717_s0 + $0x40] sm:$0xff]  ;;  %v116_v36 = vld [vmem:[%s5717_s0 + $0x310] sm:$0xff]  ;;  %v87_v38 = vld [vmem:[%s5717_s0 + $0x228] sm:$0xff] }
  0x13   :  { %v56_v37 = vld [vmem:[%s5717_s0 + $0x130] sm:$0xff]  ;;  %v27_v39 = vld [vmem:[%s5717_s0 + $0x48] sm:$0xff]  ;;  %v117_v40 = vld [vmem:[%s5717_s0 + $0x318] sm:$0xff] }
  0x14   :  { %v57_v41 = vld [vmem:[%s5717_s0 + $0x138] sm:$0xff]  ;;  %v88_v42 = vld [vmem:[%s5717_s0 + $0x230] sm:$0xff]  ;;  %v118_v44 = vld [vmem:[%s5717_s0 + $0x320] sm:$0xff] }
  0x15   :  { %2736 = vmatmul.msk.f32.gmra.mxu2 %vm144_vm0, %v80_v10  ;;  %2676 = vmatmul.msk.f32.gmra.mxu0 %vm144_vm0, %v20_v11  ;;  %v28_v43 = vld [vmem:[%s5717_s0 + $0x50] sm:$0xff]  ;;  %v58_v45 = vld [vmem:[%s5717_s0 + $0x140] sm:$0xff]  ;;  %v89_v46 = vld [vmem:[%s5717_s0 + $0x238] sm:$0xff] }
  0x16   :  { %v29_v47 = vld [vmem:[%s5717_s0 + $0x58] sm:$0xff]  ;;  %v119_v48 = vld [vmem:[%s5717_s0 + $0x328] sm:$0xff]  ;;  %v90_v49 = vld [vmem:[%s5717_s0 + $0x240] sm:$0xff] }
  0x17   :  { %2706 = vmatmul.msk.f32.gmra.mxu1 %vm144_vm0, %v50_v12  ;;  %2766 = vmatmul.msk.f32.gmra.mxu3 %vm144_vm0, %v110_v13  ;;  %v30_v50 = vld [vmem:[%s5717_s0 + $0x60] sm:$0xff]  ;;  %v59_v51 = vld [vmem:[%s5717_s0 + $0x148] sm:$0xff]  ;;  %v60_v54 = vld [vmem:[%s5717_s0 + $0x150] sm:$0xff] }
  0x18   :  { %v91_v52 = vld [vmem:[%s5717_s0 + $0x248] sm:$0xff]  ;;  %v92_v55 = vld [vmem:[%s5717_s0 + $0x250] sm:$0xff]  ;;  %v61_v56 = vld [vmem:[%s5717_s0 + $0x158] sm:$0xff] }
  0x19   :  { %v31_v53 = vld [vmem:[%s5717_s0 + $0x68] sm:$0xff]  ;;  %v32_v57 = vld [vmem:[%s5717_s0 + $0x70] sm:$0xff]  ;;  %v33_v59 = vld [vmem:[%s5717_s0 + $0x78] sm:$0xff] }
  0x1a   :  { %v120_v58 = vld [vmem:[%s5717_s0 + $0x330] sm:$0xff]  ;;  %v62_v60 = vld [vmem:[%s5717_s0 + $0x160] sm:$0xff]  ;;  %v121_v61 = vld [vmem:[%s5717_s0 + $0x338] sm:$0xff] }
  0x1b   :  { %v3478_v62 = vld [vmem:[%s5719_s2] ss:$0 sm:$0xff]  ;;  %v63_v0 = vld [vmem:[%s5717_s0 + $0x168] sm:$0xff]  ;;  %v93_v1 = vld [vmem:[%s5717_s0 + $0x258] sm:$0xff] }
  0x1c   :  { %v122_v2 = vld [vmem:[%s5717_s0 + $0x340] sm:$0xff] }
  0x1d   :  { %2737 = vmatmul.msk.f32.gmra.mxu2 %vm144_vm0, %v81_v14  ;;  %2677 = vmatmul.msk.f32.gmra.mxu0 %vm144_vm0, %v21_v15  ;;  %v3493_v4 = vld [vmem:[%s5719_s2 + $0x1] ss:$0 sm:$0xff] }
  0x1e   :  { %v34_v15 = vld [vmem:[%s5717_s0 + $0x80] sm:$0xff] }
  0x1f   :  { %2767 = vmatmul.msk.f32.gmra.mxu3 %vm144_vm0, %v111_v16  ;;  %2707 = vmatmul.msk.f32.gmra.mxu1 %vm144_vm0, %v51_v17  ;;  %v94_v16 = vld [vmem:[%s5717_s0 + $0x260] sm:$0xff]  ;;  %v123_v17 = vld [vmem:[%s5717_s0 + $0x348] sm:$0xff] }
  0x25   :  { %2738 = vmatmul.msk.f32.gmra.mxu2 %vm144_vm0, %v82_v18  ;;  %2678 = vmatmul.msk.f32.gmra.mxu0 %vm144_vm0, %v22_v19 }
  0x27   :  { %2768 = vmatmul.msk.f32.gmra.mxu3 %vm144_vm0, %v112_v20  ;;  %2708 = vmatmul.msk.f32.gmra.mxu1 %vm144_vm0, %v52_v21 }
  0x2d   :  { %2739 = vmatmul.msk.f32.gmra.mxu2 %vm144_vm0, %v83_v22  ;;  %2679 = vmatmul.msk.f32.gmra.mxu0 %vm144_vm0, %v23_v23 }
  0x2f   :  { %2769 = vmatmul.msk.f32.gmra.mxu3 %vm144_vm0, %v113_v24  ;;  %2709 = vmatmul.msk.f32.gmra.mxu1 %vm144_vm0, %v53_v25 }
  0x35   :  { %2740 = vmatmul.msk.f32.gmra.mxu2 %vm144_vm0, %v84_v26  ;;  %2680 = vmatmul.msk.f32.gmra.mxu0 %vm144_vm0, %v24_v27 }
  0x37   :  { %2770 = vmatmul.msk.f32.gmra.mxu3 %vm144_vm0, %v114_v28  ;;  %2710 = vmatmul.msk.f32.gmra.mxu1 %vm144_vm0, %v54_v29 }
  0x3d   :  { %2741 = vmatmul.msk.f32.gmra.mxu2 %vm144_vm0, %v85_v30  ;;  %2681 = vmatmul.msk.f32.gmra.mxu0 %vm144_vm0, %v25_v31 }
  0x3f   :  { %2771 = vmatmul.msk.f32.gmra.mxu3 %vm144_vm0, %v115_v32  ;;  %2711 = vmatmul.msk.f32.gmra.mxu1 %vm144_vm0, %v55_v33  ;;  %v35_v33 = vld [vmem:[%s5717_s0 + $0x88] sm:$0xff] }
  0x45   :  { %2742 = vmatmul.msk.f32.gmra.mxu2 %vm144_vm0, %v86_v34  ;;  %2682 = vmatmul.msk.f32.gmra.mxu0 %vm144_vm0, %v26_v35  ;;  %v64_v34 = vld [vmem:[%s5717_s0 + $0x170] sm:$0xff]  ;;  %v95_v35 = vld [vmem:[%s5717_s0 + $0x268] sm:$0xff] }
  0x47   :  { %2772 = vmatmul.msk.f32.gmra.mxu3 %vm144_vm0, %v116_v36  ;;  %2712 = vmatmul.msk.f32.gmra.mxu1 %vm144_vm0, %v56_v37 }
  0x4d   :  { %2743 = vmatmul.msk.f32.gmra.mxu2 %vm144_vm0, %v87_v38  ;;  %2683 = vmatmul.msk.f32.gmra.mxu0 %vm144_vm0, %v27_v39  ;;  %v124_v39 = vld [vmem:[%s5717_s0 + $0x350] sm:$0xff] }
  0x4f   :  { %2773 = vmatmul.msk.f32.gmra.mxu3 %vm144_vm0, %v117_v40  ;;  %2713 = vmatmul.msk.f32.gmra.mxu1 %vm144_vm0, %v57_v41 }
  0x55   :  { %2744 = vmatmul.msk.f32.gmra.mxu2 %vm144_vm0, %v88_v42  ;;  %2684 = vmatmul.msk.f32.gmra.mxu0 %vm144_vm0, %v28_v43 }
  0x57   :  { %2774 = vmatmul.msk.f32.gmra.mxu3 %vm144_vm0, %v118_v44  ;;  %2714 = vmatmul.msk.f32.gmra.mxu1 %vm144_vm0, %v58_v45 }
  0x5d   :  { %2745 = vmatmul.msk.f32.gmra.mxu2 %vm144_vm0, %v89_v46  ;;  %2685 = vmatmul.msk.f32.gmra.mxu0 %vm144_vm0, %v29_v47 }
  0x5f   :  { %2775 = vmatmul.msk.f32.gmra.mxu3 %vm144_vm0, %v119_v48  ;;  %2715 = vmatmul.msk.f32.gmra.mxu1 %vm144_vm0, %v59_v51 }
  0x65   :  { %2746 = vmatmul.msk.f32.gmra.mxu2 %vm144_vm0, %v90_v49  ;;  %2686 = vmatmul.msk.f32.gmra.mxu0 %vm144_vm0, %v30_v50 }
  0x67   :  { %2716 = vmatmul.msk.f32.gmra.mxu1 %vm144_vm0, %v60_v54  ;;  %2776 = vmatmul.msk.f32.gmra.mxu3 %vm144_vm0, %v120_v58  ;;  %v36_v58 = vld [vmem:[%s5717_s0 + $0x90] sm:$0xff] }
  0x6d   :  { %2747 = vmatmul.msk.f32.gmra.mxu2 %vm144_vm0, %v91_v52  ;;  %2687 = vmatmul.msk.f32.gmra.mxu0 %vm144_vm0, %v31_v53 }
  0x6f   :  { %2717 = vmatmul.msk.f32.gmra.mxu1 %vm144_vm0, %v61_v56  ;;  %2777 = vmatmul.msk.f32.gmra.mxu3 %vm144_vm0, %v121_v61  ;;  %v125_v61 = vld [vmem:[%s5717_s0 + $0x358] sm:$0xff] }
  0x75   :  { %2748 = vmatmul.msk.f32.gmra.mxu2 %vm144_vm0, %v92_v55  ;;  %2688 = vmatmul.msk.f32.gmra.mxu0 %vm144_vm0, %v32_v57  ;;  %v65_v57 = vld [vmem:[%s5717_s0 + $0x178] sm:$0xff] }
  0x77   :  { %2718 = vmatmul.msk.f32.gmra.mxu1 %vm144_vm0, %v62_v60  ;;  %2778 = vmatmul.msk.f32.gmra.mxu3 %vm144_vm0, %v122_v2 }
  0x7d   :  { %2689 = vmatmul.msk.f32.gmra.mxu0 %vm144_vm0, %v33_v59  ;;  %2749 = vmatmul.msk.f32.gmra.mxu2 %vm144_vm0, %v93_v1  ;;  %v96_v59 = vld [vmem:[%s5717_s0 + $0x270] sm:$0xff] }
  0x7f   :  { %2719 = vmatmul.msk.f32.gmra.mxu1 %vm144_vm0, %v63_v0  ;;  %2779 = vmatmul.msk.f32.gmra.mxu3 %vm144_vm0, %v123_v17  ;;  %v126_v17 = vld [vmem:[%s5717_s0 + $0x360] sm:$0xff] }
  0x82   :  { %v522_v63 = vpop.f32.mrf.mxu0 }
  0x83   :  { %v523_v3 = vadd.f32 %v3478_v62, %v522_v63 }
  0x84   :  { %v612_v5 = vpop.f32.mrf.mxu1 }
  0x85   :  { %v882_v6 = vmax.f32 %v523_v3, 0.0  ;;  %v613_v7 = vadd.f32 %v3478_v62, %v612_v5  ;;  %2690 = vmatmul.msk.f32.gmra.mxu0 %vm144_vm0, %v34_v15  ;;  %2750 = vmatmul.msk.f32.gmra.mxu2 %vm144_vm0, %v94_v16  ;;  %v66_v15 = vld [vmem:[%s5717_s0 + $0x180] sm:$0xff]  ;;  %v97_v16 = vld [vmem:[%s5717_s0 + $0x278] sm:$0xff] }
  0x87   :  { %v1003_v8 = vmul.f32 %v3493_v4, %v882_v6  ;;  %v912_v10 = vmax.f32 %v613_v7, 0.0  ;;  %2720 = vmatmul.msk.f32.gmra.mxu1 %vm144_vm0, %v64_v34  ;;  %2780 = vmatmul.msk.f32.gmra.mxu3 %vm144_vm0, %v124_v39  ;;  %v98_v34 = vld [vmem:[%s5717_s0 + $0x280] sm:$0xff] }
  0x88   :  { %v702_v9 = vpop.f32.mrf.mxu2 }
  0x89   :  { %v703_v11 = vadd.f32 %v3478_v62, %v702_v9  ;;  %v1124_v12 = vsel %vm1123_vm1, %v1003_v8, 0.0  ;;  %v1033_v23 = vmul.f32 %v3493_v4, %v912_v10 }
  0x8a   :  { %1125 = vadd.xlane.f32.xlu0 %v1124_v12  ;;  %v792_v13 = vpop.f32.mrf.mxu3  ;;  %v525_v14 = vpop.f32.mrf.mxu0 }
  0x8b   :  { %v942_v18 = vmax.f32 %v703_v11, 0.0  ;;  %v793_v19 = vadd.f32 %v3478_v62, %v792_v13  ;;  %v1214_v29 = vsel %vm1123_vm1, %v1033_v23, 0.0  ;;  %v526_v41 = vadd.f32 %v3478_v62, %v525_v14 }
  0x8c   :  { %v615_v20 = vpop.f32.mrf.mxu1 }
  0x8d   :  { %v1063_v21 = vmul.f32 %v3493_v4, %v942_v18  ;;  %v616_v22 = vadd.f32 %v3478_v62, %v615_v20  ;;  %v972_v24 = vmax.f32 %v793_v19, 0.0  ;;  %2691 = vmatmul.msk.f32.gmra.mxu0 %vm144_vm0, %v35_v33  ;;  %2751 = vmatmul.msk.f32.gmra.mxu2 %vm144_vm0, %v95_v35  ;;  %v883_v49 = vmax.f32 %v526_v41, 0.0  ;;  %v127_v35 = vld [vmem:[%s5717_s0 + $0x368] sm:$0xff] }
  0x8f   :  { %v1304_v25 = vsel %vm1123_vm1, %v1063_v21, 0.0  ;;  %v913_v26 = vmax.f32 %v616_v22, 0.0  ;;  %v1093_v38 = vmul.f32 %v3493_v4, %v972_v24  ;;  %2721 = vmatmul.msk.f32.gmra.mxu1 %vm144_vm0, %v65_v57  ;;  %v1004_v63 = vmul.f32 %v3493_v4, %v883_v49  ;;  %2781 = vmatmul.msk.f32.gmra.mxu3 %vm144_vm0, %v125_v61 }
  0x90   :  { %v705_v27 = vpop.f32.mrf.mxu2  ;;  %1305 = vadd.xlane.f32.xlu1 %v1304_v25 }
  0x91   :  { %v706_v28 = vadd.f32 %v3478_v62, %v705_v27  ;;  %v1034_v30 = vmul.f32 %v3493_v4, %v913_v26  ;;  %v1394_v48 = vsel %vm1123_vm1, %v1093_v38, 0.0  ;;  %v1127_v6 = vsel %vm1123_vm1, %v1004_v63, 0.0 }
  0x92   :  { %1215 = vadd.xlane.f32.xlu0 %v1214_v29  ;;  %v795_v31 = vpop.f32.mrf.mxu3  ;;  %v528_v32 = vpop.f32.mrf.mxu0 }
  0x93   :  { %v943_v36 = vmax.f32 %v706_v28, 0.0  ;;  %v796_v37 = vadd.f32 %v3478_v62, %v795_v31  ;;  %v1217_v45 = vsel %vm1123_vm1, %v1034_v30, 0.0  ;;  %v529_v54 = vadd.f32 %v3478_v62, %v528_v32 }
  0x94   :  { %v618_v40 = vpop.f32.mrf.mxu1 }
  0x95   :  { %v973_v42 = vmax.f32 %v796_v37, 0.0  ;;  %v1064_v43 = vmul.f32 %v3493_v4, %v943_v36  ;;  %v619_v44 = vadd.f32 %v3478_v62, %v618_v40  ;;  %2692 = vmatmul.msk.f32.gmra.mxu0 %vm144_vm0, %v36_v58  ;;  %2752 = vmatmul.msk.f32.gmra.mxu2 %vm144_vm0, %v96_v59  ;;  %v884_v3 = vmax.f32 %v529_v54, 0.0 }
  0x97   :  { %v1307_v46 = vsel %vm1123_vm1, %v1064_v43, 0.0  ;;  %v914_v47 = vmax.f32 %v619_v44, 0.0  ;;  %v1094_v53 = vmul.f32 %v3493_v4, %v973_v42  ;;  %v1005_v12 = vmul.f32 %v3493_v4, %v884_v3  ;;  %2722 = vmatmul.msk.f32.gmra.mxu1 %vm144_vm0, %v66_v15  ;;  %2782 = vmatmul.msk.f32.gmra.mxu3 %vm144_vm0, %v126_v17 }
  0x98   :  { %1308 = vadd.xlane.f32.xlu2 %v1307_v46  ;;  %1218 = vadd.xlane.f32.xlu1 %v1217_v45  ;;  %v708_v50 = vpop.f32.mrf.mxu2 }
  0x99   :  { %v709_v51 = vadd.f32 %v3478_v62, %v708_v50  ;;  %v1035_v52 = vmul.f32 %v3493_v4, %v914_v47  ;;  %v1397_v2 = vsel %vm1123_vm1, %v1094_v53, 0.0  ;;  %v1130_v23 = vsel %vm1123_vm1, %v1005_v12, 0.0  ;;  %v128_v53 = vld [vmem:[%s5717_s0 + $0x370] sm:$0xff] }
  0x9a   :  { %1395 = vadd.xlane.f32.xlu0 %v1394_v48  ;;  %v798_v55 = vpop.f32.mrf.mxu3  ;;  %v531_v56 = vpop.f32.mrf.mxu0 }
  0x9b   :  { %v799_v60 = vadd.f32 %v3478_v62, %v798_v55  ;;  %v944_v0 = vmax.f32 %v709_v51, 0.0  ;;  %v1220_v1 = vsel %vm1123_vm1, %v1035_v52, 0.0  ;;  %v532_v11 = vadd.f32 %v3478_v62, %v531_v56  ;;  %v37_v51 = vld [vmem:[%s5717_s0 + $0x98] sm:$0xff]  ;;  %v67_v52 = vld [vmem:[%s5717_s0 + $0x188] sm:$0xff] }
  0x9c   :  { %v621_v8 = vpop.f32.mrf.mxu1 }
  0x9d   :  { %v974_v5 = vmax.f32 %v799_v60, 0.0  ;;  %v1065_v10 = vmul.f32 %v3493_v4, %v944_v0  ;;  %v622_v18 = vadd.f32 %v3478_v62, %v621_v8  ;;  %2753 = vmatmul.msk.f32.gmra.mxu2 %vm144_vm0, %v97_v16  ;;  %v885_v22 = vmax.f32 %v532_v11, 0.0  ;;  %2693 = vmatmul.msk.f32.gmra.mxu0 %vm144_vm0, %v37_v51 }
  0x9f   :  { %v1095_v19 = vmul.f32 %v3493_v4, %v974_v5  ;;  %v1310_v21 = vsel %vm1123_vm1, %v1065_v10, 0.0  ;;  %v915_v24 = vmax.f32 %v622_v18, 0.0  ;;  %v1006_v31 = vmul.f32 %v3493_v4, %v885_v22  ;;  %2783 = vmatmul.msk.f32.gmra.mxu3 %vm144_vm0, %v127_v35  ;;  %2723 = vmatmul.msk.f32.gmra.mxu1 %vm144_vm0, %v67_v52 }
  0xa0   :  { %1221 = vadd.xlane.f32.xlu2 %v1220_v1  ;;  %1398 = vadd.xlane.f32.xlu1 %v1397_v2  ;;  %v711_v7 = vpop.f32.mrf.mxu2 }
  0xa1   :  { %v712_v9 = vadd.f32 %v3478_v62, %v711_v7  ;;  %v1400_v25 = vsel %vm1123_vm1, %v1095_v19, 0.0  ;;  %v1036_v37 = vmul.f32 %v3493_v4, %v915_v24  ;;  %v1133_v41 = vsel %vm1123_vm1, %v1006_v31, 0.0  ;;  %v68_v7 = vld [vmem:[%s5717_s0 + $0x190] sm:$0xff]  ;;  %v39_v24 = vld [vmem:[%s5717_s0 + $0xa8] sm:$0xff] }
  0xa2   :  { %1128 = vadd.xlane.f32.xlu0 %v1127_v6  ;;  %v801_v13 = vpop.f32.mrf.mxu3  ;;  %v534_v14 = vpop.f32.mrf.mxu0  ;;  %v38_v6 = vld [vmem:[%s5717_s0 + $0xa0] sm:$0xff] }
  0xa3   :  { %v945_v20 = vmax.f32 %v712_v9, 0.0  ;;  %v802_v28 = vadd.f32 %v3478_v62, %v801_v13  ;;  %v535_v30 = vadd.f32 %v3478_v62, %v534_v14  ;;  %v1223_v43 = vsel %vm1123_vm1, %v1036_v37, 0.0 }
  0xa4   :  { %v624_v27 = vpop.f32.mrf.mxu1 }
  0xa5   :  { %v1066_v29 = vmul.f32 %v3493_v4, %v945_v20  ;;  %2754 = vmatmul.msk.f32.gmra.mxu2 %vm144_vm0, %v98_v34  ;;  %v975_v38 = vmax.f32 %v802_v28, 0.0  ;;  %v886_v40 = vmax.f32 %v535_v30, 0.0  ;;  %v625_v46 = vadd.f32 %v3478_v62, %v624_v27  ;;  %2694 = vmatmul.msk.f32.gmra.mxu0 %vm144_vm0, %v38_v6 }
  0xa7   :  { %v1313_v39 = vsel %vm1123_vm1, %v1066_v29, 0.0  ;;  %v1007_v47 = vmul.f32 %v3493_v4, %v886_v40  ;;  %v1096_v48 = vmul.f32 %v3493_v4, %v975_v38  ;;  %2784 = vmatmul.msk.f32.gmra.mxu3 %vm144_vm0, %v128_v53  ;;  %v916_v58 = vmax.f32 %v625_v46, 0.0  ;;  %2724 = vmatmul.msk.f32.gmra.mxu1 %vm144_vm0, %v68_v7 }
  0xa8   :  { %1311 = vadd.xlane.f32.xlu2 %v1310_v21  ;;  %1131 = vadd.xlane.f32.xlu1 %v1130_v23  ;;  %v714_v26 = vpop.f32.mrf.mxu2 }
  0xa9   :  { %v715_v36 = vadd.f32 %v3478_v62, %v714_v26  ;;  %v1136_v59 = vsel %vm1123_vm1, %v1007_v47, 0.0  ;;  %v1403_v60 = vsel %vm1123_vm1, %v1096_v48, 0.0  ;;  %v1037_v5 = vmul.f32 %v3493_v4, %v916_v58  ;;  %v99_v26 = vld [vmem:[%s5717_s0 + $0x288] sm:$0xff]  ;;  %v100_v48 = vld [vmem:[%s5717_s0 + $0x290] sm:$0xff] }
  0xaa   :  { %1401 = vadd.xlane.f32.xlu0 %v1400_v25  ;;  %v804_v32 = vpop.f32.mrf.mxu3  ;;  %v537_v33 = vpop.f32.mrf.mxu0  ;;  %v69_v25 = vld [vmem:[%s5717_s0 + $0x198] sm:$0xff] }
  0xab   :  { %v946_v42 = vmax.f32 %v715_v36, 0.0  ;;  %v805_v45 = vadd.f32 %v3478_v62, %v804_v32  ;;  %v538_v1 = vadd.f32 %v3478_v62, %v537_v33  ;;  %v1226_v15 = vsel %vm1123_vm1, %v1037_v5, 0.0 }
  0xac   :  { %v627_v50 = vpop.f32.mrf.mxu1 }
  0xad   :  { %v1067_v55 = vmul.f32 %v3493_v4, %v946_v42  ;;  %v976_v57 = vmax.f32 %v805_v45, 0.0  ;;  %v887_v12 = vmax.f32 %v538_v1, 0.0  ;;  %v628_v20 = vadd.f32 %v3478_v62, %v627_v50  ;;  %2695 = vmatmul.msk.f32.gmra.mxu0 %vm144_vm0, %v39_v24  ;;  %2755 = vmatmul.msk.f32.gmra.mxu2 %vm144_vm0, %v99_v26  ;;  %v40_v42 = vld [vmem:[%s5717_s0 + $0xb0] sm:$0xff] }
  0xaf   :  { %v1316_v63 = vsel %vm1123_vm1, %v1067_v55, 0.0  ;;  %v1097_v3 = vmul.f32 %v3493_v4, %v976_v57  ;;  %v1008_v22 = vmul.f32 %v3493_v4, %v887_v12  ;;  %2725 = vmatmul.msk.f32.gmra.mxu1 %vm144_vm0, %v69_v25  ;;  %v917_v29 = vmax.f32 %v628_v20, 0.0 }
  0xb0   :  { %1314 = vadd.xlane.f32.xlu2 %v1313_v39  ;;  %1134 = vadd.xlane.f32.xlu1 %v1133_v41  ;;  %v717_v44 = vpop.f32.mrf.mxu2 }
  0xb1   :  { %v718_v2 = vadd.f32 %v3478_v62, %v717_v44  ;;  %v1406_v14 = vsel %vm1123_vm1, %v1097_v3, 0.0  ;;  %v1139_v31 = vsel %vm1123_vm1, %v1008_v22, 0.0  ;;  %v1038_v39 = vmul.f32 %v3493_v4, %v917_v29  ;;  %v129_v44 = vld [vmem:[%s5717_s0 + $0x378] sm:$0xff]  ;;  %v131_v22 = vld [vmem:[%s5717_s0 + $0x388] sm:$0xff] }
  0xb2   :  { %1224 = vadd.xlane.f32.xlu0 %v1223_v43  ;;  %v807_v49 = vpop.f32.mrf.mxu3  ;;  %v540_v56 = vpop.f32.mrf.mxu0  ;;  %v70_v43 = vld [vmem:[%s5717_s0 + $0x1a0] sm:$0xff]  ;;  %2785 = vmatmul.msk.f32.gmra.mxu3 %vm144_vm0, %v129_v44 }
  0xb3   :  { %v808_v54 = vadd.f32 %v3478_v62, %v807_v49  ;;  %v541_v8 = vadd.f32 %v3478_v62, %v540_v56  ;;  %v947_v13 = vmax.f32 %v718_v2, 0.0  ;;  %v1229_v50 = vsel %vm1123_vm1, %v1038_v39, 0.0 }
  0xb4   :  { %v630_v10 = vpop.f32.mrf.mxu1 }
  0xb5   :  { %v977_v61 = vmax.f32 %v808_v54, 0.0  ;;  %v888_v17 = vmax.f32 %v541_v8, 0.0  ;;  %v1068_v23 = vmul.f32 %v3493_v4, %v947_v13  ;;  %v631_v27 = vadd.f32 %v3478_v62, %v630_v10  ;;  %2696 = vmatmul.msk.f32.gmra.mxu0 %vm144_vm0, %v40_v42  ;;  %2756 = vmatmul.msk.f32.gmra.mxu2 %vm144_vm0, %v100_v48 }
  0xb7   :  { %v1098_v9 = vmul.f32 %v3493_v4, %v977_v61  ;;  %v1009_v28 = vmul.f32 %v3493_v4, %v888_v17  ;;  %v1319_v32 = vsel %vm1123_vm1, %v1068_v23, 0.0  ;;  %v918_v35 = vmax.f32 %v631_v27, 0.0  ;;  %2726 = vmatmul.msk.f32.gmra.mxu1 %vm144_vm0, %v70_v43  ;;  %v130_v61 = vld [vmem:[%s5717_s0 + $0x380] sm:$0xff] }
  0xb8   :  { %1137 = vadd.xlane.f32.xlu2 %v1136_v59  ;;  %1404 = vadd.xlane.f32.xlu1 %v1403_v60  ;;  %v720_v0 = vpop.f32.mrf.mxu2  ;;  %v71_v59 = vld [vmem:[%s5717_s0 + $0x1a8] sm:$0xff]  ;;  %v101_v60 = vld [vmem:[%s5717_s0 + $0x298] sm:$0xff] }
  0xb9   :  { %v1409_v18 = vsel %vm1123_vm1, %v1098_v9, 0.0  ;;  %v1142_v36 = vsel %vm1123_vm1, %v1009_v28, 0.0  ;;  %v721_v45 = vadd.f32 %v3478_v62, %v720_v0  ;;  %v1039_v47 = vmul.f32 %v3493_v4, %v918_v35 }
  0xba   :  { %1317 = vadd.xlane.f32.xlu0 %v1316_v63  ;;  %v810_v11 = vpop.f32.mrf.mxu3  ;;  %v543_v16 = vpop.f32.mrf.mxu0  ;;  %2786 = vmatmul.msk.f32.gmra.mxu3 %vm144_vm0, %v130_v61  ;;  %v103_v61 = vld [vmem:[%s5717_s0 + $0x2a8] sm:$0xff] }
  0xbb   :  { %v544_v21 = vadd.f32 %v3478_v62, %v543_v16  ;;  %v948_v52 = vmax.f32 %v721_v45, 0.0  ;;  %v1232_v54 = vsel %vm1123_vm1, %v1039_v47, 0.0  ;;  %v811_v57 = vadd.f32 %v3478_v62, %v810_v11 }
  0xbc   :  { %v633_v33 = vpop.f32.mrf.mxu1 }
  0xbd   :  { %v889_v30 = vmax.f32 %v544_v21, 0.0  ;;  %v634_v38 = vadd.f32 %v3478_v62, %v633_v33  ;;  %v1069_v0 = vmul.f32 %v3493_v4, %v948_v52  ;;  %2757 = vmatmul.msk.f32.gmra.mxu2 %vm144_vm0, %v101_v60  ;;  %v978_v7 = vmax.f32 %v811_v57, 0.0  ;;  %v42_v33 = vld [vmem:[%s5717_s0 + $0xc0] sm:$0xff]  ;;  %v43_v52 = vld [vmem:[%s5717_s0 + $0xc8] sm:$0xff]  ;;  %v132_v57 = vld [vmem:[%s5717_s0 + $0x390] sm:$0xff] }
  0xbf   :  { %v1010_v40 = vmul.f32 %v3493_v4, %v889_v30  ;;  %v919_v49 = vmax.f32 %v634_v38, 0.0  ;;  %2727 = vmatmul.msk.f32.gmra.mxu1 %vm144_vm0, %v71_v59  ;;  %v1322_v9 = vsel %vm1123_vm1, %v1069_v0, 0.0  ;;  %v1099_v13 = vmul.f32 %v3493_v4, %v978_v7  ;;  %v102_v38 = vld [vmem:[%s5717_s0 + $0x2a0] sm:$0xff] }
  0xc0   :  { %1407 = vadd.xlane.f32.xlu2 %v1406_v14  ;;  %1227 = vadd.xlane.f32.xlu1 %v1226_v15  ;;  %v723_v19 = vpop.f32.mrf.mxu2  ;;  %v41_v14 = vld [vmem:[%s5717_s0 + $0xb8] sm:$0xff] }
  0xc1   :  { %v1145_v51 = vsel %vm1123_vm1, %v1010_v40, 0.0  ;;  %v1040_v56 = vmul.f32 %v3493_v4, %v919_v49  ;;  %v724_v63 = vadd.f32 %v3478_v62, %v723_v19  ;;  %2697 = vmatmul.msk.f32.gmra.mxu0 %vm144_vm0, %v41_v14  ;;  %v1412_v23 = vsel %vm1123_vm1, %v1099_v13, 0.0  ;;  %v74_v13 = vld [vmem:[%s5717_s0 + $0x1c0] sm:$0xff] }
  0xc2   :  { %1410 = vadd.xlane.f32.xlu0 %v1409_v18  ;;  %v813_v34 = vpop.f32.mrf.mxu3  ;;  %v546_v41 = vpop.f32.mrf.mxu0  ;;  %2787 = vmatmul.msk.f32.gmra.mxu3 %vm144_vm0, %v131_v22 }
  0xc3   :  { %v1235_v6 = vsel %vm1123_vm1, %v1040_v56, 0.0  ;;  %v949_v8 = vmax.f32 %v724_v63, 0.0  ;;  %v547_v12 = vadd.f32 %v3478_v62, %v546_v41  ;;  %v814_v15 = vadd.f32 %v3478_v62, %v813_v34  ;;  %v72_v34 = vld [vmem:[%s5717_s0 + $0x1b0] sm:$0xff]  ;;  %v73_v56 = vld [vmem:[%s5717_s0 + $0x1b8] sm:$0xff] }
  0xc4   :  { %v636_v58 = vpop.f32.mrf.mxu1 }
  0xc5   :  { %v1070_v17 = vmul.f32 %v3493_v4, %v949_v8  ;;  %v890_v21 = vmax.f32 %v547_v12, 0.0  ;;  %v979_v26 = vmax.f32 %v814_v15, 0.0  ;;  %v637_v30 = vadd.f32 %v3478_v62, %v636_v58  ;;  %2758 = vmatmul.msk.f32.gmra.mxu2 %vm144_vm0, %v102_v38 }
  0xc7   :  { %v1325_v28 = vsel %vm1123_vm1, %v1070_v17, 0.0  ;;  %2728 = vmatmul.msk.f32.gmra.mxu1 %vm144_vm0, %v72_v34  ;;  %v920_v39 = vmax.f32 %v637_v30, 0.0  ;;  %v133_v17 = vld [vmem:[%s5717_s0 + $0x398] sm:$0xff] }
  0xc8   :  { %1140 = vadd.xlane.f32.xlu2 %v1139_v31  ;;  %1320 = vadd.xlane.f32.xlu1 %v1319_v32  ;;  %v726_v37 = vpop.f32.mrf.mxu2  ;;  %v1011_v32 = vmul.f32 %v3493_v4, %v890_v21 }
  0xc9   :  { %v727_v46 = vadd.f32 %v3478_v62, %v726_v37  ;;  %2698 = vmatmul.msk.f32.gmra.mxu0 %vm144_vm0, %v42_v33  ;;  %v1041_v49 = vmul.f32 %v3493_v4, %v920_v39 }
  0xca   :  { %1143 = vadd.xlane.f32.xlu0 %v1142_v36  ;;  %v816_v55 = vpop.f32.mrf.mxu3  ;;  %v549_v3 = vpop.f32.mrf.mxu0  ;;  %v1100_v36 = vmul.f32 %v3493_v4, %v979_v26  ;;  %v1148_v41 = vsel %vm1123_vm1, %v1011_v32, 0.0  ;;  %2788 = vmatmul.msk.f32.gmra.mxu3 %vm144_vm0, %v132_v57 }
  0xcb   :  { %v950_v53 = vmax.f32 %v727_v46, 0.0  ;;  %v817_v1 = vadd.f32 %v3478_v62, %v816_v55  ;;  %v550_v16 = vadd.f32 %v3478_v62, %v549_v3  ;;  %v1238_v59 = vsel %vm1123_vm1, %v1041_v49, 0.0 }
  0xcc   :  { %v639_v19 = vpop.f32.mrf.mxu1  ;;  %v1415_v45 = vsel %vm1123_vm1, %v1100_v36, 0.0 }
  0xcd   :  { %v1071_v2 = vmul.f32 %v3493_v4, %v950_v53  ;;  %v980_v10 = vmax.f32 %v817_v1, 0.0  ;;  %v891_v27 = vmax.f32 %v550_v16, 0.0  ;;  %v640_v35 = vadd.f32 %v3478_v62, %v639_v19  ;;  %2759 = vmatmul.msk.f32.gmra.mxu2 %vm144_vm0, %v103_v61  ;;  %v104_v16 = vld [vmem:[%s5717_s0 + $0x2b0] sm:$0xff] }
  0xcf   :  { %v1328_v11 = vsel %vm1123_vm1, %v1071_v2, 0.0  ;;  %v1101_v18 = vmul.f32 %v3493_v4, %v980_v10  ;;  %v1012_v37 = vmul.f32 %v3493_v4, %v891_v27  ;;  %v921_v44 = vmax.f32 %v640_v35, 0.0  ;;  %2729 = vmatmul.msk.f32.gmra.mxu1 %vm144_vm0, %v73_v56  ;;  %v134_v35 = vld [vmem:[%s5717_s0 + $0x3a0] sm:$0xff] }
  0xd0   :  { %1230 = vadd.xlane.f32.xlu2 %v1229_v50  ;;  %1146 = vadd.xlane.f32.xlu1 %v1145_v51  ;;  %v3709_v5 = vpop.f32.mrf.mxu2 }
  0xd1   :  { %v1418_v29 = vsel %vm1123_vm1, %v1101_v18, 0.0  ;;  %v1151_v46 = vsel %vm1123_vm1, %v1012_v37, 0.0  ;;  %v730_v53 = vadd.f32 %v3478_v62, %v3709_v5  ;;  %v1042_v55 = vmul.f32 %v3493_v4, %v921_v44  ;;  %2699 = vmatmul.msk.f32.gmra.mxu0 %vm144_vm0, %v43_v52  ;;  %v75_v44 = vld [vmem:[%s5717_s0 + $0x1c8] sm:$0xff] }
  0xd2   :  { %1233 = vadd.xlane.f32.xlu0 %v1232_v54  ;;  %v3726_v20 = vpop.f32.mrf.mxu3  ;;  %v552_v24 = vpop.f32.mrf.mxu0  ;;  %2789 = vmatmul.msk.f32.gmra.mxu3 %vm144_vm0, %v133_v17 }
  0xd3   :  { %v553_v31 = vadd.f32 %v3478_v62, %v552_v24  ;;  %v951_v63 = vmax.f32 %v730_v53, 0.0  ;;  %v1241_v1 = vsel %vm1123_vm1, %v1042_v55, 0.0  ;;  %v820_v5 = vadd.f32 %v3478_v62, %v3726_v20  ;;  %v44_v24 = vld [vmem:[%s5717_s0 + $0xd0] sm:$0xff] }
  0xd4   :  { %v642_v42 = vpop.f32.mrf.mxu1 }
  0xd5   :  { %v892_v40 = vmax.f32 %v553_v31, 0.0  ;;  %v643_v48 = vadd.f32 %v3478_v62, %v642_v42  ;;  %v1072_v8 = vmul.f32 %v3493_v4, %v951_v63  ;;  %v981_v15 = vmax.f32 %v820_v5, 0.0  ;;  %2760 = vmatmul.msk.f32.gmra.mxu2 %vm144_vm0, %v104_v16 }
  0xd7   :  { %v1013_v50 = vmul.f32 %v3493_v4, %v892_v40  ;;  %v922_v58 = vmax.f32 %v643_v48, 0.0  ;;  %2730 = vmatmul.msk.f32.gmra.mxu1 %vm144_vm0, %v74_v13  ;;  %v1331_v19 = vsel %vm1123_vm1, %v1072_v8, 0.0  ;;  %v1102_v26 = vmul.f32 %v3493_v4, %v981_v15 }
  0xd8   :  { %1323 = vadd.xlane.f32.xlu2 %v1322_v9  ;;  %1236 = vadd.xlane.f32.xlu1 %v1235_v6  ;;  %v732_v25 = vpop.f32.mrf.mxu2 }
  0xd9   :  { %v1154_v60 = vsel %vm1123_vm1, %v1013_v50, 0.0  ;;  %v1043_v3 = vmul.f32 %v3493_v4, %v922_v58  ;;  %v733_v7 = vadd.f32 %v3478_v62, %v732_v25  ;;  %2700 = vmatmul.msk.f32.gmra.mxu0 %vm144_vm0, %v44_v24  ;;  %v1421_v37 = vsel %vm1123_vm1, %v1102_v26, 0.0  ;;  %v105_v50 = vld [vmem:[%s5717_s0 + $0x2b8] sm:$0xff] }
  0xda   :  { %1329 = vadd.xlane.f32.xlu0 %v1328_v11  ;;  %v822_v43 = vpop.f32.mrf.mxu3  ;;  %v555_v51 = vpop.f32.mrf.mxu0  ;;  %2790 = vmatmul.msk.f32.gmra.mxu3 %vm144_vm0, %v134_v35 }
  0xdb   :  { %v1244_v14 = vsel %vm1123_vm1, %v1043_v3, 0.0  ;;  %v952_v18 = vmax.f32 %v733_v7, 0.0  ;;  %v556_v22 = vadd.f32 %v3478_v62, %v555_v51 }
  0xdc   :  { %v645_v6 = vpop.f32.mrf.mxu1 }
  0xdd   :  { %v1073_v27 = vmul.f32 %v3493_v4, %v952_v18  ;;  %v893_v30 = vmax.f32 %v556_v22, 0.0  ;;  %v646_v40 = vadd.f32 %v3478_v62, %v645_v6  ;;  %2761 = vmatmul.msk.f32.gmra.mxu2 %vm144_vm0, %v105_v50 }
  0xdf   :  { %v1334_v38 = vsel %vm1123_vm1, %v1073_v27, 0.0  ;;  %v1014_v42 = vmul.f32 %v3493_v4, %v893_v30  ;;  %2731 = vmatmul.msk.f32.gmra.mxu1 %vm144_vm0, %v75_v44  ;;  %v923_v51 = vmax.f32 %v646_v40, 0.0  ;;  %v106_v30 = vld [vmem:[%s5717_s0 + $0x2c0] sm:$0xff]  ;;  %v47_v44 = vld [vmem:[%s5717_s0 + $0xe8] sm:$0xff] }
  0xe0   :  { %1413 = vadd.xlane.f32.xlu2 %v1412_v23  ;;  %1326 = vadd.xlane.f32.xlu1 %v1325_v28  ;;  %v735_v47 = vpop.f32.mrf.mxu2  ;;  %v823_v23 = vadd.f32 %v3478_v62, %v822_v43 }
  0xe1   :  { %v736_v54 = vadd.f32 %v3478_v62, %v735_v47  ;;  %v1044_v63 = vmul.f32 %v3493_v4, %v923_v51 }
  0xe2   :  { %1419 = vadd.xlane.f32.xlu0 %v1418_v29  ;;  %v825_v2 = vpop.f32.mrf.mxu3  ;;  %v558_v11 = vpop.f32.mrf.mxu0  ;;  %v982_v32 = vmax.f32 %v823_v23, 0.0 }
  0xe3   :  { %v953_v0 = vmax.f32 %v736_v54, 0.0  ;;  %v826_v9 = vadd.f32 %v3478_v62, %v825_v2  ;;  %v559_v25 = vadd.f32 %v3478_v62, %v558_v11  ;;  %v1157_v54 = vsel %vm1123_vm1, %v1014_v42, 0.0 }
  0xe4   :  { %v648_v29 = vpop.f32.mrf.mxu1  ;;  %v1103_v48 = vmul.f32 %v3493_v4, %v982_v32  ;;  %v1247_v13 = vsel %vm1123_vm1, %v1044_v63, 0.0 }
  0xe5   :  { %v1074_v10 = vmul.f32 %v3493_v4, %v953_v0  ;;  %v983_v20 = vmax.f32 %v826_v9, 0.0  ;;  %v894_v36 = vmax.f32 %v559_v25, 0.0  ;;  %v649_v47 = vadd.f32 %v3478_v62, %v648_v29  ;;  %v76_v9 = vld [vmem:[%s5717_s0 + $0x1d0] sm:$0xff]  ;;  %v77_v29 = vld [vmem:[%s5717_s0 + $0x1d8] sm:$0xff]  ;;  %2762 = vmatmul.msk.f32.gmra.mxu2 %vm144_vm0, %v106_v30 }
  0xe6   :  { %v1424_v58 = vsel %vm1123_vm1, %v1103_v48, 0.0 }
  0xe7   :  { %v1337_v21 = vsel %vm1123_vm1, %v1074_v10, 0.0  ;;  %v1104_v28 = vmul.f32 %v3493_v4, %v983_v20  ;;  %v1015_v49 = vmul.f32 %v3493_v4, %v894_v36  ;;  %v924_v57 = vmax.f32 %v649_v47, 0.0  ;;  %v135_v10 = vld [vmem:[%s5717_s0 + $0x3a8] sm:$0xff]  ;;  %2732 = vmatmul.msk.f32.gmra.mxu1 %vm144_vm0, %v76_v9  ;;  %v136_v36 = vld [vmem:[%s5717_s0 + $0x3b0] sm:$0xff] }
  0xe8   :  { %1149 = vadd.xlane.f32.xlu2 %v1148_v41  ;;  %1416 = vadd.xlane.f32.xlu1 %v1415_v45  ;;  %v3789_v12 = vpop.f32.mrf.mxu2  ;;  %v45_v45 = vld [vmem:[%s5717_s0 + $0xd8] sm:$0xff] }
  0xe9   :  { %v1427_v39 = vsel %vm1123_vm1, %v1104_v28, 0.0  ;;  %2701 = vmatmul.msk.f32.gmra.mxu0 %vm144_vm0, %v45_v45  ;;  %v739_v2 = vadd.f32 %v3478_v62, %v3789_v12  ;;  %v1045_v7 = vmul.f32 %v3493_v4, %v924_v57  ;;  %2791 = vmatmul.msk.f32.gmra.mxu3 %vm144_vm0, %v135_v10 }
  0xea   :  { %1152 = vadd.xlane.f32.xlu0 %v1151_v46  ;;  %v561_v33 = vpop.f32.mrf.mxu0  ;;  %v828_v43 = vpop.f32.mrf.mxu3 }
  0xeb   :  { %v562_v41 = vadd.f32 %v3478_v62, %v561_v33  ;;  %v954_v16 = vmax.f32 %v739_v2, 0.0  ;;  %v1250_v18 = vsel %vm1123_vm1, %v1045_v7, 0.0  ;;  %v829_v20 = vadd.f32 %v3478_v62, %v828_v43 }
  0xec   :  { %v651_v55 = vpop.f32.mrf.mxu1 }
  0xed   :  { %v895_v53 = vmax.f32 %v562_v41, 0.0  ;;  %v652_v61 = vadd.f32 %v3478_v62, %v651_v55  ;;  %v1075_v25 = vmul.f32 %v3493_v4, %v954_v16  ;;  %v984_v33 = vmax.f32 %v829_v20, 0.0 }
  0xef   :  { %v1016_v0 = vmul.f32 %v3493_v4, %v895_v53  ;;  %v925_v12 = vmax.f32 %v652_v61, 0.0  ;;  %2733 = vmatmul.msk.f32.gmra.mxu1 %vm144_vm0, %v77_v29  ;;  %v1105_v43 = vmul.f32 %v3493_v4, %v984_v33 }
  0xf0   :  { %1239 = vadd.xlane.f32.xlu2 %v1238_v59  ;;  %1155 = vadd.xlane.f32.xlu1 %v1154_v60  ;;  %v3818_v34 = vpop.f32.mrf.mxu2  ;;  %v1160_v59 = vsel %vm1123_vm1, %v1015_v49, 0.0 }
  0xf1   :  { %v742_v22 = vadd.f32 %v3478_v62, %v3818_v34  ;;  %2792 = vmatmul.msk.f32.gmra.mxu3 %vm144_vm0, %v136_v36  ;;  %v1430_v57 = vsel %vm1123_vm1, %v1105_v43, 0.0 }
  0xf2   :  { %1242 = vadd.xlane.f32.xlu0 %v1241_v1  ;;  %v3850_v56 = vpop.f32.mrf.mxu0  ;;  %v46_v1 = vld [vmem:[%s5717_s0 + $0xe0] sm:$0xff]  ;;  %v831_v8 = vpop.f32.mrf.mxu3 }
  0xf3   :  { %2702 = vmatmul.msk.f32.gmra.mxu0 %vm144_vm0, %v46_v1  ;;  %v832_v42 = vadd.f32 %v3478_v62, %v831_v8  ;;  %v565_v45 = vadd.f32 %v3478_v62, %v3850_v56 }
  0xf4   :  { %v654_v15 = vpop.f32.mrf.mxu1 }
  0xf5   :  { %v985_v56 = vmax.f32 %v832_v42, 0.0 }
  0xf7   :  { %v1106_v2 = vmul.f32 %v3493_v4, %v985_v56 }
  0xf8   :  { %1332 = vadd.xlane.f32.xlu2 %v1331_v19  ;;  %1245 = vadd.xlane.f32.xlu1 %v1244_v14  ;;  %v744_v60 = vpop.f32.mrf.mxu2  ;;  %v1163_v14 = vsel %vm1123_vm1, %v1016_v0, 0.0 }
  0xf9   :  { %v745_v6 = vadd.f32 %v3478_v62, %v744_v60 }
  0xfa   :  { %1338 = vadd.xlane.f32.xlu0 %v1337_v21  ;;  %v567_v19 = vpop.f32.mrf.mxu0  ;;  %v1046_v21 = vmul.f32 %v3493_v4, %v925_v12  ;;  %v3893_v28 = vpop.f32.mrf.mxu3 }
  0xfb   :  { %v956_v17 = vmax.f32 %v745_v6, 0.0  ;;  %v568_v26 = vadd.f32 %v3478_v62, %v567_v19  ;;  %5768 = vst [vmem:[#allocation8_spill] sm:$0xff] %v3893_v28  ;;  %2703 = vmatmul.msk.f32.gmra.mxu0 %vm144_vm0, %v47_v44  ;;  %v655_v6 = vadd.f32 %v3478_v62, %v654_v15  ;;  %v1433_v15 = vsel %vm1123_vm1, %v1106_v2, 0.0 }
  0xfc   :  { %v1253_v34 = vsel %vm1123_vm1, %v1046_v21, 0.0  ;;  %v657_v41 = vpop.f32.mrf.mxu1 }
  0xfd   :  { %v3816_v31 = vpop.xlane.xlu0 %1125  ;;  %v1077_v27 = vmul.f32 %v3493_v4, %v956_v17  ;;  %v658_v50 = vadd.f32 %v3478_v62, %v657_v41  ;;  %v926_v19 = vmax.f32 %v655_v6, 0.0 }
  0xff   :  { %v1346_v40 = vsel %vm1123_vm1, %v1077_v27, 0.0  ;;  %v927_v61 = vmax.f32 %v658_v50, 0.0 }
 0x100   :  { %1422 = vadd.xlane.f32.xlu2 %v1421_v37  ;;  %1335 = vadd.xlane.f32.xlu1 %v1334_v38  ;;  %v747_v35 = vpop.f32.mrf.mxu2  ;;  %v955_v37 = vmax.f32 %v742_v22, 0.0  ;;  %v1340_v38 = vsel %vm1123_vm1, %v1075_v25, 0.0  ;;  %v3958_v25 = vld [vmem:[%s5719_s2] ss:$0 sm:$0xff] }
 0x101   :  { %v748_v10 = vadd.f32 %v3478_v62, %v747_v35  ;;  %v1048_v12 = vmul.f32 %v3493_v4, %v927_v61  ;;  %v3970_v35 = vld [vmem:[%s5719_s2 + $0x1] ss:$0 sm:$0xff] }
 0x102   :  { %1428 = vadd.xlane.f32.xlu0 %v1427_v39  ;;  %v897_v39 = vmax.f32 %v568_v26, 0.0  ;;  %v1076_v49 = vmul.f32 %v3493_v4, %v955_v37  ;;  %v570_v53 = vpop.f32.mrf.mxu0  ;;  %v1047_v36 = vmul.f32 %v3970_v35, %v926_v19 }
 0x103   :  { %v3836_v46 = vpop.xlane.xlu1 %1305  ;;  %v571_v1 = vadd.f32 %v3478_v62, %v570_v53  ;;  %v957_v21 = vmax.f32 %v748_v10, 0.0  ;;  %v1259_v62 = vsel %vm1123_vm1, %v1048_v12, 0.0 }
 0x104   :  { %v1018_v51 = vmul.f32 %v3493_v4, %v897_v39  ;;  %v1343_v60 = vsel %vm1123_vm1, %v1076_v49, 0.0  ;;  %v1256_v43 = vsel %vm1123_vm1, %v1047_v36, 0.0 }
 0x105   :  { %v3846_v52 = vpop.xlane.xlu0 %1215  ;;  %v898_v17 = vmax.f32 %v571_v1, 0.0 }
 0x106   :  { %v1169_v63 = vsel %vm1123_vm1, %v1018_v51, 0.0 }
 0x107   :  { %v1019_v29 = vmul.f32 %v3493_v4, %v898_v17 }
 0x108   :  { %1158 = vadd.xlane.f32.xlu2 %v1157_v54  ;;  %1425 = vadd.xlane.f32.xlu1 %v1424_v58  ;;  %v107_v54 = vld [vmem:[%s5717_s0 + $0x2c8] sm:$0xff]  ;;  %v837_v58 = vpop.f32.mrf.mxu3  ;;  %v750_v0 = vpop.f32.mrf.mxu2 }
 0x109   :  { %2763 = vmatmul.msk.f32.gmra.mxu2 %vm144_vm0, %v107_v54  ;;  %v838_v37 = vadd.f32 %v3958_v25, %v837_v58  ;;  %v1172_v41 = vsel %vm1123_vm1, %v1019_v29, 0.0  ;;  %v751_v50 = vadd.f32 %v3958_v25, %v750_v0 }
 0x10a   :  { %1161 = vadd.xlane.f32.xlu0 %v1160_v59  ;;  %v896_v59 = vmax.f32 %v565_v45, 0.0 }
 0x10b   :  { %v3862_v3 = vpop.xlane.xlu2 %1308  ;;  %v3864_v5 = vpop.xlane.xlu1 %1218  ;;  %v987_v44 = vmax.f32 %v838_v37, 0.0 }
 0x10c   :  { %v1017_v9 = vmul.f32 %v3493_v4, %v896_v59 }
 0x10d   :  { %v3875_v11 = vpop.xlane.xlu0 %1395 }
 0x10e   :  { %5765 = vst [vmem:[#allocation5_spill] sm:$0xff] %v3875_v11  ;;  %v1166_v20 = vsel %vm1123_vm1, %v1017_v9, 0.0 }
 0x110   :  { %1248 = vadd.xlane.f32.xlu2 %v1247_v13  ;;  %1164 = vadd.xlane.f32.xlu1 %v1163_v14  ;;  %v660_v13 = vpop.f32.mrf.mxu1  ;;  %v137_v14 = vld [vmem:[%s5717_s0 + $0x3b8] sm:$0xff]  ;;  %v840_v22 = vpop.f32.mrf.mxu3 }
 0x111   :  { %2793 = vmatmul.msk.f32.gmra.mxu3 %vm144_vm0, %v137_v14  ;;  %v661_v27 = vadd.f32 %v3958_v25, %v660_v13  ;;  %v753_v30 = vpop.f32.mrf.mxu2  ;;  %v841_v14 = vadd.f32 %v3958_v25, %v840_v22 }
 0x112   :  { %1251 = vadd.xlane.f32.xlu0 %v1250_v18  ;;  %v573_v18 = vpop.f32.mrf.mxu0  ;;  %v754_v13 = vadd.f32 %v3958_v25, %v753_v30 }
 0x113   :  { %v3886_v23 = vpop.xlane.xlu2 %1221  ;;  %v3888_v24 = vpop.xlane.xlu1 %1398  ;;  %v574_v26 = vadd.f32 %v3958_v25, %v573_v18 }
 0x114   :  { %5766 = vst [vmem:[#allocation6_spill] sm:$0xff] %v3886_v23 }
 0x115   :  { %5767 = vst [vmem:[#allocation7_spill] sm:$0xff] %v3888_v24  ;;  %v3901_v32 = vpop.xlane.xlu0 %1128  ;;  %v899_v4 = vmax.f32 %v574_v26, 0.0  ;;  %v959_v26 = vmax.f32 %v754_v13, 0.0 }
 0x117   :  { %v1020_v53 = vmul.f32 %v3970_v35, %v899_v4 }
 0x118   :  { %1341 = vadd.xlane.f32.xlu2 %v1340_v38  ;;  %1254 = vadd.xlane.f32.xlu1 %v1253_v34  ;;  %v1078_v38 = vmul.f32 %v3970_v35, %v957_v21  ;;  %v663_v42 = vpop.f32.mrf.mxu1  ;;  %v843_v56 = vpop.f32.mrf.mxu3 }
 0x119   :  { %v664_v51 = vadd.f32 %v3958_v25, %v663_v42  ;;  %v756_v61 = vpop.f32.mrf.mxu2  ;;  %v1175_v2 = vsel %vm1123_vm1, %v1020_v53, 0.0  ;;  %v844_v42 = vadd.f32 %v3958_v25, %v843_v56 }
 0x11a   :  { %1347 = vadd.xlane.f32.xlu0 %v1346_v40  ;;  %v928_v40 = vmax.f32 %v661_v27, 0.0  ;;  %v1349_v45 = vsel %vm1123_vm1, %v1078_v38, 0.0  ;;  %v576_v49 = vpop.f32.mrf.mxu0  ;;  %v988_v27 = vmax.f32 %v841_v14, 0.0 }
 0x11b   :  { %v3919_v47 = vpop.xlane.xlu2 %1311  ;;  %v3921_v48 = vpop.xlane.xlu1 %1131  ;;  %v577_v59 = vadd.f32 %v3958_v25, %v576_v49  ;;  %v929_v0 = vmax.f32 %v664_v51, 0.0 }
 0x11c   :  { %v1049_v54 = vmul.f32 %v3970_v35, %v928_v40 }
 0x11d   :  { %v3930_v55 = vpop.xlane.xlu0 %1401  ;;  %v900_v9 = vmax.f32 %v577_v59, 0.0  ;;  %v1050_v17 = vmul.f32 %v3970_v35, %v929_v0 }
 0x11e   :  { %5769 = vst [vmem:[#allocation9_spill] sm:$0xff] %v3930_v55  ;;  %v1262_v6 = vsel %vm1123_vm1, %v1049_v54, 0.0  ;;  %v989_v54 = vmax.f32 %v844_v42, 0.0 }
 0x11f   :  { %v1021_v21 = vmul.f32 %v3970_v35, %v900_v9  ;;  %v1265_v22 = vsel %vm1123_vm1, %v1050_v17, 0.0 }
 0x120   :  { %1431 = vadd.xlane.f32.xlu2 %v1430_v57  ;;  %1344 = vadd.xlane.f32.xlu1 %v1343_v60  ;;  %v1108_v60 = vmul.f32 %v3970_v35, %v987_v44  ;;  %v666_v12 = vpop.f32.mrf.mxu1  ;;  %v1109_v44 = vmul.f32 %v3970_v35, %v988_v27 }
 0x121   :  { %v759_v36 = vpop.f32.mrf.mxu2  ;;  %v1178_v38 = vsel %vm1123_vm1, %v1021_v21, 0.0 }
 0x122   :  { %1170 = vadd.xlane.f32.xlu0 %v1169_v63  ;;  %v958_v63 = vmax.f32 %v751_v50, 0.0  ;;  %v1439_v10 = vsel %vm1123_vm1, %v1108_v60, 0.0  ;;  %v579_v4 = vpop.f32.mrf.mxu0  ;;  %v1442_v56 = vsel %vm1123_vm1, %v1109_v44, 0.0 }
 0x123   :  { %v3939_v7 = vpop.xlane.xlu2 %1314  ;;  %v3941_v8 = vpop.xlane.xlu1 %1134  ;;  %v580_v9 = vadd.f32 %v3958_v25, %v579_v4 }
 0x125   :  { %v3949_v16 = vpop.xlane.xlu0 %1224  ;;  %v901_v27 = vmax.f32 %v580_v9, 0.0 }
 0x128   :  { %1167 = vadd.xlane.f32.xlu2 %v1166_v20  ;;  %1434 = vadd.xlane.f32.xlu1 %v1433_v15  ;;  %v1079_v15 = vmul.f32 %v3970_v35, %v958_v63  ;;  %v667_v20 = vadd.f32 %v3958_v25, %v666_v12  ;;  %v669_v40 = vpop.f32.mrf.mxu1 }
 0x129   :  { %v670_v4 = vadd.f32 %v3958_v25, %v669_v40 }
 0x12a   :  { %1260 = vadd.xlane.f32.xlu0 %v1259_v62  ;;  %v846_v62 = vpop.f32.mrf.mxu3  ;;  %v1352_v30 = vsel %vm1123_vm1, %v1079_v15, 0.0  ;;  %v930_v37 = vmax.f32 %v667_v20, 0.0  ;;  %v582_v13 = vpop.f32.mrf.mxu0 }
 0x12b   :  { %v3963_v33 = vpop.xlane.xlu2 %1137  ;;  %v3965_v34 = vpop.xlane.xlu1 %1404  ;;  %v847_v50 = vadd.f32 %v3958_v25, %v846_v62 }
 0x12c   :  { %5770 = vst [vmem:[#allocation10_spill] sm:$0xff] %v3965_v34  ;;  %v1051_v51 = vmul.f32 %v3970_v35, %v930_v37 }
 0x12d   :  { %v3975_v39 = vpop.xlane.xlu0 %1317  ;;  %v990_v63 = vmax.f32 %v847_v50, 0.0 }
 0x12e   :  { %v1268_v0 = vsel %vm1123_vm1, %v1051_v51, 0.0 }
 0x12f   :  { %v1111_v21 = vmul.f32 %v3970_v35, %v990_v63 }
 0x130   :  { %1257 = vadd.xlane.f32.xlu2 %v1256_v43  ;;  %1173 = vadd.xlane.f32.xlu1 %v1172_v41  ;;  %v757_v41 = vadd.f32 %v3958_v25, %v756_v61  ;;  %v1080_v43 = vmul.f32 %v3970_v35, %v959_v26  ;;  %v672_v14 = vpop.f32.mrf.mxu1 }
 0x131   :  { %v1448_v37 = vsel %vm1123_vm1, %v1111_v21, 0.0 }
 0x132   :  { %1350 = vadd.xlane.f32.xlu0 %v1349_v45  ;;  %v960_v53 = vmax.f32 %v757_v41, 0.0  ;;  %v1355_v60 = vsel %vm1123_vm1, %v1080_v43, 0.0  ;;  %v849_v61 = vpop.f32.mrf.mxu3  ;;  %v583_v41 = vadd.f32 %v3958_v25, %v582_v13  ;;  %v1022_v43 = vmul.f32 %v3970_v35, %v901_v27 }
 0x133   :  { %v3984_v57 = vpop.xlane.xlu2 %1407  ;;  %v3986_v58 = vpop.xlane.xlu1 %1227 }
 0x134   :  { %5771 = vst [vmem:[#allocation11_spill] sm:$0xff] %v3984_v57  ;;  %v1081_v12 = vmul.f32 %v3970_v35, %v960_v53  ;;  %v902_v40 = vmax.f32 %v583_v41, 0.0 }
 0x135   :  { %v3990_v1 = vpop.xlane.xlu0 %1410 }
 0x136   :  { %5772 = vst [vmem:[#allocation12_spill] sm:$0xff] %v3990_v1 }
 0x138   :  { %1176 = vadd.xlane.f32.xlu2 %v1175_v2  ;;  %1263 = vadd.xlane.f32.xlu1 %v1262_v6  ;;  %v762_v2 = vpop.f32.mrf.mxu2  ;;  %v760_v6 = vadd.f32 %v3958_v25, %v759_v36 }
 0x139   :  { %v763_v20 = vadd.f32 %v3958_v25, %v762_v2  ;;  %v1181_v2 = vsel %vm1123_vm1, %v1022_v43, 0.0 }
 0x13a   :  { %1440 = vadd.xlane.f32.xlu0 %v1439_v10  ;;  %v1110_v10 = vmul.f32 %v3970_v35, %v989_v54  ;;  %v961_v62 = vmax.f32 %v760_v6, 0.0  ;;  %v585_v54 = vpop.f32.mrf.mxu0 }
 0x13b   :  { %v3999_v18 = vpop.xlane.xlu2 %1140  ;;  %v4001_v19 = vpop.xlane.xlu1 %1320  ;;  %v962_v36 = vmax.f32 %v763_v20, 0.0  ;;  %v850_v20 = vadd.f32 %v3958_v25, %v849_v61  ;;  %v586_v27 = vadd.f32 %v3958_v25, %v585_v54 }
 0x13c   :  { %v1082_v42 = vmul.f32 %v3970_v35, %v961_v62 }
 0x13d   :  { %v4005_v29 = vpop.xlane.xlu0 %1143  ;;  %v1083_v53 = vmul.f32 %v3970_v35, %v962_v36  ;;  %v903_v61 = vmax.f32 %v586_v27, 0.0 }
 0x13f   :  { %v1364_v9 = vsel %vm1123_vm1, %v1083_v53, 0.0 }
 0x140   :  { %1266 = vadd.xlane.f32.xlu2 %v1265_v22  ;;  %1353 = vadd.xlane.f32.xlu1 %v1352_v30  ;;  %v1445_v22 = vsel %vm1123_vm1, %v1110_v10, 0.0  ;;  %v1358_v30 = vsel %vm1123_vm1, %v1081_v12, 0.0  ;;  %v673_v10 = vadd.f32 %v3958_v25, %v672_v14  ;;  %v1023_v12 = vmul.f32 %v3970_v35, %v902_v40 }
 0x142   :  { %1179 = vadd.xlane.f32.xlu0 %v1178_v38  ;;  %v852_v38 = vpop.f32.mrf.mxu3  ;;  %v1184_v14 = vsel %vm1123_vm1, %v1023_v12, 0.0 }
 0x143   :  { %v4014_v45 = vpop.xlane.xlu2 %1230  ;;  %v4016_v49 = vpop.xlane.xlu1 %1146  ;;  %v853_v51 = vadd.f32 %v3958_v25, %v852_v38 }
 0x144   :  { %v765_v38 = vpop.f32.mrf.mxu2 }
 0x145   :  { %v4020_v59 = vpop.xlane.xlu0 %1233  ;;  %v992_v6 = vmax.f32 %v853_v51, 0.0  ;;  %v1564_v51 = vmax.f32 %v3836_v46, %v3862_v3  ;;  %v766_v54 = vadd.f32 %v3958_v25, %v765_v38 }
 0x147   :  { %v1565_v40 = vmax.f32 %v1564_v51, %v3919_v47  ;;  %v963_v27 = vmax.f32 %v766_v54, 0.0 }
 0x148   :  { %1356 = vadd.xlane.f32.xlu2 %v1355_v60  ;;  %1443 = vadd.xlane.f32.xlu1 %v1442_v56  ;;  %v675_v60 = vpop.f32.mrf.mxu1  ;;  %v931_v56 = vmax.f32 %v670_v4, 0.0  ;;  %v588_v4 = vpop.f32.mrf.mxu0 }
 0x149   :  { %v589_v53 = vadd.f32 %v3958_v25, %v588_v4  ;;  %v676_v12 = vadd.f32 %v3958_v25, %v675_v60 }
 0x14a   :  { %1269 = vadd.xlane.f32.xlu0 %v1268_v0  ;;  %v1361_v0 = vsel %vm1123_vm1, %v1082_v42, 0.0  ;;  %v1052_v13 = vmul.f32 %v3970_v35, %v931_v56  ;;  %v991_v42 = vmax.f32 %v850_v20, 0.0 }
 0x14b   :  { %v4029_v17 = vpop.xlane.xlu2 %1323  ;;  %v4031_v15 = vpop.xlane.xlu1 %1236  ;;  %v904_v20 = vmax.f32 %v589_v53, 0.0  ;;  %v1084_v53 = vmul.f32 %v3970_v35, %v963_v27 }
 0x14d   :  { %v4035_v26 = vpop.xlane.xlu0 %1329  ;;  %v1025_v54 = vmul.f32 %v3970_v35, %v904_v20  ;;  %v1367_v20 = vsel %vm1123_vm1, %v1084_v53, 0.0 }
 0x150   :  { %1446 = vadd.xlane.f32.xlu2 %v1445_v22  ;;  %1359 = vadd.xlane.f32.xlu1 %v1358_v30  ;;  %v1113_v22 = vmul.f32 %v3970_v35, %v992_v6  ;;  %v932_v30 = vmax.f32 %v673_v10, 0.0  ;;  %v678_v41 = vpop.f32.mrf.mxu1  ;;  %v1112_v6 = vmul.f32 %v3970_v35, %v991_v42  ;;  %v1566_v10 = vmax.f32 %v1565_v40, %v3939_v7  ;;  %v591_v40 = vpop.f32.mrf.mxu0 }
 0x152   :  { %1449 = vadd.xlane.f32.xlu0 %v1448_v37  ;;  %v1271_v37 = vsel %vm1123_vm1, %v1052_v13, 0.0  ;;  %v1454_v43 = vsel %vm1123_vm1, %v1113_v22, 0.0  ;;  %v1053_v56 = vmul.f32 %v3970_v35, %v932_v30  ;;  %v1567_v30 = vmax.f32 %v1566_v10, %v3975_v39 }
 0x153   :  { %v4044_v44 = vpop.xlane.xlu2 %1413  ;;  %v4046_v50 = vpop.xlane.xlu1 %1326  ;;  %v1451_v38 = vsel %vm1123_vm1, %v1112_v6, 0.0 }
 0x154   :  { %5773 = vst [vmem:[#allocation13_spill] sm:$0xff] %v4044_v44  ;;  %v1274_v22 = vsel %vm1123_vm1, %v1053_v56, 0.0  ;;  %v1568_v42 = vmax.f32 %v1567_v30, %v4001_v19 }
 0x155   :  { %v4050_v63 = vpop.xlane.xlu0 %1419 }
 0x156   :  { %5774 = vst [vmem:[#allocation14_spill] sm:$0xff] %v4050_v63  ;;  %v1569_v56 = vmax.f32 %v1568_v42, %v4029_v17 }
 0x158   :  { %1362 = vadd.xlane.f32.xlu2 %v1361_v0  ;;  %1182 = vadd.xlane.f32.xlu1 %v1181_v2  ;;  %v681_v60 = vpop.f32.mrf.mxu1 }
 0x159   :  { %v682_v10 = vadd.f32 %v3958_v25, %v681_v60 }
 0x15a   :  { %1365 = vadd.xlane.f32.xlu0 %v1364_v9  ;;  %v1024_v9 = vmul.f32 %v3970_v35, %v903_v61  ;;  %v933_v61 = vmax.f32 %v676_v12, 0.0  ;;  %v1570_v12 = vmax.f32 %v1569_v56, %v4046_v50 }
 0x15b   :  { %v4059_v21 = vpop.xlane.xlu2 %1149  ;;  %v4061_v62 = vpop.xlane.xlu1 %1416 }
 0x15c   :  { %5775 = vst [vmem:[#allocation15_spill] sm:$0xff] %v4061_v62  ;;  %v1187_v4 = vsel %vm1123_vm1, %v1024_v9, 0.0  ;;  %v1571_v42 = vmax.f32 %v1570_v12, %v4035_v26 }
 0x15d   :  { %v4065_v36 = vpop.xlane.xlu0 %1152 }
 0x160   :  { %1185 = vadd.xlane.f32.xlu2 %v1184_v14  ;;  %1272 = vadd.xlane.f32.xlu1 %v1271_v37  ;;  %v855_v14 = vpop.f32.mrf.mxu3  ;;  %v768_v37 = vpop.f32.mrf.mxu2 }
 0x161   :  { %v856_v51 = vadd.f32 %v3958_v25, %v855_v14  ;;  %v1190_v14 = vsel %vm1123_vm1, %v1025_v54, 0.0  ;;  %v769_v56 = vadd.f32 %v3958_v25, %v768_v37  ;;  %v594_v37 = vpop.f32.mrf.mxu0 }
 0x162   :  { %1455 = vadd.xlane.f32.xlu0 %v1454_v43  ;;  %v679_v43 = vadd.f32 %v3958_v25, %v678_v41  ;;  %v1054_v41 = vmul.f32 %v3970_v35, %v933_v61  ;;  %v592_v61 = vadd.f32 %v3958_v25, %v591_v40 }
 0x163   :  { %v4076_v0 = vpop.xlane.xlu2 %1239  ;;  %v4078_v2 = vpop.xlane.xlu1 %1155  ;;  %v993_v27 = vmax.f32 %v856_v51, 0.0  ;;  %v964_v40 = vmax.f32 %v769_v56, 0.0 }
 0x164   :  { %v1277_v60 = vsel %vm1123_vm1, %v1054_v41, 0.0 }
 0x165   :  { %v4084_v13 = vpop.xlane.xlu0 %1242 }
 0x168   :  { %1275 = vadd.xlane.f32.xlu2 %v1274_v22  ;;  %1452 = vadd.xlane.f32.xlu1 %v1451_v38  ;;  %v934_v22 = vmax.f32 %v679_v43, 0.0  ;;  %v858_v38 = vpop.f32.mrf.mxu3  ;;  %v771_v63 = vpop.f32.mrf.mxu2  ;;  %v1114_v43 = vmul.f32 %v3970_v35, %v993_v27 }
 0x169   :  { %v772_v12 = vadd.f32 %v3958_v25, %v771_v63 }
 0x16a   :  { %1188 = vadd.xlane.f32.xlu0 %v1187_v4  ;;  %v935_v4 = vmax.f32 %v682_v10, 0.0  ;;  %v1055_v51 = vmul.f32 %v3970_v35, %v934_v22  ;;  %v1457_v27 = vsel %vm1123_vm1, %v1114_v43, 0.0  ;;  %v1085_v43 = vmul.f32 %v3970_v35, %v964_v40 }
 0x16b   :  { %v4096_v6 = vpop.xlane.xlu2 %1332  ;;  %v4098_v9 = vpop.xlane.xlu1 %1245  ;;  %v965_v62 = vmax.f32 %v772_v12, 0.0 }
 0x16c   :  { %v1572_v53 = vmax.f32 %v1571_v42, %v4096_v6  ;;  %v1056_v41 = vmul.f32 %v3970_v35, %v935_v4  ;;  %v1280_v22 = vsel %vm1123_vm1, %v1055_v51, 0.0 }
 0x16d   :  { %v4103_v30 = vpop.xlane.xlu0 %1338 }
 0x16e   :  { %v1283_v63 = vsel %vm1123_vm1, %v1056_v41, 0.0  ;;  %v1086_v41 = vmul.f32 %v3970_v35, %v965_v62 }
 0x170   :  { %1368 = vadd.xlane.f32.xlu2 %v1367_v20  ;;  %1191 = vadd.xlane.f32.xlu1 %v1190_v14  ;;  %v905_v14 = vmax.f32 %v592_v61, 0.0  ;;  %v861_v4 = vpop.f32.mrf.mxu3 }
 0x171   :  { %v862_v12 = vadd.f32 %v3958_v25, %v861_v4 }
 0x172   :  { %1278 = vadd.xlane.f32.xlu0 %v1277_v60  ;;  %v684_v60 = vpop.f32.mrf.mxu1  ;;  %v1026_v61 = vmul.f32 %v3970_v35, %v905_v14  ;;  %v1370_v14 = vsel %vm1123_vm1, %v1085_v43, 0.0 }
 0x173   :  { %v4114_v54 = vpop.xlane.xlu2 %1422  ;;  %v4116_v10 = vpop.xlane.xlu1 %1335  ;;  %v685_v56 = vadd.f32 %v3958_v25, %v684_v60  ;;  %v995_v1 = vmax.f32 %v862_v12, 0.0 }
 0x174   :  { %5776 = vst [vmem:[#allocation16_spill] sm:$0xff] %v4114_v54  ;;  %v4121_v20 = vmax.f32 %v1572_v53, %v4116_v10  ;;  %v859_v53 = vadd.f32 %v3958_v25, %v858_v38  ;;  %v1193_v60 = vsel %vm1123_vm1, %v1026_v61, 0.0  ;;  %v774_v54 = vpop.f32.mrf.mxu2 }
 0x175   :  { %v4125_v42 = vpop.xlane.xlu0 %1428  ;;  %v936_v38 = vmax.f32 %v685_v56, 0.0  ;;  %v775_v56 = vadd.f32 %v3958_v25, %v774_v54 }
 0x176   :  { %5777 = vst [vmem:[#allocation17_spill] sm:$0xff] %v4125_v42 }
 0x177   :  { %v1057_v61 = vmul.f32 %v3970_v35, %v936_v38  ;;  %v966_v57 = vmax.f32 %v775_v56, 0.0 }
 0x178   :  { %1458 = vadd.xlane.f32.xlu2 %v1457_v27  ;;  %1281 = vadd.xlane.f32.xlu1 %v1280_v22  ;;  %v1484_v27 = vmax.f32 %v3816_v31, %v3901_v32  ;;  %v994_v22 = vmax.f32 %v859_v53, 0.0 }
 0x179   :  { %v1286_v54 = vsel %vm1123_vm1, %v1057_v61, 0.0 }
 0x17a   :  { %1284 = vadd.xlane.f32.xlu0 %v1283_v63  ;;  %v1485_v40 = vmax.f32 %v1484_v27, %v3921_v48  ;;  %v597_v63 = vpop.f32.mrf.mxu0  ;;  %v687_v44 = vpop.f32.mrf.mxu1  ;;  %v1115_v43 = vmul.f32 %v3970_v35, %v994_v22 }
 0x17b   :  { %v4134_v51 = vpop.xlane.xlu2 %1158  ;;  %v4136_v42 = vpop.xlane.xlu1 %1425  ;;  %v598_v53 = vadd.f32 %v3958_v25, %v597_v63 }
 0x17c   :  { %5778 = vst [vmem:[#allocation18_spill] sm:$0xff] %v4136_v42  ;;  %v1373_v42 = vsel %vm1123_vm1, %v1086_v41, 0.0  ;;  %v1486_v4 = vmax.f32 %v1485_v40, %v3941_v8  ;;  %v1116_v40 = vmul.f32 %v3970_v35, %v995_v1  ;;  %v1460_v38 = vsel %vm1123_vm1, %v1115_v43, 0.0  ;;  %v864_v22 = vpop.f32.mrf.mxu3 }
 0x17d   :  { %v4147_v62 = vpop.xlane.xlu0 %1161  ;;  %v907_v63 = vmax.f32 %v598_v53, 0.0  ;;  %v688_v1 = vadd.f32 %v3958_v25, %v687_v44  ;;  %v5779_v44 = vmax.f32 %v4121_v20, %v4103_v30 }
 0x17e   :  { %v1487_v27 = vmax.f32 %v1486_v4, %v3963_v33  ;;  %v1463_v4 = vsel %vm1123_vm1, %v1116_v40, 0.0 }
 0x17f   :  { %v1028_v53 = vmul.f32 %v3970_v35, %v907_v63 }
 0x180   :  { %1194 = vadd.xlane.f32.xlu2 %v1193_v60  ;;  %1371 = vadd.xlane.f32.xlu1 %v1370_v14  ;;  %v1488_v60 = vmax.f32 %v1487_v27, %v3999_v18  ;;  %v595_v14 = vadd.f32 %v3958_v25, %v594_v37  ;;  %v865_v27 = vadd.f32 %v3958_v25, %v864_v22 }
 0x181   :  { %v1087_v37 = vmul.f32 %v3970_v35, %v966_v57 }
 0x182   :  { %1374 = vadd.xlane.f32.xlu0 %v1373_v42  ;;  %v1489_v42 = vmax.f32 %v1488_v60, %v4005_v29  ;;  %v906_v34 = vmax.f32 %v595_v14, 0.0  ;;  %v690_v55 = vpop.f32.mrf.mxu1 }
 0x183   :  { %v4154_v12 = vpop.xlane.xlu2 %1248  ;;  %v4156_v41 = vpop.xlane.xlu1 %1164  ;;  %v691_v60 = vadd.f32 %v3958_v25, %v690_v55  ;;  %v1376_v22 = vsel %vm1123_vm1, %v1087_v37, 0.0 }
 0x184   :  { %v1490_v56 = vmax.f32 %v1489_v42, %v4016_v49  ;;  %v1027_v63 = vmul.f32 %v3970_v35, %v906_v34 }
 0x185   :  { %v4170_v61 = vpop.xlane.xlu0 %1251  ;;  %v938_v42 = vmax.f32 %v691_v60, 0.0 }
 0x186   :  { %v1491_v14 = vmax.f32 %v1490_v56, %v4059_v21  ;;  %v1196_v55 = vsel %vm1123_vm1, %v1027_v63, 0.0 }
 0x188   :  { %1287 = vadd.xlane.f32.xlu2 %v1286_v54  ;;  %1461 = vadd.xlane.f32.xlu1 %v1460_v38  ;;  %v937_v54 = vmax.f32 %v688_v1, 0.0  ;;  %v996_v38 = vmax.f32 %v865_v27, 0.0  ;;  %v1492_v11 = vmax.f32 %v1491_v14, %v4065_v36  ;;  %v1059_v27 = vmul.f32 %v3970_v35, %v938_v42 }
 0x189   :  { %v1524_v14 = vmax.f32 %v3846_v52, %v3864_v5 }
 0x18a   :  { %1464 = vadd.xlane.f32.xlu0 %v1463_v4  ;;  %v1199_v4 = vsel %vm1123_vm1, %v1028_v53, 0.0  ;;  %v1117_v56 = vmul.f32 %v3970_v35, %v996_v38  ;;  %v1058_v20 = vmul.f32 %v3970_v35, %v937_v54  ;;  %v777_v53 = vpop.f32.mrf.mxu2  ;;  %v600_v54 = vpop.f32.mrf.mxu0  ;;  %v1292_v42 = vsel %vm1123_vm1, %v1059_v27, 0.0 }
 0x18b   :  { %v4172_v43 = vpop.xlane.xlu2 %1341  ;;  %v4174_v40 = vpop.xlane.xlu1 %1254 }
 0x18c   :  { %v1575_v57 = vmax.f32 %v5779_v44, %v4172_v43  ;;  %v1493_v44 = vmax.f32 %v1492_v11, %v4078_v2  ;;  %v1466_v11 = vsel %vm1123_vm1, %v1117_v56, 0.0  ;;  %v1289_v38 = vsel %vm1123_vm1, %v1058_v20, 0.0 }
 0x18d   :  { %v4199_v63 = vpop.xlane.xlu0 %1347 }
 0x18e   :  { %v1494_v37 = vmax.f32 %v1493_v44, %v4134_v51 }
 0x190   :  { %1377 = vadd.xlane.f32.xlu2 %v1376_v22  ;;  %1200 = vadd.xlane.f32.xlu1 %v1199_v4  ;;  %v1525_v4 = vmax.f32 %v1524_v14, %v3886_v23 }
 0x192   :  { %1197 = vadd.xlane.f32.xlu0 %v1196_v55  ;;  %v1495_v55 = vmax.f32 %v1494_v37, %v4147_v62  ;;  %v1526_v24 = vmax.f32 %v1525_v4, %v3949_v16 }
 0x193   :  { %v4190_v34 = vpop.xlane.xlu2 %1431  ;;  %v4192_v1 = vpop.xlane.xlu1 %1344 }
 0x194   :  { %5780 = vst [vmem:[#allocation19_spill] sm:$0xff] %v4190_v34  ;;  %v1576_v60 = vmax.f32 %v1575_v57, %v4192_v1  ;;  %v778_v57 = vadd.f32 %v3958_v25, %v777_v53  ;;  %v601_v34 = vadd.f32 %v3958_v25, %v600_v54  ;;  %v1496_v56 = vmax.f32 %v1495_v55, %v4156_v41 }
 0x196   :  { %v1577_v22 = vmax.f32 %v1576_v60, %v4199_v63  ;;  %v1527_v60 = vmax.f32 %v1526_v24, %v3986_v58  ;;  %v967_v27 = vmax.f32 %v778_v57, 0.0  ;;  %v908_v37 = vmax.f32 %v601_v34, 0.0 }
 0x198   :  { %v1578_v44 = vrot.slane %v1577_v22, 4  ;;  %1467 = vadd.xlane.f32.xlu2 %v1466_v11  ;;  %1290 = vadd.xlane.f32.xlu1 %v1289_v38  ;;  %v1528_v23 = vmax.f32 %v1527_v60, %v4014_v45  ;;  %v780_v11 = vpop.f32.mrf.mxu2  ;;  %v1029_v4 = vmul.f32 %v3970_v35, %v908_v37  ;;  %v1088_v55 = vmul.f32 %v3970_v35, %v967_v27 }
 0x199   :  { %v781_v24 = vadd.f32 %v3958_v25, %v780_v11 }
 0x19a   :  { %v1579_v20 = vmax.f32 %v1577_v22, %v1578_v44  ;;  %1293 = vadd.xlane.f32.xlu0 %v1292_v42  ;;  %v1529_v22 = vmax.f32 %v1528_v23, %v4020_v59  ;;  %v1202_v34 = vsel %vm1123_vm1, %v1029_v4, 0.0  ;;  %v1379_v57 = vsel %vm1123_vm1, %v1088_v55, 0.0 }
 0x19b   :  { %v4212_v14 = vpop.xlane.xlu2 %1167  ;;  %v968_v37 = vmax.f32 %v781_v24, 0.0 }
 0x19c   :  { %v1580_v28 = vrot.slane %v1579_v20, 2  ;;  %v1497_v53 = vmax.f32 %v1496_v56, %v4212_v14  ;;  %v1530_v56 = vmax.f32 %v1529_v22, %v4031_v15 }
 0x19e   :  { %v1581_v54 = vmax.f32 %v1579_v20, %v1580_v28  ;;  %v1498_v42 = vrot.slane %v1497_v53, 4  ;;  %v1531_v60 = vmax.f32 %v1530_v56, %v4076_v0 }
 0x1a0   :  { %v1582_v38 = vrot.slane %v1581_v54, 1  ;;  %1203 = vadd.xlane.f32.xlu2 %v1202_v34  ;;  %1380 = vadd.xlane.f32.xlu1 %v1379_v57  ;;  %v1532_v34 = vmax.f32 %v1531_v60, %v4084_v13 }
 0x1a2   :  { %v4220_v44 = vmax.f32 %v1581_v54, %v1582_v38  ;;  %v1499_v54 = vmax.f32 %v1497_v53, %v1498_v42  ;;  %v1089_v42 = vmul.f32 %v3970_v35, %v968_v37  ;;  %v1533_v57 = vmax.f32 %v1532_v34, %v4098_v9 }
 0x1a4   :  { %v1704_v28 = vsub.f32 %v3836_v46, %v4220_v44  ;;  %v1705_v20 = vsub.f32 %v3862_v3, %v4220_v44  ;;  %v1706_v23 = vsub.f32 %v3919_v47, %v4220_v44  ;;  %v1707_v25 = vsub.f32 %v3939_v7, %v4220_v44 }
 0x1a5   :  { %v1708_v27 = vsub.f32 %v3975_v39, %v4220_v44  ;;  %v1709_v11 = vsub.f32 %v4001_v19, %v4220_v44  ;;  %v1713_v46 = vsub.f32 %v4096_v6, %v4220_v44  ;;  %v1714_v3 = vsub.f32 %v4116_v10, %v4220_v44 }
 0x1a6   :  { %v1715_v47 = vsub.f32 %v4103_v30, %v4220_v44  ;;  %v1716_v7 = vsub.f32 %v4172_v43, %v4220_v44  ;;  %v1717_v39 = vsub.f32 %v4192_v1, %v4220_v44  ;;  %v1718_v53 = vsub.f32 %v4199_v63, %v4220_v44  ;;  %v3060_v1 = vld [vmem:[%s5717_s0 + $0x218] sm:$0xff] }
 0x1a7   :  { %v1884_v38 = vmul.f32 1.442695, %v1704_v28  ;;  %v1710_v19 = vsub.f32 %v4029_v17, %v4220_v44  ;;  %v1886_v6 = vmul.f32 1.442695, %v1705_v20  ;;  %v1888_v4 = vmul.f32 1.442695, %v1706_v23 }
 0x1a8   :  { %v1890_v55 = vmul.f32 1.442695, %v1707_v25  ;;  %v1711_v10 = vsub.f32 %v4046_v50, %v4220_v44  ;;  %v1892_v30 = vmul.f32 1.442695, %v1708_v27  ;;  %v1500_v22 = vrot.slane %v1499_v54, 2  ;;  %v3053_v27 = vld [vmem:[%s5717_s0 + $0x1e0] sm:$0xff] }
 0x1a9   :  { %2809 = vpow2.f32 %v1884_v38  ;;  %v1712_v43 = vsub.f32 %v4035_v26, %v4220_v44  ;;  %v1894_v24 = vmul.f32 1.442695, %v1709_v11  ;;  %v1896_v17 = vmul.f32 1.442695, %v1710_v19 }
 0x1aa   :  { %2811 = vpow2.f32 %v1886_v6  ;;  %v1898_v56 = vmul.f32 1.442695, %v1711_v10  ;;  %v1501_v28 = vmax.f32 %v1499_v54, %v1500_v22  ;;  %v1382_v20 = vsel %vm1123_vm1, %v1089_v42, 0.0  ;;  %v3054_v54 = vld [vmem:[%s5717_s0 + $0x1e8] sm:$0xff] }
 0x1ab   :  { %2813 = vpow2.f32 %v1888_v4  ;;  %v1900_v50 = vmul.f32 1.442695, %v1712_v43  ;;  %v1902_v26 = vmul.f32 1.442695, %v1713_v46  ;;  %1383 = vadd.xlane.f32.xlu0 %v1382_v20  ;;  %v1534_v35 = vmax.f32 %v1533_v57, %v4154_v12 }
 0x1ac   :  { %2815 = vpow2.f32 %v1890_v55  ;;  %v1904_v60 = vmul.f32 1.442695, %v1714_v3  ;;  %v1906_v38 = vmul.f32 1.442695, %v1715_v47  ;;  %v3055_v3 = vld [vmem:[%s5717_s0 + $0x1f0] sm:$0xff]  ;;  %v1502_v10 = vrot.slane %v1501_v28, 1 }
 0x1ad   :  { %2817 = vpow2.f32 %v1892_v30  ;;  %v3056_v47 = vld [vmem:[%s5717_s0 + $0x1f8] sm:$0xff]  ;;  %v1535_v34 = vmax.f32 %v1534_v35, %v4170_v61  ;;  %v3058_v35 = vld [vmem:[%s5717_s0 + $0x208] sm:$0xff] }
 0x1ae   :  { %2819 = vpow2.f32 %v1894_v24 }
 0x1af   :  { %v2810_v23 = vpop.eup %2809  ;;  %2821 = vpow2.f32 %v1896_v17  ;;  %v1908_v17 = vmul.f32 1.442695, %v1716_v7 }
 0x1b0   :  { %v2812_v25 = vpop.eup %2811  ;;  %v2064_v37 = vmul.f32 %v3053_v27, %v2810_v23  ;;  %2823 = vpow2.f32 %v1898_v56  ;;  %v3057_v56 = vld [vmem:[%s5717_s0 + $0x200] sm:$0xff]  ;;  %v1536_v27 = vmax.f32 %v1535_v34, %v4174_v40 }
 0x1b1   :  { %v2814_v11 = vpop.eup %2813  ;;  %v2065_v19 = vmul.f32 %v3054_v54, %v2812_v25  ;;  %v2484_v46 = vadd.f32 %v2812_v25, %v2810_v23  ;;  %2825 = vpow2.f32 %v1900_v50 }
 0x1b2   :  { %v2816_v6 = vpop.eup %2815  ;;  %v2066_v4 = vmul.f32 %v3055_v3, %v2814_v11  ;;  %v2264_v55 = vsel %vm144_vm0, %v2064_v37, 0.0  ;;  %2827 = vpow2.f32 %v1902_v26  ;;  %v4280_v26 = vpop.xlane.xlu2 %1257 }
 0x1b3   :  { %v2818_v30 = vpop.eup %2817  ;;  %v2067_v22 = vmul.f32 %v3056_v47, %v2816_v6  ;;  %v2265_v43 = vsel %vm144_vm0, %v2065_v19, 0.0  ;;  %v2485_v24 = vadd.f32 %v2814_v11, %v2484_v46  ;;  %2829 = vpow2.f32 %v1904_v60 }
 0x1b4   :  { %v2820_v42 = vpop.eup %2819  ;;  %v2266_v57 = vadd.f32 %v2265_v43, %v2264_v55  ;;  %v2068_v50 = vmul.f32 %v3057_v56, %v2818_v30  ;;  %v2267_v20 = vsel %vm144_vm0, %v2066_v4, 0.0  ;;  %2831 = vpow2.f32 %v1906_v38  ;;  %v3059_v55 = vld [vmem:[%s5717_s0 + $0x210] sm:$0xff]  ;;  %v3061_v43 = vld [vmem:[%s5717_s0 + $0x220] sm:$0xff] }
 0x1b5   :  { %v2486_v23 = vadd.f32 %v2816_v6, %v2485_v24  ;;  %v2822_v25 = vpop.eup %2821  ;;  %v4283_v11 = vmax.f32 %v1501_v28, %v1502_v10  ;;  %v2069_v60 = vmul.f32 %v3058_v35, %v2820_v42  ;;  %v2269_v54 = vsel %vm144_vm0, %v2067_v22, 0.0 }
 0x1b6   :  { %v2268_v37 = vadd.f32 %v2267_v20, %v2266_v57  ;;  %v2824_v7 = vpop.eup %2823  ;;  %v1910_v6 = vmul.f32 1.442695, %v1717_v39  ;;  %v1912_v38 = vmul.f32 1.442695, %v1718_v53  ;;  %v4296_v3 = vmax.f32 %v1536_v27, %v4280_v26  ;;  %v3063_v27 = vld [vmem:[%s5717_s0 + $0x230] sm:$0xff] }
 0x1b7   :  { %v2487_v19 = vadd.f32 %v2818_v30, %v2486_v23  ;;  %v2826_v46 = vpop.eup %2825  ;;  %2833 = vpow2.f32 %v1908_v17  ;;  %v2070_v10 = vmul.f32 %v3059_v55, %v2822_v25  ;;  %v2271_v30 = vsel %vm144_vm0, %v2068_v50, 0.0  ;;  %v4318_v50 = vpop.xlane.xlu0 %1170 }
 0x1b8   :  { %v2270_v28 = vadd.f32 %v2269_v54, %v2268_v37  ;;  %v2828_v4 = vpop.eup %2827  ;;  %v2071_v63 = vmul.f32 %v3060_v1, %v2824_v7  ;;  %v1644_v39 = vsub.f32 %v3816_v31, %v4283_v11  ;;  %v1645_v53 = vsub.f32 %v3901_v32, %v4283_v11  ;;  %v3062_v31 = vld [vmem:[%s5717_s0 + $0x228] sm:$0xff]  ;;  %5781 = vst [vmem:[#allocation20_spill] sm:$0xff] %v4318_v50 }
 0x1b9   :  { %v2488_v47 = vadd.f32 %v2820_v42, %v2487_v19  ;;  %v2830_v22 = vpop.eup %2829  ;;  %v2072_v24 = vmul.f32 %v3061_v43, %v2826_v46  ;;  %v2273_v42 = vsel %vm144_vm0, %v2069_v60, 0.0  ;;  %v1646_v17 = vsub.f32 %v3921_v48, %v4283_v11 }
 0x1ba   :  { %v2272_v44 = vadd.f32 %v2271_v30, %v2270_v28  ;;  %v2832_v57 = vpop.eup %2831  ;;  %2835 = vpow2.f32 %v1910_v6  ;;  %v2073_v56 = vmul.f32 %v3062_v31, %v2828_v4  ;;  %v1647_v20 = vsub.f32 %v3941_v8, %v4283_v11  ;;  %v3064_v8 = vld [vmem:[%s5717_s0 + $0x238] sm:$0xff] }
 0x1bb   :  { %v2489_v34 = vadd.f32 %v2822_v25, %v2488_v47  ;;  %2837 = vpow2.f32 %v1912_v38  ;;  %v2275_v23 = vsel %vm144_vm0, %v2070_v10, 0.0  ;;  %v1648_v48 = vsub.f32 %v3963_v33, %v4283_v11 }
 0x1bc   :  { %v2274_v32 = vadd.f32 %v2273_v42, %v2272_v44  ;;  %v2074_v37 = vmul.f32 %v3063_v27, %v2830_v22  ;;  %v2277_v60 = vsel %vm144_vm0, %v2071_v63, 0.0  ;;  %v1649_v54 = vsub.f32 %v3999_v18, %v4283_v11  ;;  %v867_v27 = vpop.f32.mrf.mxu3 }
 0x1bd   :  { %v2490_v25 = vadd.f32 %v2824_v7, %v2489_v34  ;;  %v2834_v19 = vpop.eup %2833  ;;  %v2075_v7 = vmul.f32 %v3064_v8, %v2832_v57  ;;  %v2279_v6 = vsel %vm144_vm0, %v2072_v24, 0.0  ;;  %v1650_v38 = vsub.f32 %v4005_v29, %v4283_v11 }
 0x1be   :  { %v2276_v35 = vadd.f32 %v2275_v23, %v2274_v32  ;;  %v2281_v55 = vsel %vm144_vm0, %v2073_v56, 0.0  ;;  %v1657_v10 = vsub.f32 %v4156_v41, %v4283_v11  ;;  %v1658_v18 = vsub.f32 %v4212_v14, %v4283_v11  ;;  %v3066_v23 = vld [vmem:[%s5717_s0 + $0x248] sm:$0xff] }
 0x1bf   :  { %v2491_v33 = vadd.f32 %v2826_v46, %v2490_v25  ;;  %v1764_v47 = vmul.f32 1.442695, %v1644_v39  ;;  %v1766_v1 = vmul.f32 1.442695, %v1645_v53  ;;  %v1768_v63 = vmul.f32 1.442695, %v1646_v17  ;;  %v4348_v39 = vpop.xlane.xlu1 %1434 }
 0x1c0   :  { %v2278_v28 = vadd.f32 %v2277_v60, %v2276_v35  ;;  %v2836_v44 = vpop.eup %2835  ;;  %v3065_v46 = vld [vmem:[%s5717_s0 + $0x240] sm:$0xff]  ;;  %v1651_v24 = vsub.f32 %v4016_v49, %v4283_v11  ;;  %v1770_v42 = vmul.f32 1.442695, %v1647_v20  ;;  %v2283_v31 = vsel %vm144_vm0, %v2074_v37, 0.0  ;;  %5782 = vst [vmem:[#allocation21_spill] sm:$0xff] %v4348_v39  ;;  %v4359_v35 = vpop.xlane.xlu0 %1260 }
 0x1c1   :  { %v2492_v30 = vadd.f32 %v2828_v4, %v2491_v33  ;;  %v2076_v43 = vmul.f32 %v3065_v46, %v2834_v19  ;;  %v2838_v34 = vpop.eup %2837  ;;  %2839 = vpow2.f32 %v1764_v47  ;;  %v1772_v4 = vmul.f32 1.442695, %v1648_v48 }
 0x1c2   :  { %v2280_v29 = vadd.f32 %v2279_v6, %v2278_v28  ;;  %v1652_v17 = vsub.f32 %v4059_v21, %v4283_v11  ;;  %2841 = vpow2.f32 %v1766_v1  ;;  %v1774_v32 = vmul.f32 1.442695, %v1649_v54 }
 0x1c3   :  { %v2493_v56 = vadd.f32 %v2830_v22, %v2492_v30  ;;  %v2077_v49 = vmul.f32 %v3066_v23, %v2836_v44  ;;  %v2285_v20 = vsel %vm144_vm0, %v2075_v7, 0.0  ;;  %2843 = vpow2.f32 %v1768_v63  ;;  %v3067_v22 = vld [vmem:[%s5717_s0 + $0x250] sm:$0xff] }
 0x1c4   :  { %v2282_v53 = vadd.f32 %v2281_v55, %v2280_v29  ;;  %v2078_v48 = vmul.f32 %v3067_v22, %v2838_v34  ;;  %2845 = vpow2.f32 %v1770_v42  ;;  %v1776_v21 = vmul.f32 1.442695, %v1650_v38 }
 0x1c5   :  { %v2494_v25 = vadd.f32 %v2832_v57, %v2493_v56  ;;  %v2287_v60 = vsel %vm144_vm0, %v2076_v43, 0.0  ;;  %v1653_v8 = vsub.f32 %v4065_v36, %v4283_v11  ;;  %2847 = vpow2.f32 %v1772_v4  ;;  %v3068_v36 = vld [vmem:[%s5717_s0] sm:$0xff] }
 0x1c6   :  { %v2284_v37 = vadd.f32 %v2283_v31, %v2282_v53  ;;  %v1654_v7 = vsub.f32 %v4078_v2, %v4283_v11  ;;  %2849 = vpow2.f32 %v1774_v32  ;;  %v1778_v6 = vmul.f32 1.442695, %v1651_v24  ;;  %v3070_v31 = vld [vmem:[%s5717_s0 + $0x10] sm:$0xff] }
 0x1c7   :  { %v2495_v54 = vadd.f32 %v2834_v19, %v2494_v25  ;;  %v2840_v33 = vpop.eup %2839  ;;  %v2289_v28 = vsel %vm144_vm0, %v2077_v49, 0.0  ;;  %v1655_v38 = vsub.f32 %v4134_v51, %v4283_v11  ;;  %v1780_v30 = vmul.f32 1.442695, %v1652_v17  ;;  %v3069_v51 = vld [vmem:[%s5717_s0 + $0x8] sm:$0xff]  ;;  %v3071_v17 = vld [vmem:[%s5717_s0 + $0x18] sm:$0xff]  ;;  %v4394_v49 = vpop.xlane.xlu1 %1173 }
 0x1c8   :  { %v2286_v57 = vadd.f32 %v2285_v20, %v2284_v37  ;;  %v2842_v47 = vpop.eup %2841  ;;  %v2291_v1 = vsel %vm144_vm0, %v2078_v48, 0.0  ;;  %2851 = vpow2.f32 %v1776_v21  ;;  %v2004_v2 = vmul.f32 %v3068_v36, %v2840_v33  ;;  %5783 = vst [vmem:[#allocation22_spill] sm:$0xff] %v4394_v49  ;;  %v693_v37 = vpop.f32.mrf.mxu1  ;;  %v3072_v21 = vld [vmem:[%s5717_s0 + $0x20] sm:$0xff] }
 0x1c9   :  { %v2496_v55 = vadd.f32 %v2836_v44, %v2495_v54  ;;  %v4373_v63 = vpop.eup %2843  ;;  %v1782_v43 = vmul.f32 1.442695, %v1653_v8  ;;  %v2005_v44 = vmul.f32 %v3069_v51, %v2842_v47  ;;  %v2404_v29 = vadd.f32 %v2842_v47, %v2840_v33  ;;  %v870_v8 = vpop.f32.mrf.mxu3 }
 0x1ca   :  { %v2288_v19 = vadd.f32 %v2287_v60, %v2286_v57  ;;  %v4380_v24 = vpop.eup %2845  ;;  %2853 = vpow2.f32 %v1778_v6  ;;  %v2006_v56 = vmul.f32 %v3070_v31, %v4373_v63  ;;  %v1784_v53 = vmul.f32 1.442695, %v1654_v7 }
 0x1cb   :  { %v4375_v46 = vadd.f32 %v2838_v34, %v2496_v55  ;;  %v2124_v34 = vsel %vm144_vm0, %v2004_v2, 0.0  ;;  %v4387_v4 = vpop.eup %2847  ;;  %2855 = vpow2.f32 %v1780_v30  ;;  %v2007_v32 = vmul.f32 %v3071_v17, %v4380_v24  ;;  %v4416_v55 = vpop.xlane.xlu0 %1350  ;;  %v3074_v30 = vld [vmem:[%s5717_s0 + $0x28] sm:$0xff] }
 0x1cc   :  { %v2290_v42 = vadd.f32 %v2289_v28, %v2288_v19  ;;  %v2125_v23 = vsel %vm144_vm0, %v2005_v44, 0.0  ;;  %v4396_v20 = vpop.eup %2849  ;;  %v1656_v22 = vsub.f32 %v4147_v62, %v4283_v11  ;;  %2857 = vpow2.f32 %v1782_v43  ;;  %v4413_v62 = vld [vmem:[%s5719_s2] ss:$0 sm:$0xff]  ;;  %5784 = vst [vmem:[#allocation23_spill] sm:$0xff] %v4416_v55 }
 0x1cd   :  { %v2126_v48 = vadd.f32 %v2125_v23, %v2124_v34  ;;  %v2008_v60 = vmul.f32 %v3072_v21, %v4387_v4  ;;  %v2127_v54 = vsel %vm144_vm0, %v2006_v56, 0.0  ;;  %v1538_v57 = vrot.slane %v4296_v3, 4 }
 0x1ce   :  { %v4398_v25 = vadd.f32 %v2291_v1, %v2290_v42  ;;  %v4408_v7 = vpop.eup %2851  ;;  %v868_v6 = vadd.f32 %v4413_v62, %v867_v27  ;;  %v1786_v33 = vmul.f32 1.442695, %v1655_v38  ;;  %2859 = vpow2.f32 %v1784_v53  ;;  %v4423_v1 = vpop.f32.mrf.mxu0  ;;  %v3075_v42 = vld [vmem:[%s5717_s0 + $0x30] sm:$0xff] }
 0x1cf   :  { %v2128_v28 = vadd.f32 %v2127_v54, %v2126_v48  ;;  %v2009_v47 = vmul.f32 %v3074_v30, %v4396_v20  ;;  %v2129_v19 = vsel %vm144_vm0, %v2007_v32, 0.0  ;;  %v694_v36 = vadd.f32 %v4413_v62, %v693_v37 }
 0x1d0   :  { %v4426_v2 = vpop.eup %2853  ;;  %v1788_v27 = vmul.f32 1.442695, %v1656_v22  ;;  %v871_v43 = vadd.f32 %v4413_v62, %v870_v8  ;;  %v1790_v44 = vmul.f32 1.442695, %v1657_v10  ;;  %v2010_v31 = vmul.f32 %v3075_v42, %v4408_v7  ;;  %v3076_v10 = vld [vmem:[%s5717_s0 + $0x38] sm:$0xff]  ;;  %v4458_v8 = vpop.xlane.xlu2 %1176 }
 0x1d1   :  { %v2130_v38 = vadd.f32 %v2129_v19, %v2128_v28  ;;  %v4429_v51 = vpop.eup %2855  ;;  %v2131_v56 = vsel %vm144_vm0, %v2008_v60, 0.0  ;;  %v1539_v34 = vmax.f32 %v4296_v3, %v1538_v57  ;;  %2861 = vpow2.f32 %v1786_v33  ;;  %v3077_v3 = vld [vmem:[%s5717_s0 + $0x40] sm:$0xff]  ;;  %v4460_v57 = vpop.xlane.xlu1 %1263 }
 0x1d2   :  { %v1792_v53 = vmul.f32 1.442695, %v1658_v18  ;;  %v4443_v32 = vpop.eup %2857  ;;  %v997_v41 = vmax.f32 %v868_v6, 0.0  ;;  %v2011_v23 = vmul.f32 %v3076_v10, %v4426_v2  ;;  %v2133_v22 = vsel %vm144_vm0, %v2009_v47, 0.0  ;;  %v3078_v6 = vld [vmem:[%s5717_s0 + $0x48] sm:$0xff] }
 0x1d3   :  { %v2132_v17 = vadd.f32 %v2131_v56, %v2130_v38  ;;  %v939_v48 = vmax.f32 %v694_v36, 0.0  ;;  %2863 = vpow2.f32 %v1788_v27  ;;  %v2012_v14 = vmul.f32 %v3077_v3, %v4429_v51  ;;  %v4471_v47 = vld [vmem:[%s5719_s2 + $0x1] ss:$0 sm:$0xff]  ;;  %v3080_v38 = vld [vmem:[%s5717_s0 + $0x50] sm:$0xff] }
 0x1d4   :  { %v2405_v18 = vadd.f32 %v4373_v63, %v2404_v29  ;;  %v4455_v37 = vpop.eup %2859  ;;  %2865 = vpow2.f32 %v1790_v44  ;;  %v2135_v21 = vsel %vm144_vm0, %v2010_v31, 0.0  ;;  %v998_v60 = vmax.f32 %v871_v43, 0.0  ;;  %v4483_v31 = vpop.xlane.xlu0 %1440 }
 0x1d5   :  { %v2134_v11 = vadd.f32 %v2133_v22, %v2132_v17  ;;  %v1540_v54 = vrot.slane %v1539_v34, 2  ;;  %2867 = vpow2.f32 %v1792_v53  ;;  %v2013_v33 = vmul.f32 %v3078_v6, %v4443_v32  ;;  %5785 = vst [vmem:[#allocation24_spill] sm:$0xff] %v4483_v31 }
 0x1d6   :  { %v2406_v63 = vadd.f32 %v4380_v24, %v2405_v18  ;;  %v2137_v29 = vsel %vm144_vm0, %v2011_v23, 0.0  ;;  %v1060_v19 = vmul.f32 %v4471_v47, %v939_v48  ;;  %v1118_v36 = vmul.f32 %v4471_v47, %v997_v41  ;;  %v783_v48 = vpop.f32.mrf.mxu2 }
 0x1d7   :  { %v2136_v28 = vadd.f32 %v2135_v21, %v2134_v11  ;;  %v1541_v30 = vmax.f32 %v1539_v34, %v1540_v54  ;;  %v4475_v27 = vpop.eup %2861  ;;  %v2014_v24 = vmul.f32 %v3080_v38, %v4455_v37  ;;  %v2139_v44 = vsel %vm144_vm0, %v2012_v14, 0.0  ;;  %v606_v34 = vpop.f32.mrf.mxu0  ;;  %v3083_v38 = vld [vmem:[%s5717_s0 + $0x68] sm:$0xff] }
 0x1d8   :  { %v2407_v42 = vadd.f32 %v4387_v4, %v2406_v63  ;;  %v1295_v53 = vsel %vm1123_vm1, %v1060_v19, 0.0  ;;  %v1469_v17 = vsel %vm1123_vm1, %v1118_v36, 0.0  ;;  %v1119_v41 = vmul.f32 %v4471_v47, %v998_v60  ;;  %v3081_v4 = vld [vmem:[%s5717_s0 + $0x58] sm:$0xff] }
 0x1d9   :  { %v2138_v43 = vadd.f32 %v2137_v29, %v2136_v28  ;;  %v1542_v56 = vrot.slane %v1541_v30, 1  ;;  %v2864_v10 = vpop.eup %2863  ;;  %1296 = vadd.xlane.f32.xlu2 %v1295_v53  ;;  %1470 = vadd.xlane.f32.xlu1 %v1469_v17  ;;  %v2015_v14 = vmul.f32 %v3081_v4, %v4475_v27  ;;  %v2141_v11 = vsel %vm144_vm0, %v2013_v33, 0.0  ;;  %v3082_v28 = vld [vmem:[%s5717_s0 + $0x60] sm:$0xff] }
 0x1da   :  { %v2408_v22 = vadd.f32 %v4396_v20, %v2407_v42  ;;  %v2866_v3 = vpop.eup %2865  ;;  %v1472_v21 = vsel %vm1123_vm1, %v1119_v41, 0.0  ;;  %v607_v6 = vadd.f32 %v4413_v62, %v606_v34  ;;  %v2016_v63 = vmul.f32 %v3082_v28, %v2864_v10  ;;  %v4513_v42 = vpop.xlane.xlu2 %1266  ;;  %v5787_v28 = vld [vmem:[#allocation6_spill] sm:$0xff] }
 0x1db   :  { %v2140_v23 = vadd.f32 %v2139_v44, %v2138_v43  ;;  %v4494_v18 = vmax.f32 %v1541_v30, %v1542_v56  ;;  %v2868_v60 = vpop.eup %2867  ;;  %1473 = vadd.xlane.f32.xlu0 %v1472_v21  ;;  %v2143_v29 = vsel %vm144_vm0, %v2014_v24, 0.0  ;;  %v784_v30 = vadd.f32 %v4413_v62, %v783_v48  ;;  %v4515_v24 = vpop.xlane.xlu1 %1353 }
 0x1dc   :  { %v2409_v20 = vadd.f32 %v4408_v7, %v2408_v22  ;;  %v2017_v43 = vmul.f32 %v3083_v38, %v2866_v3  ;;  %v2145_v44 = vsel %vm144_vm0, %v2015_v14, 0.0  ;;  %5786 = vst [vmem:[#allocation25_spill] sm:$0xff] %v4515_v24  ;;  %v910_v34 = vmax.f32 %v607_v6, 0.0  ;;  %v4523_v4 = vpop.xlane.xlu0 %1179 }
 0x1dd   :  { %v2142_v54 = vadd.f32 %v2141_v11, %v2140_v23  ;;  %v1674_v33 = vsub.f32 %v3846_v52, %v4494_v18  ;;  %v1675_v7 = vsub.f32 %v3864_v5, %v4494_v18  ;;  %v2147_v53 = vsel %vm144_vm0, %v2016_v63, 0.0 }
 0x1de   :  { %v2410_v36 = vadd.f32 %v4426_v2, %v2409_v20  ;;  %v3084_v2 = vld [vmem:[%s5717_s0 + $0x70] sm:$0xff]  ;;  %v969_v41 = vmax.f32 %v784_v30, 0.0  ;;  %v2149_v14 = vsel %vm144_vm0, %v2017_v43, 0.0  ;;  %v1031_v20 = vmul.f32 %v4471_v47, %v910_v34 }
 0x1df   :  { %v2144_v19 = vadd.f32 %v2143_v29, %v2142_v54  ;;  %v2018_v5 = vmul.f32 %v3084_v2, %v2868_v60  ;;  %v1824_v17 = vmul.f32 1.442695, %v1674_v33  ;;  %v1826_v48 = vmul.f32 1.442695, %v1675_v7  ;;  %v696_v29 = vpop.f32.mrf.mxu1 }
 0x1e0   :  { %v2411_v56 = vadd.f32 %v4429_v51, %v2410_v36  ;;  %v1090_v54 = vmul.f32 %v4471_v47, %v969_v41  ;;  %v1676_v63 = vsub.f32 %v5787_v28, %v4494_v18  ;;  %v1208_v38 = vsel %vm1123_vm1, %v1031_v20, 0.0 }
 0x1e1   :  { %v2146_v52 = vadd.f32 %v2145_v44, %v2144_v19  ;;  %2869 = vpow2.f32 %v1824_v17  ;;  %v2151_v21 = vsel %vm144_vm0, %v2018_v5, 0.0  ;;  %v1677_v19 = vsub.f32 %v3949_v16, %v4494_v18  ;;  %1209 = vadd.xlane.f32.xlu1 %v1208_v38 }
 0x1e2   :  { %v2412_v22 = vadd.f32 %v4443_v32, %v2411_v56  ;;  %2871 = vpow2.f32 %v1826_v48  ;;  %v4535_v33 = vpop.xlane.xlu2 %1356  ;;  %v1385_v7 = vsel %vm1123_vm1, %v1090_v54, 0.0  ;;  %v1678_v44 = vsub.f32 %v3986_v58, %v4494_v18 }
 0x1e3   :  { %v2148_v23 = vadd.f32 %v2147_v53, %v2146_v52  ;;  %5788 = vst [vmem:[#allocation6_spill] sm:$0xff] %v4535_v33  ;;  %v4537_v30 = vpop.xlane.xlu1 %1443  ;;  %v1828_v52 = vmul.f32 1.442695, %v1676_v63  ;;  %1386 = vadd.xlane.f32.xlu2 %v1385_v7  ;;  %v1679_v16 = vsub.f32 %v4014_v45, %v4494_v18  ;;  %v1830_v34 = vmul.f32 1.442695, %v1677_v19  ;;  %v873_v45 = vpop.f32.mrf.mxu3 }
 0x1e4   :  { %v2413_v11 = vadd.f32 %v4455_v37, %v2412_v22  ;;  %5789 = vst [vmem:[#allocation26_spill] sm:$0xff] %v4537_v30  ;;  %v4555_v2 = vpop.xlane.xlu0 %1269  ;;  %v1832_v5 = vmul.f32 1.442695, %v1678_v44  ;;  %v604_v58 = vadd.f32 %v4413_v62, %v4423_v1  ;;  %v1681_v53 = vsub.f32 %v4031_v15, %v4494_v18  ;;  %v786_v15 = vpop.f32.mrf.mxu2 }
 0x1e5   :  { %v2150_v51 = vadd.f32 %v2149_v14, %v2148_v23  ;;  %2873 = vpow2.f32 %v1828_v52  ;;  %v1682_v22 = vsub.f32 %v4076_v0, %v4494_v18  ;;  %v1683_v1 = vsub.f32 %v4084_v13, %v4494_v18  ;;  %v609_v52 = vpop.f32.mrf.mxu0 }
 0x1e6   :  { %v2414_v32 = vadd.f32 %v4475_v27, %v2413_v11  ;;  %2875 = vpow2.f32 %v1830_v34  ;;  %v909_v48 = vmax.f32 %v604_v58, 0.0  ;;  %v697_v14 = vadd.f32 %v4413_v62, %v696_v29 }
 0x1e7   :  { %v4530_v6 = vadd.f32 %v2151_v21, %v2150_v51  ;;  %v4541_v36 = vpop.eup %2869  ;;  %v699_v23 = vpop.f32.mrf.mxu1  ;;  %2877 = vpow2.f32 %v1832_v5  ;;  %v1838_v11 = vmul.f32 1.442695, %v1681_v53  ;;  %v874_v21 = vadd.f32 %v4413_v62, %v873_v45 }
 0x1e8   :  { %v2415_v37 = vadd.f32 %v2864_v10, %v2414_v32  ;;  %v4545_v43 = vpop.eup %2871  ;;  %v700_v54 = vadd.f32 %v4413_v62, %v699_v23  ;;  %v1684_v32 = vsub.f32 %v4098_v9, %v4494_v18  ;;  %v1685_v13 = vsub.f32 %v4154_v12, %v4494_v18 }
 0x1e9   :  { %v2444_v10 = vadd.f32 %v4545_v43, %v4541_v36  ;;  %v1840_v28 = vmul.f32 1.442695, %v1682_v22  ;;  %v1842_v29 = vmul.f32 1.442695, %v1683_v1  ;;  %v940_v19 = vmax.f32 %v697_v14, 0.0 }
 0x1ea   :  { %v2416_v27 = vadd.f32 %v2866_v3, %v2415_v37  ;;  %v1680_v3 = vsub.f32 %v4020_v59, %v4494_v18  ;;  %v4563_v17 = vpop.xlane.xlu2 %1446  ;;  %v999_v38 = vmax.f32 %v874_v21, 0.0  ;;  %v1030_v44 = vmul.f32 %v4471_v47, %v909_v48 }
 0x1eb   :  { %5790 = vst [vmem:[#allocation27_spill] sm:$0xff] %v4563_v17  ;;  %v4565_v41 = vpop.xlane.xlu1 %1359  ;;  %v4572_v51 = vpop.eup %2873  ;;  %v1686_v9 = vsub.f32 %v4170_v61, %v4494_v18  ;;  %v1687_v12 = vsub.f32 %v4174_v40, %v4494_v18  ;;  %v1846_v5 = vmul.f32 1.442695, %v1685_v13  ;;  %v610_v40 = vadd.f32 %v4413_v62, %v609_v52 }
 0x1ec   :  { %v4551_v56 = vadd.f32 %v2868_v60, %v2416_v27  ;;  %v1834_v60 = vmul.f32 1.442695, %v1679_v16  ;;  %5791 = vst [vmem:[#allocation28_spill] sm:$0xff] %v4565_v41  ;;  %v1836_v59 = vmul.f32 1.442695, %v1680_v3  ;;  %v2445_v20 = vadd.f32 %v4572_v51, %v2444_v10  ;;  %v4577_v0 = vpop.eup %2875  ;;  %v4583_v63 = vpop.xlane.xlu0 %1449 }
 0x1ed   :  { %5792 = vst [vmem:[#allocation29_spill] sm:$0xff] %v4583_v63  ;;  %v4586_v7 = vpop.eup %2877  ;;  %v941_v27 = vmax.f32 %v700_v54, 0.0  ;;  %v876_v16 = vpop.f32.mrf.mxu3  ;;  %v1844_v3 = vmul.f32 1.442695, %v1684_v32  ;;  %v1205_v58 = vsel %vm1123_vm1, %v1030_v44, 0.0  ;;  %v787_v45 = vadd.f32 %v4413_v62, %v786_v15 }
 0x1ee   :  { %2879 = vpow2.f32 %v1834_v60  ;;  %v2446_v37 = vadd.f32 %v4577_v0, %v2445_v20  ;;  %1206 = vadd.xlane.f32.xlu0 %v1205_v58  ;;  %v1120_v22 = vmul.f32 %v4471_v47, %v999_v38  ;;  %v877_v48 = vadd.f32 %v4413_v62, %v876_v16  ;;  %v789_v20 = vpop.f32.mrf.mxu2 }
 0x1ef   :  { %2881 = vpow2.f32 %v1836_v59  ;;  %v1061_v59 = vmul.f32 %v4471_v47, %v940_v19  ;;  %v1062_v1 = vmul.f32 %v4471_v47, %v941_v27  ;;  %v1688_v14 = vsub.f32 %v4280_v26, %v4494_v18 }
 0x1f0   :  { %2883 = vpow2.f32 %v1838_v11  ;;  %v2447_v10 = vadd.f32 %v4586_v7, %v2446_v37  ;;  %v911_v21 = vmax.f32 %v610_v40, 0.0  ;;  %v970_v54 = vmax.f32 %v787_v45, 0.0 }
 0x1f1   :  { %2885 = vpow2.f32 %v1840_v28  ;;  %v1848_v15 = vmul.f32 1.442695, %v1686_v9  ;;  %v1475_v13 = vsel %vm1123_vm1, %v1120_v22, 0.0  ;;  %v1298_v28 = vsel %vm1123_vm1, %v1061_v59, 0.0 }
 0x1f2   :  { %v4597_v53 = vpop.xlane.xlu2 %1362  ;;  %2887 = vpow2.f32 %v1842_v29  ;;  %v1850_v29 = vmul.f32 1.442695, %v1687_v12  ;;  %1476 = vadd.xlane.f32.xlu2 %v1475_v13  ;;  %1299 = vadd.xlane.f32.xlu1 %v1298_v28  ;;  %v1000_v18 = vmax.f32 %v877_v48, 0.0  ;;  %v1301_v19 = vsel %vm1123_vm1, %v1062_v1, 0.0 }
 0x1f3   :  { %5793 = vst [vmem:[#allocation30_spill] sm:$0xff] %v4597_v53  ;;  %v4599_v60 = vpop.xlane.xlu1 %1182  ;;  %2889 = vpow2.f32 %v1844_v3  ;;  %v790_v38 = vadd.f32 %v4413_v62, %v789_v20  ;;  %v1032_v27 = vmul.f32 %v4471_v47, %v911_v21  ;;  %v1091_v12 = vmul.f32 %v4471_v47, %v970_v54 }
 0x1f4   :  { %v4594_v34 = vpop.eup %2879  ;;  %2891 = vpow2.f32 %v1846_v5  ;;  %v4623_v44 = vpop.xlane.xlu0 %1365  ;;  %v1852_v3 = vmul.f32 1.442695, %v1688_v14  ;;  %v1121_v22 = vmul.f32 %v4471_v47, %v1000_v18 }
 0x1f5   :  { %v2448_v61 = vadd.f32 %v4594_v34, %v2447_v10  ;;  %v4604_v23 = vpop.eup %2881  ;;  %5794 = vst [vmem:[#allocation31_spill] sm:$0xff] %v4623_v44  ;;  %v5795_v10 = vld [vmem:[#allocation8_spill] sm:$0xff]  ;;  %2893 = vpow2.f32 %v1848_v15  ;;  %v1211_v40 = vsel %vm1123_vm1, %v1032_v27, 0.0  ;;  %v1388_v45 = vsel %vm1123_vm1, %v1091_v12, 0.0 }
 0x1f6   :  { %v4613_v32 = vpop.eup %2883  ;;  %v835_v16 = vadd.f32 %v4413_v62, %v5795_v10  ;;  %2895 = vpow2.f32 %v1850_v29  ;;  %1302 = vadd.xlane.f32.xlu0 %v1301_v19  ;;  %v1478_v15 = vsel %vm1123_vm1, %v1121_v22, 0.0 }
 0x1f7   :  { %v2449_v11 = vadd.f32 %v4604_v23, %v2448_v61  ;;  %v4618_v26 = vpop.eup %2885  ;;  %v971_v61 = vmax.f32 %v790_v38, 0.0  ;;  %2897 = vpow2.f32 %v1852_v3 }
 0x1f8   :  { %v4625_v52 = vpop.eup %2887  ;;  %v986_v21 = vmax.f32 %v835_v16, 0.0 }
 0x1f9   :  { %v2450_v37 = vadd.f32 %v4613_v32, %v2449_v11  ;;  %v4632_v58 = vpop.eup %2889  ;;  %v879_v11 = vpop.f32.mrf.mxu3  ;;  %v1092_v28 = vmul.f32 %v4471_v47, %v971_v61 }
 0x1fa   :  { %v4637_v59 = vpop.xlane.xlu2 %1185  ;;  %v4641_v1 = vpop.eup %2891  ;;  %1212 = vadd.xlane.f32.xlu2 %v1211_v40  ;;  %1389 = vadd.xlane.f32.xlu1 %v1388_v45  ;;  %v880_v13 = vadd.f32 %v4413_v62, %v879_v11  ;;  %v1107_v18 = vmul.f32 %v4471_v47, %v986_v21 }
 0x1fb   :  { %v2451_v9 = vadd.f32 %v4618_v26, %v2450_v37  ;;  %5796 = vst [vmem:[#allocation8_spill] sm:$0xff] %v4637_v59  ;;  %v4639_v48 = vpop.xlane.xlu1 %1272  ;;  %v4645_v20 = vpop.eup %2893  ;;  %v1391_v12 = vsel %vm1123_vm1, %v1092_v28, 0.0 }
 0x1fc   :  { %v4650_v29 = vpop.eup %2895  ;;  %v4654_v19 = vpop.xlane.xlu0 %1455  ;;  %v1436_v10 = vsel %vm1123_vm1, %v1107_v18, 0.0  ;;  %v3085_v18 = vld [vmem:[%s5717_s0 + $0xf0] sm:$0xff] }
 0x1fd   :  { %v2452_v5 = vadd.f32 %v4625_v52, %v2451_v9  ;;  %5797 = vst [vmem:[#allocation32_spill] sm:$0xff] %v4654_v19  ;;  %v4657_v27 = vpop.eup %2897  ;;  %v1001_v9 = vmax.f32 %v880_v13, 0.0 }
 0x1fe   :  { %1479 = vadd.xlane.f32.xlu0 %v1478_v15 }
 0x1ff   :  { %v2453_v14 = vadd.f32 %v4632_v58, %v2452_v5  ;;  %v1122_v5 = vmul.f32 %v4471_v47, %v1001_v9  ;;  %v3086_v9 = vld [vmem:[%s5717_s0 + $0xf8] sm:$0xff] }
 0x201   :  { %v2454_v54 = vadd.f32 %v4641_v1, %v2453_v14  ;;  %v1481_v61 = vsel %vm1123_vm1, %v1122_v5, 0.0 }
 0x202   :  { %v4664_v16 = vpop.xlane.xlu2 %1275  ;;  %1392 = vadd.xlane.f32.xlu2 %v1391_v12  ;;  %1437 = vadd.xlane.f32.xlu1 %v1436_v10  ;;  %v2035_v12 = vmul.f32 %v3086_v9, %v4545_v43  ;;  %v3088_v43 = vld [vmem:[%s5717_s0 + $0x108] sm:$0xff] }
 0x203   :  { %v2455_v37 = vadd.f32 %v4645_v20, %v2454_v54  ;;  %v4666_v3 = vpop.xlane.xlu1 %1452 }
 0x204   :  { %5798 = vst [vmem:[#allocation33_spill] sm:$0xff] %v4666_v3  ;;  %v4670_v40 = vpop.xlane.xlu0 %1188  ;;  %v2195_v5 = vsel %vm144_vm0, %v2035_v12, 0.0 }
 0x205   :  { %v2456_v38 = vadd.f32 %v4650_v29, %v2455_v37 }
 0x207   :  { %v4661_v62 = vadd.f32 %v4657_v27, %v2456_v38  ;;  %v2034_v38 = vmul.f32 %v3085_v18, %v4541_v36 }
 0x209   :  { %v2194_v10 = vsel %vm144_vm0, %v2034_v38, 0.0  ;;  %v2037_v38 = vmul.f32 %v3088_v43, %v4577_v0 }
 0x20a   :  { %1482 = vadd.xlane.f32.xlu2 %v1481_v61  ;;  %v4672_v45 = vpop.xlane.xlu2 %1368  ;;  %v2196_v39 = vadd.f32 %v2195_v5, %v2194_v10 }
 0x20b   :  { %5799 = vst [vmem:[#allocation34_spill] sm:$0xff] %v4672_v45  ;;  %v4674_v22 = vpop.xlane.xlu1 %1191 }
 0x20c   :  { %v4676_v14 = vpop.xlane.xlu0 %1278 }
 0x20d   :  { %5800 = vst [vmem:[#allocation35_spill] sm:$0xff] %v4676_v14 }
 0x212   :  { %v4678_v11 = vpop.xlane.xlu2 %1458 }
 0x213   :  { %5801 = vst [vmem:[#allocation36_spill] sm:$0xff] %v4678_v11  ;;  %v4680_v21 = vpop.xlane.xlu1 %1281 }
 0x214   :  { %v4682_v54 = vpop.xlane.xlu0 %1284 }
 0x21a   :  { %v4684_v15 = vpop.xlane.xlu2 %1194 }
 0x21b   :  { %v4686_v47 = vpop.xlane.xlu1 %1371 }
 0x21c   :  { %5802 = vst [vmem:[#allocation37_spill] sm:$0xff] %v4686_v47  ;;  %v4688_v13 = vpop.xlane.xlu0 %1374 }
 0x21d   :  { %5803 = vst [vmem:[#allocation38_spill] sm:$0xff] %v4688_v13  ;;  %v3087_v13 = vld [vmem:[%s5717_s0 + $0x100] sm:$0xff] }
 0x222   :  { %v4690_v28 = vpop.xlane.xlu2 %1287 }
 0x223   :  { %v4692_v37 = vpop.xlane.xlu1 %1461 }
 0x224   :  { %5804 = vst [vmem:[#allocation39_spill] sm:$0xff] %v4692_v37  ;;  %v4704_v61 = vpop.xlane.xlu0 %1464  ;;  %v2036_v37 = vmul.f32 %v3087_v13, %v4572_v51  ;;  %v2199_v13 = vsel %vm144_vm0, %v2037_v38, 0.0 }
 0x225   :  { %5805 = vst [vmem:[#allocation40_spill] sm:$0xff] %v4704_v61  ;;  %v3089_v61 = vld [vmem:[%s5717_s0 + $0x110] sm:$0xff] }
 0x226   :  { %v2197_v9 = vsel %vm144_vm0, %v2036_v37, 0.0  ;;  %v2038_v51 = vmul.f32 %v3089_v61, %v4586_v7  ;;  %v3091_v7 = vld [vmem:[%s5717_s0 + $0x120] sm:$0xff] }
 0x227   :  { %v2198_v12 = vadd.f32 %v2197_v9, %v2196_v39  ;;  %v2040_v61 = vmul.f32 %v3091_v7, %v4604_v23  ;;  %v3093_v23 = vld [vmem:[%s5717_s0 + $0x130] sm:$0xff] }
 0x228   :  { %v2201_v37 = vsel %vm144_vm0, %v2038_v51, 0.0 }
 0x229   :  { %v2200_v5 = vadd.f32 %v2199_v13, %v2198_v12  ;;  %v2205_v51 = vsel %vm144_vm0, %v2040_v61, 0.0  ;;  %v3094_v61 = vld [vmem:[%s5717_s0 + $0x138] sm:$0xff] }
 0x22a   :  { %v4710_v36 = vpop.xlane.xlu2 %1377 }
 0x22b   :  { %5806 = vst [vmem:[#allocation41_spill] sm:$0xff] %v4710_v36  ;;  %v4712_v18 = vpop.xlane.xlu1 %1200  ;;  %v3090_v36 = vld [vmem:[%s5717_s0 + $0x118] sm:$0xff]  ;;  %v2202_v9 = vadd.f32 %v2201_v37, %v2200_v5 }
 0x22c   :  { %v4724_v10 = vpop.xlane.xlu0 %1197  ;;  %v2039_v0 = vmul.f32 %v3090_v36, %v4594_v34  ;;  %v3092_v34 = vld [vmem:[%s5717_s0 + $0x128] sm:$0xff] }
 0x22d   :  { %v2041_v36 = vmul.f32 %v3092_v34, %v4613_v32 }
 0x22e   :  { %v2203_v38 = vsel %vm144_vm0, %v2039_v0, 0.0  ;;  %v2042_v0 = vmul.f32 %v3093_v23, %v4618_v26 }
 0x22f   :  { %v2204_v12 = vadd.f32 %v2203_v38, %v2202_v9  ;;  %v2207_v9 = vsel %vm144_vm0, %v2041_v36, 0.0  ;;  %v1544_v38 = vmax.f32 %v4359_v35, %v4460_v57 }
 0x230   :  { %v2209_v34 = vsel %vm144_vm0, %v2042_v0, 0.0 }
 0x231   :  { %v2206_v5 = vadd.f32 %v2205_v51, %v2204_v12  ;;  %v1545_v32 = vmax.f32 %v1544_v38, %v4513_v42  ;;  %v2043_v12 = vmul.f32 %v3094_v61, %v4625_v52 }
 0x232   :  { %v4731_v39 = vpop.xlane.xlu2 %1467 }
 0x233   :  { %5807 = vst [vmem:[#allocation42_spill] sm:$0xff] %v4731_v39  ;;  %v4733_v43 = vpop.xlane.xlu1 %1290  ;;  %v2208_v7 = vadd.f32 %v2207_v9, %v2206_v5  ;;  %v1546_v26 = vmax.f32 %v1545_v32, %v4555_v2  ;;  %v3095_v5 = vld [vmem:[%s5717_s0 + $0x140] sm:$0xff]  ;;  %v2211_v9 = vsel %vm144_vm0, %v2043_v12, 0.0 }
 0x234   :  { %v4740_v13 = vpop.xlane.xlu0 %1293  ;;  %v2044_v23 = vmul.f32 %v3095_v5, %v4632_v58  ;;  %v3096_v58 = vld [vmem:[%s5717_s0 + $0x148] sm:$0xff] }
 0x235   :  { %v1547_v36 = vmax.f32 %v1546_v26, %v4639_v48  ;;  %v1504_v26 = vmax.f32 %v4318_v50, %v4394_v49  ;;  %v2045_v12 = vmul.f32 %v3096_v58, %v4641_v1  ;;  %v5814_v49 = vld [vmem:[#allocation10_spill] sm:$0xff] }
 0x236   :  { %v2213_v5 = vsel %vm144_vm0, %v2044_v23, 0.0 }
 0x237   :  { %v1548_v61 = vmax.f32 %v1547_v36, %v4664_v16  ;;  %v1505_v36 = vmax.f32 %v1504_v26, %v4458_v8  ;;  %v2215_v23 = vsel %vm144_vm0, %v2045_v12, 0.0  ;;  %v5816_v12 = vld [vmem:[#allocation12_spill] sm:$0xff] }
 0x23a   :  { %v4747_v37 = vpop.xlane.xlu2 %1203 }
 0x23b   :  { %v4749_v39 = vpop.xlane.xlu1 %1380 }
 0x23c   :  { %5808 = vst [vmem:[#allocation43_spill] sm:$0xff] %v4749_v39  ;;  %v4764_v51 = vpop.xlane.xlu0 %1383  ;;  %v2210_v39 = vadd.f32 %v2209_v34, %v2208_v7  ;;  %v5811_v7 = vld [vmem:[#allocation7_spill] sm:$0xff]  ;;  %v5812_v34 = vld [vmem:[#allocation5_spill] sm:$0xff] }
 0x23d   :  { %5809 = vst [vmem:[#allocation44_spill] sm:$0xff] %v4764_v51  ;;  %v1604_v32 = vmax.f32 %v5812_v34, %v5811_v7  ;;  %v1549_v51 = vmax.f32 %v1548_v61, %v4676_v14  ;;  %v1506_v61 = vmax.f32 %v1505_v36, %v4523_v4  ;;  %v3097_v14 = vld [vmem:[%s5717_s0 + $0x150] sm:$0xff] }
 0x23e   :  { %v2212_v0 = vadd.f32 %v2211_v9, %v2210_v39  ;;  %v2046_v1 = vmul.f32 %v3097_v14, %v4645_v20  ;;  %v3098_v20 = vld [vmem:[%s5717_s0 + $0x158] sm:$0xff] }
 0x23f   :  { %v1550_v7 = vmax.f32 %v1549_v51, %v4680_v21  ;;  %v1507_v26 = vmax.f32 %v1506_v61, %v4599_v60  ;;  %v2047_v14 = vmul.f32 %v3098_v20, %v4650_v29 }
 0x240   :  { %v2214_v9 = vadd.f32 %v2213_v5, %v2212_v0 }
 0x241   :  { %v1551_v51 = vmax.f32 %v1550_v7, %v4682_v54  ;;  %v1508_v36 = vmax.f32 %v1507_v26, %v4637_v59  ;;  %v2219_v29 = vsel %vm144_vm0, %v2047_v14, 0.0  ;;  %v5820_v14 = vld [vmem:[#allocation14_spill] sm:$0xff] }
 0x242   :  { %v2216_v58 = vadd.f32 %v2215_v23, %v2214_v9 }
 0x243   :  { %v1509_v7 = vmax.f32 %v1508_v36, %v4670_v40 }
 0x245   :  { %v1510_v26 = vmax.f32 %v1509_v7, %v4674_v22 }
 0x247   :  { %v1511_v36 = vmax.f32 %v1510_v26, %v4684_v15  ;;  %v5821_v26 = vld [vmem:[#allocation16_spill] sm:$0xff] }
 0x24c   :  { %v4773_v38 = vpop.xlane.xlu2 %1296  ;;  %v4775_v52 = vpop.xlane.xlu1 %1470 }
 0x24d   :  { %5810 = vst [vmem:[#allocation45_spill] sm:$0xff] %v4775_v52  ;;  %v5813_v52 = vld [vmem:[#allocation9_spill] sm:$0xff] }
 0x24e   :  { %v1605_v39 = vmax.f32 %v1604_v32, %v5813_v52  ;;  %v4791_v34 = vpop.xlane.xlu0 %1473  ;;  %v5815_v32 = vld [vmem:[#allocation11_spill] sm:$0xff] }
 0x250   :  { %v1606_v50 = vmax.f32 %v1605_v39, %v5814_v49  ;;  %v1552_v49 = vmax.f32 %v1551_v51, %v4690_v28  ;;  %v3099_v51 = vld [vmem:[%s5717_s0 + $0x160] sm:$0xff] }
 0x251   :  { %v2048_v59 = vmul.f32 %v3099_v51, %v4657_v27 }
 0x252   :  { %v1607_v0 = vmax.f32 %v1606_v50, %v5815_v32  ;;  %v2217_v50 = vsel %vm144_vm0, %v2046_v1, 0.0  ;;  %v1553_v23 = vmax.f32 %v1552_v49, %v4733_v43  ;;  %v5817_v32 = vld [vmem:[#allocation13_spill] sm:$0xff] }
 0x253   :  { %v2218_v61 = vadd.f32 %v2217_v50, %v2216_v58  ;;  %v1512_v50 = vmax.f32 %v1511_v36, %v4724_v10  ;;  %v2221_v7 = vsel %vm144_vm0, %v2048_v59, 0.0  ;;  %v2498_v59 = vrot.slane %v4375_v46, 4 }
 0x254   :  { %v4805_v39 = vpop.xlane.xlu1 %1209  ;;  %v1608_v9 = vmax.f32 %v1607_v0, %v5816_v12  ;;  %v5818_v0 = vld [vmem:[#allocation15_spill] sm:$0xff]  ;;  %v1554_v49 = vmax.f32 %v1553_v23, %v4740_v13  ;;  %v1624_v23 = vmax.f32 %v4483_v31, %v4537_v30 }
 0x255   :  { %v2220_v20 = vadd.f32 %v2219_v29, %v2218_v61  ;;  %v1584_v61 = vmax.f32 %v4416_v55, %v4515_v24  ;;  %v1513_v36 = vmax.f32 %v1512_v50, %v4712_v18  ;;  %v5822_v50 = vld [vmem:[#allocation18_spill] sm:$0xff] }
 0x256   :  { %v4803_v5 = vpop.xlane.xlu2 %1386  ;;  %v1609_v52 = vmax.f32 %v1608_v9, %v5817_v32  ;;  %v1555_v9 = vmax.f32 %v1554_v49, %v4773_v38  ;;  %v2153_v49 = vrot.slane %v4530_v6, 4 }
 0x257   :  { %v2222_v12 = vadd.f32 %v2221_v7, %v2220_v20 }
 0x258   :  { %v1610_v58 = vmax.f32 %v1609_v52, %v5818_v0  ;;  %v1585_v0 = vmax.f32 %v1584_v61, %v4535_v33  ;;  %v2499_v61 = vadd.f32 %v2498_v59, %v4375_v46 }
 0x259   :  { %v2223_v7 = vrot.slane %v2222_v12, 4 }
 0x25a   :  { %v1611_v51 = vmax.f32 %v1610_v58, %v5820_v14  ;;  %v1625_v58 = vmax.f32 %v1624_v23, %v4563_v17  ;;  %v1514_v14 = vmax.f32 %v1513_v36, %v4747_v37  ;;  %v2154_v23 = vadd.f32 %v2153_v49, %v4530_v6  ;;  %v5823_v6 = vld [vmem:[#allocation17_spill] sm:$0xff] }
 0x25b   :  { %v2224_v36 = vadd.f32 %v2223_v7, %v2222_v12  ;;  %v2500_v49 = vrot.slane %v2499_v61, 2 }
 0x25c   :  { %v1612_v29 = vmax.f32 %v1611_v51, %v5821_v26  ;;  %v1586_v51 = vmax.f32 %v1585_v0, %v4565_v41  ;;  %v1626_v17 = vmax.f32 %v1625_v58, %v4583_v63  ;;  %v2458_v0 = vrot.slane %v4661_v62, 4 }
 0x25d   :  { %v2155_v58 = vrot.slane %v2154_v23, 2  ;;  %v2225_v12 = vrot.slane %v2224_v36, 2 }
 0x25e   :  { %v1613_v31 = vmax.f32 %v1612_v29, %v5822_v50  ;;  %v1587_v33 = vmax.f32 %v1586_v51, %v4597_v53  ;;  %v1627_v29 = vmax.f32 %v1626_v17, %v4666_v3  ;;  %v2459_v17 = vadd.f32 %v2458_v0, %v4661_v62  ;;  %v5832_v53 = vld [vmem:[#allocation43_spill] sm:$0xff] }
 0x260   :  { %v1614_v59 = vmax.f32 %v1613_v31, %v5823_v6  ;;  %v1588_v51 = vmax.f32 %v1587_v33, %v4623_v44  ;;  %v1628_v3 = vmax.f32 %v1627_v29, %v4654_v19  ;;  %v4877_v6 = vadd.f32 %v2500_v49, %v2499_v61  ;;  %v5829_v29 = vld [vmem:[#allocation41_spill] sm:$0xff] }
 0x261   :  { %v4824_v1 = vpop.xlane.xlu0 %1206  ;;  %v2156_v33 = vadd.f32 %v2155_v58, %v2154_v23  ;;  %v5827_v58 = vld [vmem:[#allocation38_spill] sm:$0xff] }
 0x262   :  { %v1515_v26 = vmax.f32 %v1514_v14, %v4824_v1  ;;  %v1589_v7 = vmax.f32 %v1588_v51, %v4672_v45  ;;  %v1629_v44 = vmax.f32 %v1628_v3, %v4678_v11  ;;  %v2460_v51 = vrot.slane %v2459_v17, 2  ;;  %v5830_v11 = vld [vmem:[#allocation35_spill] sm:$0xff]  ;;  %v5831_v45 = vld [vmem:[#allocation42_spill] sm:$0xff] }
 0x263   :  { %v2157_v49 = vrot.slane %v2156_v33, 1 }
 0x264   :  { %v1516_v46 = vmax.f32 %v1515_v26, %v4805_v39  ;;  %v5824_v26 = vld [vmem:[#allocation19_spill] sm:$0xff] }
 0x265   :  { %v4832_v32 = vpop.xlane.xlu2 %1476  ;;  %v4834_v27 = vpop.xlane.xlu1 %1299  ;;  %v4875_v63 = vmax.f32 %v1614_v59, %v5824_v26  ;;  %v5826_v59 = vld [vmem:[#allocation39_spill] sm:$0xff] }
 0x266   :  { %5819 = vst [vmem:[#allocation46_spill] sm:$0xff] %v4832_v32  ;;  %v1556_v52 = vmax.f32 %v1555_v9, %v4834_v27  ;;  %v2418_v9 = vrot.slane %v4551_v56, 4  ;;  %v1630_v19 = vmax.f32 %v1629_v44, %v5826_v59 }
 0x268   :  { %v2419_v55 = vadd.f32 %v2418_v9, %v4551_v56 }
 0x269   :  { %v4848_v20 = vpop.xlane.xlu0 %1302 }
 0x26a   :  { %v1557_v30 = vmax.f32 %v1556_v52, %v4848_v20  ;;  %v2293_v52 = vrot.slane %v4398_v25, 4  ;;  %v2420_v56 = vrot.slane %v2419_v55, 2 }
 0x26c   :  { %v1558_v24 = vrot.slane %v1557_v30, 4  ;;  %v2294_v9 = vadd.f32 %v2293_v52, %v4398_v25 }
 0x26d   :  { %v4864_v14 = vpop.xlane.xlu2 %1212 }
 0x26e   :  { %v1559_v32 = vmax.f32 %v1557_v30, %v1558_v24  ;;  %v1517_v30 = vmax.f32 %v1516_v46, %v4864_v14  ;;  %v2226_v46 = vadd.f32 %v2225_v12, %v2224_v36  ;;  %v2295_v52 = vrot.slane %v2294_v9, 2 }
 0x26f   :  { %v2502_v36 = vrot.slane %v4877_v6, 1 }
 0x270   :  { %v1560_v50 = vrot.slane %v1559_v32, 2  ;;  %v1518_v62 = vrot.slane %v1517_v30, 4 }
 0x272   :  { %v1561_v24 = vmax.f32 %v1559_v32, %v1560_v50  ;;  %v1590_v32 = vmax.f32 %v1589_v7, %v4686_v47  ;;  %v2421_v50 = vadd.f32 %v2420_v56, %v2419_v55  ;;  %v2461_v7 = vadd.f32 %v2460_v51, %v2459_v17 }
 0x274   :  { %v1562_v31 = vrot.slane %v1561_v24, 1  ;;  %v1591_v56 = vmax.f32 %v1590_v32, %v5827_v58  ;;  %v2422_v12 = vrot.slane %v2421_v50, 1  ;;  %v2462_v17 = vrot.slane %v2461_v7, 1 }
 0x276   :  { %v4881_v25 = vmax.f32 %v1561_v24, %v1562_v31  ;;  %v2227_v24 = vrot.slane %v2226_v46, 1  ;;  %v5828_v31 = vld [vmem:[#allocation40_spill] sm:$0xff]  ;;  %v1592_v59 = vmax.f32 %v1591_v56, %v5829_v29 }
 0x278   :  { %v1689_v61 = vsub.f32 %v4359_v35, %v4881_v25  ;;  %v1690_v3 = vsub.f32 %v4460_v57, %v4881_v25  ;;  %v1691_v55 = vsub.f32 %v4513_v42, %v4881_v25  ;;  %v1692_v23 = vsub.f32 %v4555_v2, %v4881_v25 }
 0x279   :  { %v1693_v44 = vsub.f32 %v4639_v48, %v4881_v25  ;;  %v1694_v35 = vsub.f32 %v4664_v16, %v4881_v25  ;;  %v1519_v57 = vmax.f32 %v1517_v30, %v1518_v62  ;;  %v1631_v42 = vmax.f32 %v1630_v19, %v5828_v31  ;;  %v5833_v62 = vld [vmem:[#allocation45_spill] sm:$0xff] }
 0x27a   :  { %v1854_v2 = vmul.f32 1.442695, %v1689_v61  ;;  %v1695_v26 = vsub.f32 %v5830_v11, %v4881_v25  ;;  %v1856_v47 = vmul.f32 1.442695, %v1690_v3  ;;  %v1858_v32 = vmul.f32 1.442695, %v1691_v55 }
 0x27b   :  { %v1860_v58 = vmul.f32 1.442695, %v1692_v23  ;;  %v1632_v48 = vmax.f32 %v1631_v42, %v5831_v45  ;;  %v1593_v41 = vmax.f32 %v1592_v59, %v5832_v53  ;;  %v1862_v0 = vmul.f32 1.442695, %v1693_v44  ;;  %v5834_v23 = vld [vmem:[#allocation44_spill] sm:$0xff] }
 0x27c   :  { %2899 = vpow2.f32 %v1854_v2  ;;  %v1696_v16 = vsub.f32 %v4680_v21, %v4881_v25  ;;  %v1864_v19 = vmul.f32 1.442695, %v1694_v35  ;;  %v1520_v30 = vrot.slane %v1519_v57, 2  ;;  %v3102_v2 = vld [vmem:[%s5717_s0 + $0x178] sm:$0xff] }
 0x27d   :  { %2901 = vpow2.f32 %v1856_v47  ;;  %v4909_v51 = vmax.f32 %v1632_v48, %v5833_v62  ;;  %v1697_v11 = vsub.f32 %v4682_v54, %v4881_v25  ;;  %v4913_v61 = vadd.f32 %v2157_v49, %v2156_v33 }
 0x27e   :  { %2903 = vpow2.f32 %v1858_v32  ;;  %v1866_v59 = vmul.f32 1.442695, %v1695_v26  ;;  %v2296_v3 = vadd.f32 %v2295_v52, %v2294_v9  ;;  %v4915_v55 = vadd.f32 %v2422_v12, %v2421_v50  ;;  %v3101_v12 = vld [vmem:[%s5717_s0 + $0x170] sm:$0xff] }
 0x27f   :  { %2905 = vpow2.f32 %v1860_v58  ;;  %v1594_v21 = vmax.f32 %v1593_v41, %v5834_v23  ;;  %v1698_v47 = vsub.f32 %v4690_v28, %v4881_v25  ;;  %v4920_v56 = vadd.f32 %v2227_v24, %v2226_v46  ;;  %v3100_v28 = vld [vmem:[%s5717_s0 + $0x168] sm:$0xff] }
 0x280   :  { %2907 = vpow2.f32 %v1862_v0  ;;  %v1868_v44 = vmul.f32 1.442695, %v1696_v16  ;;  %v1521_v35 = vmax.f32 %v1519_v57, %v1520_v30  ;;  %v4922_v42 = vadd.f32 %v2462_v17, %v2461_v7 }
 0x281   :  { %2909 = vpow2.f32 %v1864_v19  ;;  %v1634_v26 = vmax.f32 %v4909_v51, %v4791_v34  ;;  %v4927_v9 = vmax.f32 %v1594_v21, %v4803_v5  ;;  %v1870_v33 = vmul.f32 1.442695, %v1697_v11 }
 0x282   :  { %v2900_v54 = vpop.eup %2899  ;;  %2911 = vpow2.f32 %v1866_v59  ;;  %v2297_v46 = vrot.slane %v2296_v3, 1  ;;  %v4933_v52 = vadd.f32 %v2502_v36, %v4877_v6  ;;  %v1699_v49 = vsub.f32 %v4733_v43, %v4881_v25  ;;  %v3103_v43 = vld [vmem:[%s5717_s0 + $0x180] sm:$0xff] }
 0x283   :  { %v2902_v41 = vpop.eup %2901  ;;  %v2049_v50 = vmul.f32 %v3100_v28, %v2900_v54  ;;  %v1872_v58 = vmul.f32 1.442695, %v1698_v47  ;;  %2913 = vpow2.f32 %v1868_v44  ;;  %v1522_v36 = vrot.slane %v1521_v35, 1 }
 0x284   :  { %v2904_v0 = vpop.eup %2903  ;;  %v2050_v24 = vmul.f32 %v3101_v12, %v2902_v41  ;;  %v2464_v57 = vadd.f32 %v2902_v41, %v2900_v54  ;;  %2915 = vpow2.f32 %v1870_v33  ;;  %v1700_v11 = vsub.f32 %v4740_v13, %v4881_v25  ;;  %v3104_v54 = vld [vmem:[%s5717_s0 + $0x188] sm:$0xff] }
 0x285   :  { %v2906_v7 = vpop.eup %2905  ;;  %v2051_v32 = vmul.f32 %v3102_v2, %v2904_v0  ;;  %v2229_v6 = vsel %vm144_vm0, %v2049_v50, 0.0  ;;  %v1701_v59 = vsub.f32 %v4773_v38, %v4881_v25  ;;  %v4952_v47 = vadd.f32 %v2297_v46, %v2296_v3  ;;  %v4958_v50 = vpop.xlane.xlu1 %1389  ;;  %v3105_v46 = vld [vmem:[%s5717_s0 + $0x190] sm:$0xff] }
 0x286   :  { %v2908_v48 = vpop.eup %2907  ;;  %v2052_v16 = vmul.f32 %v3103_v43, %v2906_v7  ;;  %v2230_v19 = vsel %vm144_vm0, %v2050_v24, 0.0  ;;  %v2465_v30 = vadd.f32 %v2904_v0, %v2464_v57  ;;  %v1874_v44 = vmul.f32 1.442695, %v1699_v49 }
 0x287   :  { %v2910_v17 = vpop.eup %2909  ;;  %v2231_v21 = vadd.f32 %v2230_v19, %v2229_v6  ;;  %v2053_v33 = vmul.f32 %v3104_v54, %v2908_v48  ;;  %v2232_v41 = vsel %vm144_vm0, %v2051_v32, 0.0  ;;  %v1702_v13 = vsub.f32 %v4834_v27, %v4881_v25 }
 0x288   :  { %v2466_v28 = vadd.f32 %v2906_v7, %v2465_v30  ;;  %v2912_v0 = vpop.eup %2911  ;;  %v1703_v38 = vsub.f32 %v4848_v20, %v4881_v25  ;;  %2917 = vpow2.f32 %v1872_v58  ;;  %v2054_v49 = vmul.f32 %v3105_v46, %v2910_v17  ;;  %v4970_v7 = vpop.xlane.xlu2 %1392  ;;  %v3106_v58 = vld [vmem:[%s5717_s0 + $0x198] sm:$0xff] }
 0x289   :  { %v2233_v3 = vadd.f32 %v2232_v41, %v2231_v21  ;;  %v2234_v12 = vsel %vm144_vm0, %v2052_v16, 0.0  ;;  %v4968_v57 = vmax.f32 %v1521_v35, %v1522_v36  ;;  %v2914_v2 = vpop.eup %2913  ;;  %v1876_v32 = vmul.f32 1.442695, %v1700_v11  ;;  %v3107_v11 = vld [vmem:[%s5717_s0 + $0x1a0] sm:$0xff] }
 0x28a   :  { %v2467_v24 = vadd.f32 %v2908_v48, %v2466_v28  ;;  %v1878_v27 = vmul.f32 1.442695, %v1701_v59  ;;  %v1596_v20 = vmax.f32 %v4927_v9, %v4958_v50  ;;  %v2916_v25 = vpop.eup %2915  ;;  %2919 = vpow2.f32 %v1874_v44  ;;  %v5835_v44 = vld [vmem:[#allocation20_spill] sm:$0xff] }
 0x28b   :  { %v2235_v6 = vadd.f32 %v2234_v12, %v2233_v3  ;;  %v2055_v43 = vmul.f32 %v3106_v58, %v2912_v0  ;;  %v2236_v48 = vsel %vm144_vm0, %v2053_v33, 0.0  ;;  %v1880_v36 = vmul.f32 1.442695, %v1702_v13  ;;  %v5836_v13 = vld [vmem:[#allocation22_spill] sm:$0xff] }
 0x28c   :  { %v2468_v35 = vadd.f32 %v2910_v17, %v2467_v24  ;;  %v1882_v16 = vmul.f32 1.442695, %v1703_v38  ;;  %v1597_v30 = vmax.f32 %v1596_v20, %v4970_v7  ;;  %v2056_v9 = vmul.f32 %v3107_v11, %v2914_v2  ;;  %v3108_v17 = vld [vmem:[%s5717_s0 + $0x1a8] sm:$0xff] }
 0x28d   :  { %v2237_v19 = vadd.f32 %v2236_v48, %v2235_v6  ;;  %v2238_v59 = vsel %vm144_vm0, %v2054_v49, 0.0  ;;  %v1659_v54 = vsub.f32 %v5835_v44, %v4968_v57  ;;  %2921 = vpow2.f32 %v1876_v32  ;;  %v3109_v6 = vld [vmem:[%s5717_s0 + $0x1b0] sm:$0xff]  ;;  %v5837_v48 = vld [vmem:[#allocation8_spill] sm:$0xff] }
 0x28e   :  { %v2469_v21 = vadd.f32 %v2912_v0, %v2468_v35  ;;  %v2918_v41 = vpop.eup %2917  ;;  %v2057_v33 = vmul.f32 %v3108_v17, %v2916_v25  ;;  %v1660_v38 = vsub.f32 %v5836_v13, %v4968_v57  ;;  %2923 = vpow2.f32 %v1878_v27  ;;  %v5007_v35 = vld [vmem:[%s5719_s2 + $0x2] ss:$0 sm:$0xff] }
 0x28f   :  { %v2239_v28 = vadd.f32 %v2238_v59, %v2237_v19  ;;  %v2240_v3 = vsel %vm144_vm0, %v2055_v43, 0.0  ;;  %v1661_v0 = vsub.f32 %v4458_v8, %v4968_v57  ;;  %2925 = vpow2.f32 %v1880_v36 }
 0x290   :  { %v2470_v46 = vadd.f32 %v2914_v2, %v2469_v21  ;;  %v1662_v12 = vsub.f32 %v4523_v4, %v4968_v57  ;;  %v1598_v24 = vrot.slane %v1597_v30, 4  ;;  %v2920_v32 = vpop.eup %2919  ;;  %v2058_v20 = vmul.f32 %v3109_v6, %v2918_v41 }
 0x291   :  { %v2241_v49 = vadd.f32 %v2240_v3, %v2239_v28  ;;  %v2242_v27 = vsel %vm144_vm0, %v2056_v9, 0.0  ;;  %v1663_v2 = vsub.f32 %v4599_v60, %v4968_v57  ;;  %2927 = vpow2.f32 %v1882_v16  ;;  %v3110_v60 = vld [vmem:[%s5717_s0 + $0x1b8] sm:$0xff] }
 0x292   :  { %v2471_v58 = vadd.f32 %v2916_v25, %v2470_v46  ;;  %v2244_v43 = vsel %vm144_vm0, %v2057_v33, 0.0  ;;  %v1664_v4 = vsub.f32 %v5837_v48, %v4968_v57  ;;  %v1794_v19 = vmul.f32 1.442695, %v1659_v54  ;;  %v3111_v46 = vld [vmem:[%s5717_s0 + $0x1c0] sm:$0xff] }
 0x293   :  { %v2243_v8 = vadd.f32 %v2242_v27, %v2241_v49  ;;  %v1796_v11 = vmul.f32 1.442695, %v1660_v38  ;;  %v1798_v9 = vmul.f32 1.442695, %v1661_v0  ;;  %v2922_v25 = vpop.eup %2921  ;;  %v2059_v16 = vmul.f32 %v3110_v60, %v2920_v32 }
 0x294   :  { %v2472_v36 = vadd.f32 %v2918_v41, %v2471_v58  ;;  %v1665_v21 = vsub.f32 %v4670_v40, %v4968_v57  ;;  %v1800_v44 = vmul.f32 1.442695, %v1662_v12  ;;  %v2924_v17 = vpop.eup %2923  ;;  %v2246_v33 = vsel %vm144_vm0, %v2058_v20, 0.0 }
 0x295   :  { %v2245_v59 = vadd.f32 %v2244_v43, %v2243_v8  ;;  %2929 = vpow2.f32 %v1794_v19  ;;  %v1802_v41 = vmul.f32 1.442695, %v1663_v2  ;;  %v2926_v54 = vpop.eup %2925  ;;  %v1666_v38 = vsub.f32 %v4674_v22, %v4968_v57 }
 0x296   :  { %v2473_v28 = vadd.f32 %v2920_v32, %v2472_v36  ;;  %2931 = vpow2.f32 %v1796_v11  ;;  %v1804_v3 = vmul.f32 1.442695, %v1664_v4  ;;  %v2060_v0 = vmul.f32 %v3111_v46, %v2922_v25  ;;  %v3113_v11 = vld [vmem:[%s5717_s0 + $0x78] sm:$0xff] }
 0x297   :  { %v2247_v13 = vadd.f32 %v2246_v33, %v2245_v59  ;;  %2933 = vpow2.f32 %v1798_v9  ;;  %v5022_v49 = vmul.f32 %v5007_v35, %v4952_v47  ;;  %v2928_v12 = vpop.eup %2927  ;;  %v1667_v32 = vsub.f32 %v4684_v15, %v4968_v57  ;;  %v3112_v47 = vld [vmem:[%s5717_s0 + $0x1c8] sm:$0xff] }
 0x298   :  { %v2474_v40 = vadd.f32 %v2922_v25, %v2473_v28  ;;  %2935 = vpow2.f32 %v1800_v44  ;;  %v1806_v6 = vmul.f32 1.442695, %v1665_v21  ;;  %v5026_v22 = vmax.f32 %v1597_v30, %v1598_v24  ;;  %v3115_v44 = vld [vmem:[%s5717_s0 + $0x88] sm:$0xff] }
 0x299   :  { %v2248_v20 = vsel %vm144_vm0, %v2059_v16, 0.0  ;;  %v1668_v58 = vsub.f32 %v4724_v10, %v4968_v57  ;;  %2937 = vpow2.f32 %v1802_v41  ;;  %v2061_v2 = vmul.f32 %v3112_v47, %v2924_v17  ;;  %v3116_v41 = vld [vmem:[%s5717_s0 + $0x1d0] sm:$0xff] }
 0x29a   :  { %v2475_v27 = vadd.f32 %v2924_v17, %v2474_v40  ;;  %v2249_v8 = vadd.f32 %v2248_v20, %v2247_v13  ;;  %2939 = vpow2.f32 %v1804_v3  ;;  %v1808_v43 = vmul.f32 1.442695, %v1666_v38  ;;  %v3117_v3 = vld [vmem:[%s5717_s0 + $0x90] sm:$0xff] }
 0x29b   :  { %v2930_v15 = vpop.eup %2929  ;;  %v2250_v48 = vsel %vm144_vm0, %v2060_v0, 0.0  ;;  %v1669_v24 = vsub.f32 %v4712_v18, %v4968_v57  ;;  %v1670_v4 = vsub.f32 %v4747_v37, %v4968_v57  ;;  %v1671_v36 = vsub.f32 %v4824_v1, %v4968_v57  ;;  %v3114_v18 = vld [vmem:[%s5717_s0 + $0x80] sm:$0xff] }
 0x29c   :  { %v2476_v30 = vadd.f32 %v2926_v54, %v2475_v27  ;;  %v2932_v10 = vpop.eup %2931  ;;  %2941 = vpow2.f32 %v1806_v6  ;;  %v1810_v19 = vmul.f32 1.442695, %v1667_v32  ;;  %v2019_v9 = vmul.f32 %v3113_v11, %v2930_v15 }
 0x29d   :  { %v5044_v25 = vpop.eup %2933  ;;  %v1812_v16 = vmul.f32 1.442695, %v1668_v58  ;;  %v2020_v37 = vmul.f32 %v3114_v18, %v2932_v10  ;;  %v5051_v59 = vadd.f32 %v2932_v10, %v2930_v15  ;;  %v2251_v21 = vadd.f32 %v2250_v48, %v2249_v8  ;;  %v3118_v58 = vld [vmem:[%s5717_s0 + $0x98] sm:$0xff] }
 0x29e   :  { %v5046_v60 = vadd.f32 %v2928_v12, %v2476_v30  ;;  %v5053_v1 = vpop.eup %2935  ;;  %2943 = vpow2.f32 %v1808_v43  ;;  %v2021_v17 = vmul.f32 %v3115_v44, %v5044_v25  ;;  %v2159_v33 = vsel %vm144_vm0, %v2019_v9, 0.0  ;;  %v3119_v48 = vld [vmem:[%s5717_s0 + $0x1d8] sm:$0xff] }
 0x29f   :  { %v5060_v28 = vpop.eup %2937  ;;  %v2062_v13 = vmul.f32 %v3116_v41, %v2926_v54  ;;  %v2252_v38 = vsel %vm144_vm0, %v2061_v2, 0.0  ;;  %v2022_v46 = vmul.f32 %v3117_v3, %v5053_v1  ;;  %v2160_v0 = vsel %vm144_vm0, %v2020_v37, 0.0  ;;  %v5838_v41 = vld [vmem:[#allocation46_spill] sm:$0xff] }
 0x2a0   :  { %v5071_v40 = vpop.eup %2939  ;;  %v1672_v32 = vsub.f32 %v4805_v39, %v4968_v57  ;;  %2945 = vpow2.f32 %v1810_v19  ;;  %v1814_v6 = vmul.f32 1.442695, %v1669_v24  ;;  %v2161_v20 = vadd.f32 %v2160_v0, %v2159_v33  ;;  %v5104_v33 = vpop.xlane.xlu1 %1437 }
 0x2a1   :  { %v1673_v54 = vsub.f32 %v4864_v14, %v4968_v57  ;;  %v1816_v27 = vmul.f32 1.442695, %v1670_v4  ;;  %v2023_v47 = vmul.f32 %v3118_v58, %v5060_v28  ;;  %v2162_v2 = vsel %vm144_vm0, %v2021_v17, 0.0  ;;  %v3120_v57 = vld [vmem:[%s5717_s0 + $0xa0] sm:$0xff] }
 0x2a2   :  { %v5082_v8 = vpop.eup %2941  ;;  %v2253_v43 = vadd.f32 %v2252_v38, %v2251_v21  ;;  %2947 = vpow2.f32 %v1812_v16  ;;  %v1818_v39 = vmul.f32 1.442695, %v1671_v36  ;;  %v2163_v15 = vadd.f32 %v2162_v2, %v2161_v20  ;;  %v3122_v38 = vld [vmem:[%s5717_s0 + $0xb0] sm:$0xff] }
 0x2a3   :  { %v2063_v14 = vmul.f32 %v3119_v48, %v2928_v12  ;;  %v2024_v30 = vmul.f32 %v3120_v57, %v5071_v40  ;;  %v2164_v24 = vsel %vm144_vm0, %v2022_v46, 0.0  ;;  %v1600_v4 = vrot.slane %v5026_v22, 2  ;;  %v3121_v12 = vld [vmem:[%s5717_s0 + $0xa8] sm:$0xff] }
 0x2a4   :  { %v5093_v10 = vpop.eup %2943  ;;  %v2254_v36 = vsel %vm144_vm0, %v2062_v13, 0.0  ;;  %2949 = vpow2.f32 %v1814_v6  ;;  %v1820_v19 = vmul.f32 1.442695, %v1672_v32  ;;  %v2165_v11 = vadd.f32 %v2164_v24, %v2163_v15 }
 0x2a5   :  { %2951 = vpow2.f32 %v1816_v27  ;;  %v1822_v9 = vmul.f32 1.442695, %v1673_v54  ;;  %v2025_v16 = vmul.f32 %v3121_v12, %v5082_v8  ;;  %v2166_v18 = vsel %vm144_vm0, %v2023_v47, 0.0  ;;  %v5839_v47 = vld [vmem:[#allocation21_spill] sm:$0xff] }
 0x2a6   :  { %v5101_v37 = vpop.eup %2945  ;;  %v2255_v21 = vadd.f32 %v2254_v36, %v2253_v43  ;;  %v2478_v44 = vrot.slane %v5046_v60, 4  ;;  %2953 = vpow2.f32 %v1818_v39  ;;  %v2167_v17 = vadd.f32 %v2166_v18, %v2165_v11 }
 0x2a7   :  { %v5110_v13 = vmax.f32 %v1634_v26, %v5838_v41  ;;  %v2026_v3 = vmul.f32 %v3122_v38, %v5093_v10  ;;  %v2168_v46 = vsel %vm144_vm0, %v2024_v30, 0.0  ;;  %v1601_v0 = vmax.f32 %v5026_v22, %v1600_v4  ;;  %v3123_v26 = vld [vmem:[%s5717_s0 + $0xb8] sm:$0xff]  ;;  %v5129_v22 = vpop.xlane.xlu0 %1479 }
 0x2a8   :  { %v5118_v32 = vpop.eup %2947  ;;  %v2256_v6 = vsel %vm144_vm0, %v2063_v14, 0.0  ;;  %2955 = vpow2.f32 %v1820_v19  ;;  %v2169_v20 = vadd.f32 %v2168_v46, %v2167_v17  ;;  %v2590_v51 = vrot.slane %v5022_v49, 4 }
 0x2a9   :  { %v2027_v54 = vmul.f32 %v3123_v26, %v5101_v37  ;;  %v2170_v27 = vsel %vm144_vm0, %v2025_v16, 0.0  ;;  %v2425_v58 = vadd.f32 %v5044_v25, %v5051_v59  ;;  %v5840_v2 = vmax.f32 %v4875_v63, %v5839_v47  ;;  %v3124_v25 = vld [vmem:[%s5717_s0 + $0xc0] sm:$0xff]  ;;  %v5841_v26 = vld [vmem:[#allocation23_spill] sm:$0xff] }
 0x2aa   :  { %v5137_v39 = vpop.eup %2949  ;;  %v2257_v15 = vadd.f32 %v2256_v6, %v2255_v21  ;;  %v5140_v48 = vadd.f32 %v2478_v44, %v5046_v60  ;;  %2957 = vpow2.f32 %v1822_v9  ;;  %v2171_v14 = vadd.f32 %v2170_v27, %v2169_v20  ;;  %v3125_v9 = vld [vmem:[%s5717_s0 + $0xc8] sm:$0xff] }
 0x2ab   :  { %v5135_v43 = vmax.f32 %v5840_v2, %v5104_v33  ;;  %v5142_v57 = vpop.eup %2951  ;;  %v2028_v59 = vmul.f32 %v3124_v25, %v5118_v32  ;;  %v2172_v63 = vsel %vm144_vm0, %v2026_v3, 0.0  ;;  %v2426_v30 = vadd.f32 %v5053_v1, %v2425_v58  ;;  %v5842_v27 = vld [vmem:[#allocation25_spill] sm:$0xff]  ;;  %v5843_v2 = vld [vmem:[#allocation6_spill] sm:$0xff] }
 0x2ac   :  { %v1602_v24 = vrot.slane %v1601_v0, 1  ;;  %v5150_v4 = vpop.eup %2953  ;;  %v2173_v36 = vadd.f32 %v2172_v63, %v2171_v14  ;;  %v1636_v60 = vmax.f32 %v5110_v13, %v5129_v22  ;;  %v5156_v19 = vmul.f32 %v5007_v35, %v4913_v61  ;;  %v3128_v25 = vld [vmem:[%s5717_s0 + $0xe0] sm:$0xff]  ;;  %v3138_v13 = vld [vmem:[%s5717_s0 + $0x298] sm:$0xff] }
 0x2ad   :  { %v5160_v11 = vmul.f32 %v5007_v35, %v4920_v56  ;;  %v2029_v1 = vmul.f32 %v3125_v9, %v5137_v39  ;;  %v2174_v12 = vsel %vm144_vm0, %v2027_v54, 0.0  ;;  %v2427_v16 = vadd.f32 %v5060_v28, %v2426_v30  ;;  %v3126_v56 = vld [vmem:[%s5717_s0 + $0xd0] sm:$0xff]  ;;  %v3127_v28 = vld [vmem:[%s5717_s0 + $0xd8] sm:$0xff] }
 0x2ae   :  { %v5168_v18 = vmax.f32 %v1601_v0, %v1602_v24  ;;  %v5170_v21 = vpop.eup %2955  ;;  %v2258_v61 = vrot.slane %v2257_v15, 4  ;;  %v2030_v35 = vmul.f32 %v3126_v56, %v5142_v57  ;;  %v2175_v44 = vadd.f32 %v2174_v12, %v2173_v36  ;;  %v5844_v30 = vld [vmem:[#allocation28_spill] sm:$0xff] }
 0x2af   :  { %v1618_v17 = vrot.slane %v5135_v43, 4  ;;  %v2480_v38 = vrot.slane %v5140_v48, 2  ;;  %v2031_v3 = vmul.f32 %v3127_v28, %v5150_v4  ;;  %v2176_v46 = vsel %vm144_vm0, %v2028_v59, 0.0 }
 0x2b0   :  { %v2428_v0 = vadd.f32 %v5071_v40, %v2427_v16  ;;  %v5184_v6 = vpop.eup %2957  ;;  %v2177_v20 = vadd.f32 %v2176_v46, %v2175_v44  ;;  %v1719_v54 = vsub.f32 %v5841_v26, %v5168_v18  ;;  %v1720_v58 = vsub.f32 %v5842_v27, %v5168_v18  ;;  %v5845_v16 = vld [vmem:[#allocation30_spill] sm:$0xff]  ;;  %v5846_v46 = vld [vmem:[#allocation31_spill] sm:$0xff] }
 0x2b1   :  { %v1721_v14 = vsub.f32 %v5843_v2, %v5168_v18  ;;  %v2032_v59 = vmul.f32 %v3128_v25, %v5170_v21  ;;  %v2178_v40 = vsel %vm144_vm0, %v2029_v1, 0.0  ;;  %v1722_v24 = vsub.f32 %v5844_v30, %v5168_v18  ;;  %v3129_v44 = vld [vmem:[%s5717_s0 + $0xe8] sm:$0xff] }
 0x2b2   :  { %v2429_v63 = vadd.f32 %v5082_v8, %v2428_v0  ;;  %v5200_v36 = vadd.f32 %v2258_v61, %v2257_v15  ;;  %v2179_v9 = vadd.f32 %v2178_v40, %v2177_v20  ;;  %v2180_v12 = vsel %vm144_vm0, %v2030_v35, 0.0  ;;  %v5847_v2 = vld [vmem:[#allocation34_spill] sm:$0xff] }
 0x2b3   :  { %v1723_v56 = vsub.f32 %v5845_v16, %v5168_v18  ;;  %v2033_v28 = vmul.f32 %v3129_v44, %v5184_v6  ;;  %v2182_v1 = vsel %vm144_vm0, %v2031_v3, 0.0  ;;  %v1724_v15 = vsub.f32 %v5846_v46, %v5168_v18 }
 0x2b4   :  { %v2430_v8 = vadd.f32 %v5093_v10, %v2429_v63  ;;  %v2181_v61 = vadd.f32 %v2180_v12, %v2179_v9  ;;  %v1914_v0 = vmul.f32 1.442695, %v1719_v54  ;;  %v1916_v20 = vmul.f32 1.442695, %v1720_v58  ;;  %v5848_v9 = vld [vmem:[#allocation37_spill] sm:$0xff] }
 0x2b5   :  { %v1918_v35 = vmul.f32 1.442695, %v1721_v14  ;;  %v2184_v26 = vsel %vm144_vm0, %v2032_v59, 0.0  ;;  %v1725_v25 = vsub.f32 %v5847_v2, %v5168_v18  ;;  %v1920_v40 = vmul.f32 1.442695, %v1722_v24 }
 0x2b6   :  { %v2431_v27 = vadd.f32 %v5101_v37, %v2430_v8  ;;  %v2183_v30 = vadd.f32 %v2182_v1, %v2181_v61  ;;  %2959 = vpow2.f32 %v1914_v0  ;;  %v1922_v3 = vmul.f32 1.442695, %v1723_v56  ;;  %v5849_v37 = vld [vmem:[#allocation38_spill] sm:$0xff] }
 0x2b7   :  { %v1619_v10 = vmax.f32 %v5135_v43, %v1618_v17  ;;  %v1726_v54 = vsub.f32 %v5848_v9, %v5168_v18  ;;  %2961 = vpow2.f32 %v1916_v20  ;;  %v1924_v58 = vmul.f32 1.442695, %v1724_v15 }
 0x2b8   :  { %v2432_v63 = vadd.f32 %v5118_v32, %v2431_v27  ;;  %v2185_v14 = vadd.f32 %v2184_v26, %v2183_v30  ;;  %v2186_v59 = vsel %vm144_vm0, %v2033_v28, 0.0  ;;  %v1727_v12 = vsub.f32 %v5849_v37, %v5168_v18  ;;  %v3132_v27 = vld [vmem:[%s5717_s0 + $0x268] sm:$0xff]  ;;  %v3134_v37 = vld [vmem:[%s5717_s0 + $0x278] sm:$0xff] }
 0x2b9   :  { %2963 = vpow2.f32 %v1918_v35  ;;  %v1728_v16 = vsub.f32 %v5829_v29, %v5168_v18  ;;  %v1926_v43 = vmul.f32 1.442695, %v1725_v25  ;;  %v1729_v17 = vsub.f32 %v5832_v53, %v5168_v18 }
 0x2ba   :  { %v2433_v24 = vadd.f32 %v5137_v39, %v2432_v63  ;;  %2965 = vpow2.f32 %v1920_v40  ;;  %v2187_v32 = vadd.f32 %v2186_v59, %v2185_v14  ;;  %v1620_v56 = vrot.slane %v1619_v10, 2 }
 0x2bb   :  { %2967 = vpow2.f32 %v1922_v3  ;;  %v1730_v28 = vsub.f32 %v5834_v23, %v5168_v18  ;;  %v1928_v1 = vmul.f32 1.442695, %v1726_v54  ;;  %v1731_v39 = vsub.f32 %v4803_v5, %v5168_v18  ;;  %v3130_v23 = vld [vmem:[%s5717_s0 + $0x258] sm:$0xff]  ;;  %v3133_v3 = vld [vmem:[%s5717_s0 + $0x270] sm:$0xff] }
 0x2bc   :  { %v2434_v44 = vadd.f32 %v5142_v57, %v2433_v24  ;;  %2969 = vpow2.f32 %v1924_v58  ;;  %v2960_v8 = vpop.eup %2959  ;;  %v1732_v29 = vsub.f32 %v4958_v50, %v5168_v18  ;;  %v1733_v46 = vsub.f32 %v4970_v7, %v5168_v18  ;;  %v3131_v50 = vld [vmem:[%s5717_s0 + $0x260] sm:$0xff] }
 0x2bd   :  { %v1930_v53 = vmul.f32 1.442695, %v1727_v12  ;;  %v2962_v15 = vpop.eup %2961  ;;  %2971 = vpow2.f32 %v1926_v43  ;;  %v1932_v57 = vmul.f32 1.442695, %v1728_v16  ;;  %v2079_v0 = vmul.f32 %v3130_v23, %v2960_v8 }
 0x2be   :  { %v2435_v61 = vadd.f32 %v5150_v4, %v2434_v44  ;;  %v2188_v35 = vrot.slane %v2187_v32, 4  ;;  %v1934_v5 = vmul.f32 1.442695, %v1729_v17  ;;  %v2080_v26 = vmul.f32 %v3131_v50, %v2962_v15  ;;  %v3137_v50 = vld [vmem:[%s5717_s0 + $0x290] sm:$0xff] }
 0x2bf   :  { %v2964_v20 = vpop.eup %2963  ;;  %v2504_v7 = vadd.f32 %v2962_v15, %v2960_v8  ;;  %2973 = vpow2.f32 %v1928_v1  ;;  %v2299_v25 = vsel %vm144_vm0, %v2079_v0, 0.0  ;;  %v1936_v30 = vmul.f32 1.442695, %v1730_v28  ;;  %v5277_v8 = vpop.xlane.xlu2 %1482 }
 0x2c0   :  { %v5245_v18 = vpop.eup %2965  ;;  %v2436_v4 = vadd.f32 %v5170_v21, %v2435_v61  ;;  %v2081_v2 = vmul.f32 %v3132_v27, %v2964_v20  ;;  %2975 = vpow2.f32 %v1930_v53  ;;  %v2300_v21 = vsel %vm144_vm0, %v2080_v26, 0.0 }
 0x2c1   :  { %v5252_v40 = vpop.eup %2967  ;;  %v2082_v63 = vmul.f32 %v3133_v3, %v5245_v18  ;;  %v2481_v54 = vadd.f32 %v2480_v38, %v5140_v48  ;;  %v1938_v14 = vmul.f32 1.442695, %v1731_v39  ;;  %v2301_v59 = vadd.f32 %v2300_v21, %v2299_v25 }
 0x2c2   :  { %v5259_v9 = vpop.eup %2969  ;;  %v2437_v58 = vadd.f32 %v5184_v6, %v2436_v4  ;;  %2977 = vpow2.f32 %v1932_v57  ;;  %v2083_v12 = vmul.f32 %v3134_v37, %v5252_v40  ;;  %v2302_v24 = vsel %vm144_vm0, %v2081_v2, 0.0  ;;  %v3135_v6 = vld [vmem:[%s5717_s0 + $0x280] sm:$0xff] }
 0x2c3   :  { %v1621_v16 = vmax.f32 %v1619_v10, %v1620_v56  ;;  %v5270_v43 = vpop.eup %2971  ;;  %v2189_v17 = vadd.f32 %v2188_v35, %v2187_v32  ;;  %2979 = vpow2.f32 %v1934_v5  ;;  %v1940_v44 = vmul.f32 1.442695, %v1732_v29 }
 0x2c4   :  { %v2303_v48 = vadd.f32 %v2302_v24, %v2301_v59  ;;  %2981 = vpow2.f32 %v1936_v30  ;;  %v1942_v38 = vmul.f32 1.442695, %v1733_v46  ;;  %v2084_v28 = vmul.f32 %v3135_v6, %v5259_v9  ;;  %v3136_v46 = vld [vmem:[%s5717_s0 + $0x288] sm:$0xff]  ;;  %v3139_v59 = vld [vmem:[%s5717_s0 + $0x2a0] sm:$0xff] }
 0x2c5   :  { %v2304_v1 = vsel %vm144_vm0, %v2082_v63, 0.0  ;;  %v5279_v39 = vpop.eup %2973  ;;  %v2260_v10 = vrot.slane %v5200_v36, 2  ;;  %v2482_v32 = vrot.slane %v2481_v54, 1  ;;  %v2438_v56 = vrot.slane %v2437_v58, 4 }
 0x2c6   :  { %v2305_v29 = vadd.f32 %v2304_v1, %v2303_v48  ;;  %v5282_v53 = vpop.eup %2975  ;;  %2983 = vpow2.f32 %v1938_v14  ;;  %v2085_v15 = vmul.f32 %v3136_v46, %v5270_v43  ;;  %v2306_v61 = vsel %vm144_vm0, %v2083_v12, 0.0  ;;  %v5851_v46 = vld [vmem:[#allocation7_spill] sm:$0xff] }
 0x2c7   :  { %v1622_v57 = vrot.slane %v1621_v16, 1  ;;  %v2190_v23 = vrot.slane %v2189_v17, 2  ;;  %2985 = vpow2.f32 %v1940_v44  ;;  %v5293_v35 = vmax.f32 %v1636_v60, %v5277_v8 }
 0x2c8   :  { %v2307_v0 = vadd.f32 %v2306_v61, %v2305_v29  ;;  %v5295_v5 = vpop.eup %2977  ;;  %2987 = vpow2.f32 %v1942_v38  ;;  %v2086_v26 = vmul.f32 %v3137_v50, %v5279_v39  ;;  %v2308_v4 = vsel %vm144_vm0, %v2084_v28, 0.0  ;;  %v3141_v28 = vld [vmem:[%s5717_s0 + $0x2b0] sm:$0xff]  ;;  %v5850_v29 = vld [vmem:[#allocation5_spill] sm:$0xff] }
 0x2c9   :  { %v2505_v27 = vadd.f32 %v2964_v20, %v2504_v7  ;;  %v5302_v2 = vpop.eup %2979  ;;  %v5304_v25 = vadd.f32 %v2438_v56, %v2437_v58  ;;  %v2087_v60 = vmul.f32 %v3138_v13, %v5282_v53  ;;  %v2584_v3 = vrot.slane %v5160_v11, 6  ;;  %v5852_v61 = vld [vmem:[#allocation9_spill] sm:$0xff] }
 0x2ca   :  { %v2309_v30 = vadd.f32 %v2308_v4, %v2307_v0  ;;  %v5311_v63 = vpop.eup %2981  ;;  %v5314_v21 = vadd.f32 %v2260_v10, %v5200_v36  ;;  %v2310_v20 = vsel %vm144_vm0, %v2085_v15, 0.0  ;;  %v5318_v58 = vmax.f32 %v1621_v16, %v1622_v57 }
 0x2cb   :  { %v2506_v7 = vadd.f32 %v5245_v18, %v2505_v27  ;;  %v5320_v14 = vadd.f32 %v2482_v32, %v2481_v54  ;;  %v2088_v37 = vmul.f32 %v3139_v59, %v5295_v5  ;;  %v1638_v24 = vrot.slane %v5293_v35, 4  ;;  %v3140_v18 = vld [vmem:[%s5717_s0 + $0x2a8] sm:$0xff]  ;;  %v3143_v27 = vld [vmem:[%s5717_s0 + $0x2c0] sm:$0xff] }
 0x2cc   :  { %v2311_v12 = vadd.f32 %v2310_v20, %v2309_v30  ;;  %v5327_v44 = vpop.eup %2983  ;;  %v5329_v36 = vadd.f32 %v2190_v23, %v2189_v17  ;;  %v2089_v54 = vmul.f32 %v3140_v18, %v5302_v2  ;;  %v2312_v16 = vsel %vm144_vm0, %v2086_v26, 0.0  ;;  %v3142_v23 = vld [vmem:[%s5717_s0 + $0x2b8] sm:$0xff]  ;;  %v3144_v59 = vld [vmem:[%s5717_s0 + $0x2c8] sm:$0xff] }
 0x2cd   :  { %v2507_v48 = vadd.f32 %v5252_v40, %v2506_v7  ;;  %v5337_v38 = vpop.eup %2985  ;;  %v2440_v6 = vrot.slane %v5304_v25, 2  ;;  %v2090_v17 = vmul.f32 %v3141_v28, %v5311_v63  ;;  %v2314_v10 = vsel %vm144_vm0, %v2087_v60, 0.0  ;;  %v5854_v20 = vld [vmem:[#allocation11_spill] sm:$0xff] }
 0x2ce   :  { %v2313_v1 = vadd.f32 %v2312_v16, %v2311_v12  ;;  %v5345_v32 = vpop.eup %2987  ;;  %v1734_v40 = vsub.f32 %v5850_v29, %v5318_v58  ;;  %v1735_v15 = vsub.f32 %v5851_v46, %v5318_v58  ;;  %v1736_v57 = vsub.f32 %v5852_v61, %v5318_v58  ;;  %v5855_v16 = vld [vmem:[#allocation12_spill] sm:$0xff]  ;;  %v5856_v29 = vld [vmem:[#allocation13_spill] sm:$0xff] }
 0x2cf   :  { %v2508_v56 = vadd.f32 %v5259_v9, %v2507_v48  ;;  %v2091_v0 = vmul.f32 %v3142_v23, %v5327_v44  ;;  %v2316_v26 = vsel %vm144_vm0, %v2088_v37, 0.0  ;;  %v5853_v9 = vld [vmem:[#allocation10_spill] sm:$0xff]  ;;  %v2092_v13 = vmul.f32 %v3143_v27, %v5337_v38 }
 0x2d0   :  { %v2315_v50 = vadd.f32 %v2314_v10, %v2313_v1  ;;  %v1737_v4 = vsub.f32 %v5853_v9, %v5318_v58  ;;  %v2318_v60 = vsel %vm144_vm0, %v2089_v54, 0.0  ;;  %v1738_v7 = vsub.f32 %v5854_v20, %v5318_v58 }
 0x2d1   :  { %v2509_v30 = vadd.f32 %v5270_v43, %v2508_v56  ;;  %v5373_v37 = vmul.f32 %v3144_v59, %v5345_v32  ;;  %v2320_v18 = vsel %vm144_vm0, %v2090_v17, 0.0  ;;  %v1739_v48 = vsub.f32 %v5855_v16, %v5318_v58 }
 0x2d2   :  { %v2317_v12 = vadd.f32 %v2316_v26, %v2315_v50  ;;  %v1944_v28 = vmul.f32 1.442695, %v1734_v40  ;;  %v1946_v43 = vmul.f32 1.442695, %v1735_v15  ;;  %v1948_v1 = vmul.f32 1.442695, %v1736_v57 }
 0x2d3   :  { %v2510_v54 = vadd.f32 %v5279_v39, %v2509_v30  ;;  %v2322_v56 = vsel %vm144_vm0, %v2091_v0, 0.0  ;;  %v1740_v46 = vsub.f32 %v5856_v29, %v5318_v58  ;;  %v1950_v61 = vmul.f32 1.442695, %v1737_v4  ;;  %v5857_v50 = vld [vmem:[#allocation15_spill] sm:$0xff]  ;;  %v5858_v39 = vld [vmem:[#allocation14_spill] sm:$0xff]  ;;  %v5859_v0 = vld [vmem:[#allocation16_spill] sm:$0xff] }
 0x2d4   :  { %v2319_v10 = vadd.f32 %v2318_v60, %v2317_v12  ;;  %v1741_v17 = vsub.f32 %v5857_v50, %v5318_v58  ;;  %2989 = vpow2.f32 %v1944_v28  ;;  %v1952_v26 = vmul.f32 1.442695, %v1738_v7  ;;  %v5860_v4 = vld [vmem:[#allocation18_spill] sm:$0xff]  ;;  %v5861_v30 = vld [vmem:[#allocation17_spill] sm:$0xff] }
 0x2d5   :  { %v2511_v23 = vadd.f32 %v5282_v53, %v2510_v54  ;;  %v1742_v40 = vsub.f32 %v5858_v39, %v5318_v58  ;;  %2991 = vpow2.f32 %v1946_v43  ;;  %v1954_v15 = vmul.f32 1.442695, %v1739_v48  ;;  %v3145_v29 = vld [vmem:[%s5717_s0 + $0x2d0] sm:$0xff]  ;;  %v3148_v39 = vld [vmem:[%s5717_s0 + $0x2e8] sm:$0xff] }
 0x2d6   :  { %v2321_v9 = vadd.f32 %v2320_v18, %v2319_v10  ;;  %v1743_v27 = vsub.f32 %v5859_v0, %v5318_v58  ;;  %v1744_v60 = vsub.f32 %v5860_v4, %v5318_v58  ;;  %2993 = vpow2.f32 %v1948_v1 }
 0x2d7   :  { %v2512_v57 = vadd.f32 %v5295_v5, %v2511_v23  ;;  %v1745_v20 = vsub.f32 %v5861_v30, %v5318_v58  ;;  %2995 = vpow2.f32 %v1950_v61  ;;  %v1956_v7 = vmul.f32 1.442695, %v1740_v46  ;;  %v5862_v5 = vld [vmem:[#allocation19_spill] sm:$0xff] }
 0x2d8   :  { %v2323_v53 = vadd.f32 %v2322_v56, %v2321_v9  ;;  %v2324_v59 = vsel %vm144_vm0, %v2092_v13, 0.0  ;;  %2997 = vpow2.f32 %v1952_v26  ;;  %v1958_v18 = vmul.f32 1.442695, %v1741_v17  ;;  %v3147_v26 = vld [vmem:[%s5717_s0 + $0x2e0] sm:$0xff] }
 0x2d9   :  { %v2513_v12 = vadd.f32 %v5302_v2, %v2512_v57  ;;  %v1746_v16 = vsub.f32 %v5862_v5, %v5318_v58  ;;  %v1747_v48 = vsub.f32 %v5839_v47, %v5318_v58  ;;  %2999 = vpow2.f32 %v1954_v15 }
 0x2da   :  { %v1960_v54 = vmul.f32 1.442695, %v1742_v40  ;;  %v2990_v28 = vpop.eup %2989  ;;  %v1748_v1 = vsub.f32 %v5104_v33, %v5318_v58  ;;  %v1962_v10 = vmul.f32 1.442695, %v1743_v27  ;;  %v1964_v13 = vmul.f32 1.442695, %v1744_v60 }
 0x2db   :  { %v2514_v43 = vadd.f32 %v5311_v63, %v2513_v12  ;;  %v2992_v56 = vpop.eup %2991  ;;  %3001 = vpow2.f32 %v1956_v7  ;;  %v1966_v2 = vmul.f32 1.442695, %v1745_v20  ;;  %v2094_v46 = vmul.f32 %v3145_v29, %v2990_v28  ;;  %v3146_v33 = vld [vmem:[%s5717_s0 + $0x2d8] sm:$0xff] }
 0x2dc   :  { %v1639_v47 = vmax.f32 %v5293_v35, %v1638_v24  ;;  %v2994_v61 = vpop.eup %2993  ;;  %3003 = vpow2.f32 %v1958_v18  ;;  %v2095_v58 = vmul.f32 %v3146_v33, %v2992_v56  ;;  %v2524_v23 = vadd.f32 %v2992_v56, %v2990_v28  ;;  %v3151_v56 = vld [vmem:[%s5717_s0 + $0x300] sm:$0xff] }
 0x2dd   :  { %v2515_v63 = vadd.f32 %v5327_v44, %v2514_v43  ;;  %v2996_v50 = vpop.eup %2995  ;;  %v2325_v17 = vadd.f32 %v2324_v59, %v2323_v53  ;;  %3005 = vpow2.f32 %v1960_v54  ;;  %v2096_v9 = vmul.f32 %v3147_v26, %v2994_v61  ;;  %v3149_v53 = vld [vmem:[%s5717_s0 + $0x2f0] sm:$0xff] }
 0x2de   :  { %v2334_v35 = vsel %vm144_vm0, %v2094_v46, 0.0  ;;  %v5417_v24 = vpop.eup %2997  ;;  %3007 = vpow2.f32 %v1962_v10  ;;  %v2097_v40 = vmul.f32 %v3148_v39, %v2996_v50  ;;  %v2335_v15 = vsel %vm144_vm0, %v2095_v58, 0.0 }
 0x2df   :  { %v2516_v44 = vadd.f32 %v5337_v38, %v2515_v63  ;;  %v5424_v57 = vpop.eup %2999  ;;  %v2441_v0 = vadd.f32 %v2440_v6, %v5304_v25  ;;  %3009 = vpow2.f32 %v1964_v13  ;;  %v1968_v27 = vmul.f32 1.442695, %v1746_v16 }
 0x2e0   :  { %v2336_v4 = vadd.f32 %v2335_v15, %v2334_v35  ;;  %v2326_v38 = vsel %vm144_vm0, %v5373_v37, 0.0  ;;  %v2098_v30 = vmul.f32 %v3149_v53, %v5417_v24  ;;  %v2337_v20 = vsel %vm144_vm0, %v2096_v9, 0.0 }
 0x2e1   :  { %v2517_v60 = vadd.f32 %v5345_v32, %v2516_v44  ;;  %v5437_v7 = vpop.eup %3001  ;;  %v2327_v59 = vadd.f32 %v2326_v38, %v2325_v17  ;;  %3011 = vpow2.f32 %v1966_v2  ;;  %v1970_v25 = vmul.f32 1.442695, %v1747_v48  ;;  %v3150_v32 = vld [vmem:[%s5717_s0 + $0x2f8] sm:$0xff]  ;;  %v3152_v17 = vld [vmem:[%s5717_s0 + $0x308] sm:$0xff] }
 0x2e2   :  { %v2338_v6 = vadd.f32 %v2337_v20, %v2336_v4  ;;  %v5439_v12 = vpop.eup %3003  ;;  %v1972_v18 = vmul.f32 1.442695, %v1748_v1  ;;  %v2099_v37 = vmul.f32 %v3150_v32, %v5424_v57  ;;  %v2339_v5 = vsel %vm144_vm0, %v2097_v40, 0.0  ;;  %v3153_v40 = vld [vmem:[%s5717_s0 + $0x310] sm:$0xff]  ;;  %v3156_v32 = vld [vmem:[%s5717_s0 + $0x328] sm:$0xff] }
 0x2e3   :  { %v1640_v16 = vrot.slane %v1639_v47, 2  ;;  %v5446_v54 = vpop.eup %3005  ;;  %v2262_v28 = vrot.slane %v5314_v21, 1  ;;  %v2518_v43 = vrot.slane %v2517_v60, 4  ;;  %3013 = vpow2.f32 %v1968_v27  ;;  %v3154_v27 = vld [vmem:[%s5717_s0 + $0x318] sm:$0xff] }
 0x2e4   :  { %v2340_v48 = vadd.f32 %v2339_v5, %v2338_v6  ;;  %v5449_v10 = vpop.eup %3007  ;;  %v2192_v1 = vrot.slane %v5329_v36, 1  ;;  %v2442_v13 = vrot.slane %v2441_v0, 1  ;;  %v2100_v2 = vmul.f32 %v3151_v56, %v5437_v7 }
 0x2e5   :  { %v2341_v29 = vsel %vm144_vm0, %v2098_v30, 0.0  ;;  %v5457_v46 = vpop.eup %3009  ;;  %v2328_v63 = vrot.slane %v2327_v59, 4  ;;  %3015 = vpow2.f32 %v1970_v25  ;;  %v2525_v58 = vadd.f32 %v2994_v61, %v2524_v23 }
 0x2e6   :  { %v2342_v33 = vadd.f32 %v2341_v29, %v2340_v48  ;;  %3017 = vpow2.f32 %v1972_v18  ;;  %v2101_v26 = vmul.f32 %v3152_v17, %v5439_v12  ;;  %v2343_v9 = vsel %vm144_vm0, %v2099_v37, 0.0  ;;  %v5863_v29 = vld [vmem:[#allocation24_spill] sm:$0xff] }
 0x2e7   :  { %v1641_v35 = vmax.f32 %v1639_v47, %v1640_v16  ;;  %v5464_v44 = vpop.eup %3011  ;;  %v5466_v39 = vadd.f32 %v2518_v43, %v2517_v60  ;;  %v2102_v61 = vmul.f32 %v3153_v40, %v5446_v54  ;;  %v2526_v15 = vadd.f32 %v2996_v50, %v2525_v58  ;;  %v3155_v47 = vld [vmem:[%s5717_s0 + $0x320] sm:$0xff] }
 0x2e8   :  { %v2344_v23 = vadd.f32 %v2343_v9, %v2342_v33  ;;  %v2103_v4 = vmul.f32 %v3154_v27, %v5449_v10  ;;  %v2104_v38 = vmul.f32 %v3155_v47, %v5457_v46  ;;  %v2345_v60 = vsel %vm144_vm0, %v2100_v2, 0.0  ;;  %v5867_v27 = vld [vmem:[#allocation33_spill] sm:$0xff] }
 0x2e9   :  { %v1642_v53 = vrot.slane %v1641_v35, 1  ;;  %v5481_v30 = vpop.eup %3013  ;;  %v5484_v20 = vadd.f32 %v2192_v1, %v5329_v36  ;;  %v5486_v50 = vadd.f32 %v2442_v13, %v2441_v0  ;;  %v2527_v6 = vadd.f32 %v5417_v24, %v2526_v15  ;;  %v3157_v1 = vld [vmem:[%s5717_s0 + $0x330] sm:$0xff] }
 0x2ea   :  { %v2346_v25 = vadd.f32 %v2345_v60, %v2344_v23  ;;  %v5489_v18 = vadd.f32 %v2328_v63, %v2327_v59  ;;  %v2105_v37 = vmul.f32 %v3156_v32, %v5464_v44  ;;  %v2347_v5 = vsel %vm144_vm0, %v2101_v26, 0.0  ;;  %v5865_v26 = vld [vmem:[#allocation27_spill] sm:$0xff]  ;;  %v5866_v23 = vld [vmem:[#allocation29_spill] sm:$0xff]  ;;  %v5869_v32 = vld [vmem:[#allocation36_spill] sm:$0xff] }
 0x2eb   :  { %v5496_v16 = vmax.f32 %v1641_v35, %v1642_v53  ;;  %v5498_v43 = vpop.eup %3015  ;;  %v2520_v36 = vrot.slane %v5466_v39, 2  ;;  %v2349_v48 = vsel %vm144_vm0, %v2102_v61, 0.0  ;;  %v2528_v24 = vadd.f32 %v5424_v57, %v2527_v6  ;;  %v5864_v57 = vld [vmem:[#allocation26_spill] sm:$0xff]  ;;  %v3158_v35 = vld [vmem:[%s5717_s0 + $0x338] sm:$0xff] }
 0x2ec   :  { %v2348_v0 = vadd.f32 %v2347_v5, %v2346_v25  ;;  %v5503_v59 = vpop.eup %3017  ;;  %v2106_v13 = vmul.f32 %v3157_v1, %v5481_v30  ;;  %v2351_v56 = vsel %vm144_vm0, %v2103_v4, 0.0  ;;  %v2353_v2 = vsel %vm144_vm0, %v2104_v38, 0.0  ;;  %v3159_v4 = vld [vmem:[%s5717_s0 + $0x340] sm:$0xff]  ;;  %v5870_v5 = vld [vmem:[#allocation39_spill] sm:$0xff] }
 0x2ed   :  { %v1749_v63 = vsub.f32 %v5863_v29, %v5496_v16  ;;  %v2529_v58 = vadd.f32 %v5437_v7, %v2528_v24  ;;  %v1750_v17 = vsub.f32 %v5864_v57, %v5496_v16  ;;  %v1751_v9 = vsub.f32 %v5865_v26, %v5496_v16  ;;  %v5868_v53 = vld [vmem:[#allocation32_spill] sm:$0xff] }
 0x2ee   :  { %v2350_v33 = vadd.f32 %v2349_v48, %v2348_v0  ;;  %v2107_v40 = vmul.f32 %v3158_v35, %v5498_v43  ;;  %v2355_v61 = vsel %vm144_vm0, %v2105_v37, 0.0  ;;  %v1752_v15 = vsub.f32 %v5866_v23, %v5496_v16 }
 0x2ef   :  { %v1753_v7 = vsub.f32 %v5867_v27, %v5496_v16  ;;  %v5531_v47 = vmul.f32 %v3159_v4, %v5503_v59  ;;  %v2530_v60 = vadd.f32 %v5439_v12, %v2529_v58  ;;  %v1754_v25 = vsub.f32 %v5868_v53, %v5496_v16 }
 0x2f0   :  { %v2352_v38 = vadd.f32 %v2351_v56, %v2350_v33  ;;  %v2357_v6 = vsel %vm144_vm0, %v2106_v13, 0.0  ;;  %v1755_v37 = vsub.f32 %v5869_v32, %v5496_v16  ;;  %v1756_v0 = vsub.f32 %v5870_v5, %v5496_v16  ;;  %v3163_v5 = vld [vmem:[%s5717_s0 + $0x360] sm:$0xff] }
 0x2f1   :  { %v1974_v48 = vmul.f32 1.442695, %v1749_v63  ;;  %v2531_v1 = vadd.f32 %v5446_v54, %v2530_v60  ;;  %v1976_v29 = vmul.f32 1.442695, %v1750_v17  ;;  %v1978_v57 = vmul.f32 1.442695, %v1751_v9 }
 0x2f2   :  { %v2354_v24 = vadd.f32 %v2353_v2, %v2352_v38  ;;  %v1757_v12 = vsub.f32 %v5828_v31, %v5496_v16  ;;  %v1980_v56 = vmul.f32 1.442695, %v1752_v15  ;;  %v1982_v33 = vmul.f32 1.442695, %v1753_v7  ;;  %v3161_v60 = vld [vmem:[%s5717_s0 + $0x350] sm:$0xff] }
 0x2f3   :  { %3019 = vpow2.f32 %v1974_v48  ;;  %v2532_v13 = vadd.f32 %v5449_v10, %v2531_v1  ;;  %v1758_v58 = vsub.f32 %v5831_v45, %v5496_v16  ;;  %v1984_v26 = vmul.f32 1.442695, %v1754_v25 }
 0x2f4   :  { %3021 = vpow2.f32 %v1976_v29  ;;  %v2356_v35 = vadd.f32 %v2355_v61, %v2354_v24  ;;  %v1759_v2 = vsub.f32 %v5833_v62, %v5496_v16  ;;  %v1986_v54 = vmul.f32 1.442695, %v1755_v37 }
 0x2f5   :  { %3023 = vpow2.f32 %v1978_v57  ;;  %v2533_v63 = vadd.f32 %v5457_v46, %v2532_v13  ;;  %v1760_v31 = vsub.f32 %v4791_v34, %v5496_v16  ;;  %v1988_v17 = vmul.f32 1.442695, %v1756_v0 }
 0x2f6   :  { %3025 = vpow2.f32 %v1980_v56  ;;  %v2359_v10 = vsel %vm144_vm0, %v2107_v40, 0.0  ;;  %v1761_v45 = vsub.f32 %v5838_v41, %v5496_v16  ;;  %v1990_v9 = vmul.f32 1.442695, %v1757_v12 }
 0x2f7   :  { %3027 = vpow2.f32 %v1982_v33  ;;  %v2534_v61 = vadd.f32 %v5464_v44, %v2533_v63  ;;  %v1762_v62 = vsub.f32 %v5129_v22, %v5496_v16  ;;  %v1992_v23 = vmul.f32 1.442695, %v1758_v58  ;;  %v3160_v44 = vld [vmem:[%s5717_s0 + $0x348] sm:$0xff] }
 0x2f8   :  { %3029 = vpow2.f32 %v1984_v26  ;;  %v2358_v15 = vadd.f32 %v2357_v6, %v2356_v35  ;;  %v1763_v34 = vsub.f32 %v5277_v8, %v5496_v16  ;;  %v1994_v27 = vmul.f32 1.442695, %v1759_v2  ;;  %v3162_v6 = vld [vmem:[%s5717_s0 + $0x358] sm:$0xff]  ;;  %v3164_v33 = vld [vmem:[%s5717_s0 + $0x368] sm:$0xff]  ;;  %v3165_v2 = vld [vmem:[%s5717_s0 + $0x370] sm:$0xff] }
 0x2f9   :  { %v3020_v46 = vpop.eup %3019  ;;  %3031 = vpow2.f32 %v1986_v54  ;;  %v2535_v7 = vadd.f32 %v5481_v30, %v2534_v61  ;;  %v1996_v41 = vmul.f32 1.442695, %v1760_v31  ;;  %v1998_v38 = vmul.f32 1.442695, %v1761_v45  ;;  %v3166_v61 = vld [vmem:[%s5717_s0 + $0x378] sm:$0xff] }
 0x2fa   :  { %v3022_v40 = vpop.eup %3021  ;;  %3033 = vpow2.f32 %v1988_v17  ;;  %v2109_v4 = vmul.f32 %v3160_v44, %v3020_v46  ;;  %v2000_v30 = vmul.f32 1.442695, %v1762_v62  ;;  %v2002_v56 = vmul.f32 1.442695, %v1763_v34 }
 0x2fb   :  { %v3024_v22 = vpop.eup %3023  ;;  %3035 = vpow2.f32 %v1990_v9  ;;  %v2110_v8 = vmul.f32 %v3161_v60, %v3022_v40  ;;  %v2544_v16 = vadd.f32 %v3022_v40, %v3020_v46  ;;  %v2536_v25 = vadd.f32 %v5498_v43, %v2535_v7  ;;  %v3167_v7 = vld [vmem:[%s5717_s0 + $0x380] sm:$0xff] }
 0x2fc   :  { %v3026_v53 = vpop.eup %3025  ;;  %3037 = vpow2.f32 %v1992_v23  ;;  %v2111_v32 = vmul.f32 %v3162_v6, %v3024_v22  ;;  %v2369_v48 = vsel %vm144_vm0, %v2109_v4, 0.0  ;;  %v2360_v43 = vadd.f32 %v2359_v10, %v2358_v15 }
 0x2fd   :  { %v3028_v37 = vpop.eup %3027  ;;  %3039 = vpow2.f32 %v1994_v27  ;;  %v2112_v0 = vmul.f32 %v3163_v5, %v3026_v53  ;;  %v2370_v24 = vsel %vm144_vm0, %v2110_v8, 0.0  ;;  %v2537_v29 = vadd.f32 %v5503_v59, %v2536_v25  ;;  %v3169_v8 = vld [vmem:[%s5717_s0 + $0x390] sm:$0xff] }
 0x2fe   :  { %v5576_v1 = vpop.eup %3029  ;;  %3041 = vpow2.f32 %v1996_v41  ;;  %v2371_v57 = vadd.f32 %v2370_v24, %v2369_v48  ;;  %v2113_v13 = vmul.f32 %v3164_v33, %v3028_v37  ;;  %v2372_v58 = vsel %vm144_vm0, %v2111_v32, 0.0  ;;  %v3170_v32 = vld [vmem:[%s5717_s0 + $0x398] sm:$0xff] }
 0x2ff   :  { %v5579_v12 = vpop.eup %3031  ;;  %3043 = vpow2.f32 %v1998_v38  ;;  %v5590_v35 = vadd.f32 %v2520_v36, %v5466_v39  ;;  %v2538_v59 = vrot.slane %v2537_v29, 4  ;;  %v2114_v54 = vmul.f32 %v3165_v2, %v5576_v1 }
 0x300   :  { %v5585_v26 = vpop.eup %3033  ;;  %v2373_v63 = vadd.f32 %v2372_v58, %v2371_v57  ;;  %v2330_v17 = vrot.slane %v5489_v18, 2  ;;  %v2361_v10 = vsel %vm144_vm0, %v5531_v47, 0.0  ;;  %3045 = vpow2.f32 %v2000_v30 }
 0x301   :  { %v5596_v31 = vpop.eup %3035  ;;  %v2374_v45 = vsel %vm144_vm0, %v2112_v0, 0.0  ;;  %v2362_v36 = vadd.f32 %v2361_v10, %v2360_v43  ;;  %v2539_v9 = vadd.f32 %v2538_v59, %v2537_v29  ;;  %v2115_v62 = vmul.f32 %v3166_v61, %v5579_v12 }
 0x302   :  { %v5602_v39 = vpop.eup %3037  ;;  %v2375_v23 = vadd.f32 %v2374_v45, %v2373_v63  ;;  %3047 = vpow2.f32 %v2002_v56  ;;  %v2376_v15 = vsel %vm144_vm0, %v2113_v13, 0.0  ;;  %v2545_v47 = vadd.f32 %v3024_v22, %v2544_v16  ;;  %v3168_v22 = vld [vmem:[%s5717_s0 + $0x388] sm:$0xff]  ;;  %v3171_v56 = vld [vmem:[%s5717_s0 + $0x3a0] sm:$0xff] }
 0x303   :  { %v5608_v46 = vpop.eup %3039  ;;  %v2640_v34 = vlaneseq  ;;  %v2522_v40 = vrot.slane %v5590_v35, 1  ;;  %v2116_v41 = vmul.f32 %v3167_v7, %v5585_v26  ;;  %v2378_v4 = vsel %vm144_vm0, %v2114_v54, 0.0  ;;  %v3172_v13 = vld [vmem:[%s5717_s0 + $0x3a8] sm:$0xff] }
 0x304   :  { %v5611_v27 = vpop.eup %3041  ;;  %v2377_v44 = vadd.f32 %v2376_v15, %v2375_v23  ;;  %v2117_v60 = vmul.f32 %v3168_v22, %v5596_v31  ;;  %v2118_v16 = vmul.f32 %v3169_v8, %v5602_v39  ;;  %v2546_v25 = vadd.f32 %v3026_v53, %v2545_v47  ;;  %v5664_v15 = vld [vmem:[%s5719_s2 + $0x2] ss:$0 sm:$0xff]  ;;  %v3175_v47 = vld [vmem:[%s5717_s0 + $0x3b8] sm:$0xff] }
 0x305   :  { %v5619_v38 = vpop.eup %3043  ;;  %v2641_v30 = vshrl.u32 %v2640_v34, 7  ;;  %v2540_v6 = vrot.slane %v2539_v9, 2  ;;  %v2119_v5 = vmul.f32 %v3170_v32, %v5608_v46  ;;  %v2263_v48 = vadd.f32 %v2262_v28, %v5314_v21 }
 0x306   :  { %v2379_v0 = vadd.f32 %v2378_v4, %v2377_v44  ;;  %v5637_v24 = vpop.eup %3045  ;;  %v2363_v43 = vrot.slane %v2362_v36, 4  ;;  %v2380_v29 = vsel %vm144_vm0, %v2115_v62, 0.0  ;;  %v2547_v53 = vadd.f32 %v3028_v37, %v2546_v25 }
 0x307   :  { %2802 = vset.pattern.permute.xlu1 %v2641_v30  ;;  %v2331_v57 = vadd.f32 %v2330_v17, %v5489_v18  ;;  %v2120_v33 = vmul.f32 %v3171_v56, %v5611_v27  ;;  %v2121_v21 = vmul.f32 %v3172_v13, %v5619_v38  ;;  %v2382_v58 = vsel %vm144_vm0, %v2116_v41, 0.0  ;;  %v3173_v17 = vld [vmem:[%s5717_s0 + $0x3b0] sm:$0xff] }
 0x308   :  { %v2381_v28 = vadd.f32 %v2380_v29, %v2379_v0  ;;  %v5650_v59 = vpop.eup %3047  ;;  %v2384_v37 = vsel %vm144_vm0, %v2117_v60, 0.0  ;;  %v2386_v18 = vsel %vm144_vm0, %v2118_v16, 0.0  ;;  %v2548_v2 = vadd.f32 %v5576_v1, %v2547_v53 }
 0x309   :  { %v2332_v54 = vrot.slane %v2331_v57, 1  ;;  %v2541_v63 = vadd.f32 %v2540_v6, %v2539_v9  ;;  %v2122_v10 = vmul.f32 %v3173_v17, %v5637_v24  ;;  %v2388_v61 = vsel %vm144_vm0, %v2119_v5, 0.0 }
 0x30a   :  { %v2383_v45 = vadd.f32 %v2382_v58, %v2381_v28  ;;  %v2549_v62 = vadd.f32 %v5579_v12, %v2548_v2  ;;  %v2566_v1 = vmul.f32 %v5664_v15, %v5484_v20  ;;  %v2568_v9 = vmul.f32 %v5664_v15, %v2263_v48 }
 0x30b   :  { %v2333_v23 = vadd.f32 %v2332_v54, %v2331_v57  ;;  %v2123_v7 = vmul.f32 %v3175_v47, %v5650_v59  ;;  %v2390_v12 = vsel %vm144_vm0, %v2120_v33, 0.0  ;;  %v2392_v44 = vsel %vm144_vm0, %v2121_v21, 0.0 }
 0x30c   :  { %v2385_v41 = vadd.f32 %v2384_v37, %v2383_v45  ;;  %v2550_v4 = vadd.f32 %v5585_v26, %v2549_v62  ;;  %v2364_v22 = vadd.f32 %v2363_v43, %v2362_v36  ;;  %v2581_v8 = vrot.slane %v2566_v1, 7 }
 0x30d   :  { %v2570_v60 = vmul.f32 %v5664_v15, %v2333_v23  ;;  %v2542_v16 = vrot.slane %v2541_v63, 1  ;;  %v2587_v6 = vrot.slane %v2568_v9, 5  ;;  %v2523_v0 = vadd.f32 %v2522_v40, %v5590_v35 }
 0x30e   :  { %v2387_v20 = vadd.f32 %v2386_v18, %v2385_v41  ;;  %v2551_v25 = vadd.f32 %v5596_v31, %v2550_v4  ;;  %v2583_v30 = vsel %vm2582_vm2, %v2581_v8, %v5156_v19  ;;  %v2365_v48 = vrot.slane %v2364_v22, 2  ;;  %v2808_v19 = vld [vmem:[%s5720_s3] ss:$0 sm:$0xff]  ;;  %s3203_s3 = smov [#allocation2]  }
 0x30f   :  { %v2593_v32 = vrot.slane %v2570_v60, 3  ;;  %v2586_v26 = vsel %vm2585_vm3, %v2584_v3, %v2583_v30  ;;  %v2614_v11 = vsel %vm2582_vm2, %v5486_v50, %v4915_v55  ;;  %2644 = vperm.xlu1 %2802, %v2808_v19   ;;  %v2396_v33 = vsel %vm144_vm0, %v2123_v7, 0.0  ;;  %s2663_s28 = sshll.u32 %s3203_s3, 4  ;;  %s2664_s28 = int_to_ptr.vmem [resolvable:$true] %s2663_s28 }
 0x310   :  { %v2389_v5 = vadd.f32 %v2388_v61, %v2387_v20  ;;  %v2552_v36 = vadd.f32 %v5602_v39, %v2551_v25  ;;  %v2589_v43 = vsel %vm2588_vm4, %v2587_v6, %v2586_v26  ;;  %v2543_v39 = vadd.f32 %v2542_v16, %v2541_v63 }
 0x311   :  { %v2592_v35 = vsel %vm2591_vm5, %v2590_v51, %v2589_v43  ;;  %v2615_v29 = vsel %vm2585_vm3, %v4922_v42, %v2614_v11  ;;  %v2394_v51 = vsel %vm144_vm0, %v2122_v10, 0.0  ;;  %v2366_v56 = vadd.f32 %v2365_v48, %v2364_v22 }
 0x312   :  { %v2391_v31 = vadd.f32 %v2390_v12, %v2389_v5  ;;  %v2553_v3 = vadd.f32 %v5608_v46, %v2552_v36  ;;  %v2595_v40 = vsel %vm2594_vm6, %v2593_v32, %v2592_v35  ;;  %v2616_v49 = vsel %vm2588_vm4, %v5320_v14, %v2615_v29 }
 0x313   :  { %v2617_v55 = vsel %vm2591_vm5, %v4933_v52, %v2616_v49  ;;  %v2367_v14 = vrot.slane %v2366_v56, 1  ;;  %v3202_v12 = vmov 0   ;;  %v2653_v26 = vand.u32 127, %v2640_v34 }
 0x314   :  { %v2393_v53 = vadd.f32 %v2392_v44, %v2391_v31  ;;  %v2554_v57 = vadd.f32 %v5611_v27, %v2553_v3  ;;  %v2618_v46 = vsel %vm2594_vm6, %v2523_v0, %v2617_v55  ;;  %2803 = vset.pattern.permute.xlu2 %v3202_v12  ;;  %2804 = vset.pattern.permute.xlu0 %v3202_v12 }
 0x315   :  { %v2619_v13 = vsel %vm2597_vm7, %v2543_v39, %v2618_v46  ;;  %v2368_v2 = vadd.f32 %v2367_v14, %v2366_v56 }
 0x316   :  { %v2395_v50 = vadd.f32 %v2394_v51, %v2393_v53  ;;  %v2555_v42 = vadd.f32 %v5619_v38, %v2554_v57 }
 0x317   :  { %v2571_v10 = vmul.f32 %v5664_v15, %v2368_v2 }
 0x318   :  { %v2397_v21 = vadd.f32 %v2396_v33, %v2395_v50  ;;  %v2556_v28 = vadd.f32 %v5637_v24, %v2555_v42 }
 0x319   :  { %v2596_v23 = vrot.slane %v2571_v10, 2 }
 0x31a   :  { %v2398_v58 = vrot.slane %v2397_v21, 4  ;;  %v2557_v37 = vadd.f32 %v5650_v59, %v2556_v28 }
 0x31b   :  { %v2598_v59 = vsel %vm2597_vm7, %v2596_v23, %v2595_v40 }
 0x31c   :  { %v2399_v27 = vadd.f32 %v2398_v58, %v2397_v21  ;;  %v2558_v18 = vrot.slane %v2557_v37, 4 }
 0x31e   :  { %v2400_v54 = vrot.slane %v2399_v27, 2  ;;  %v2559_v52 = vadd.f32 %v2558_v18, %v2557_v37 }
 0x320   :  { %v2401_v63 = vadd.f32 %v2400_v54, %v2399_v27  ;;  %v2560_v17 = vrot.slane %v2559_v52, 2 }
 0x322   :  { %v2402_v45 = vrot.slane %v2401_v63, 1  ;;  %v2561_v38 = vadd.f32 %v2560_v17, %v2559_v52 }
 0x324   :  { %v2403_v61 = vadd.f32 %v2402_v45, %v2401_v63  ;;  %v2562_v62 = vrot.slane %v2561_v38, 1 }
 0x326   :  { %v2572_v24 = vmul.f32 %v5664_v15, %v2403_v61  ;;  %v2563_v1 = vadd.f32 %v2562_v62, %v2561_v38 }
 0x328   :  { %v2599_v9 = vrot.slane %v2572_v24, 1  ;;  %v2620_v47 = vsel %vm2600_vm8, %v2563_v1, %v2619_v13 }
 0x329   :  { %3049 = vrcp.f32 %v2620_v47  ;;  %v2633_v15 = vand.u32 2147483648, %v2620_v47  ;;  %vm2627_vm10 = vweird.f32 %v2620_v47  ;;  %v2631_v20 = vand.u32 2147483647, %v2620_v47 }
 0x32a   :  { %v2601_v7 = vsel %vm2600_vm8, %v2599_v9, %v2598_v59 }
 0x32b   :  { %v2603_v41 = vsel %vm144_vm0, %v2601_v7, 0.0  ;;  %v2634_v25 = vor.u32 1.1754944e-38, %v2633_v15  ;;  %vm2632_vm12 = vcmp.eq.f32.partialorder %v2631_v20, 8.507059e+37 }
 0x32c   :  { %2604 = vadd.xlane.f32.xlu0 %v2603_v41 }
 0x32f   :  { %v3050_v44 = vpop.eup %3049 }
 0x330   :  { %v2623_v4 = vmul.f32 %v3050_v44, %v2620_v47  ;;  %vm2628_vm9 = vweird.f32 %v3050_v44 }
 0x331   :  { %vm2629_vm11 = vmor %vm2627_vm10, %vm2628_vm9 }
 0x332   :  { %v2624_v22 = vsub.f32 1.0, %v2623_v4 }
 0x334   :  { %v2625_v60 = vmul.f32 %v3050_v44, %v2624_v22 }
 0x336   :  { %v2626_v8 = vadd.f32 %v3050_v44, %v2625_v60 }
 0x338   :  { %v2630_v16 = vsel %vm2629_vm11, %v3050_v44, %v2626_v8 }
 0x339   :  { %v2635_v30 = vsel %vm2632_vm12, %v2634_v25, %v2630_v16 }
 0x381   :  { %v2645_v32 = vpop.permute.xlu1 %2644 }
 0x39f   :  { %v2605_v6 = vpop.xlane.xlu0 %2604 }
 0x3a0   :  { %v2636_v5 = vmul.f32 %v2635_v30, %v2605_v6 }
 0x3a2   :  { %v2647_v0 = vadd.f32 %v2645_v32, %v2636_v5 }
 0x3a4   :  { %2650 = vperm.xlu2 %2803, %v2647_v0  }
 0x3fe   :  { %v2651_v36 = vpop.permute.xlu2 %2650 }
 0x3ff   :  { %v2654_v48 = vperm.slane %v2651_v36, %v2653_v26 }
 0x401   :  { %2657 = vst.msk [vmem:[#allocation2] sm:$0x1] %vm2656_vm13, %v2654_v48 }
 0x402   :  { %2668 = dma.vmem_to_hbm [thread:$0]  %s2664_s28, 16, %s2666_s5, [#allocation3]  }
 0x403   :  { %3200 = dma.done.wait [#allocation3], 16  }
 0x404   :  { %3201 = vsyncadd [#allocation3], 4294967280 }
 0x405   :  { %2673 = vsyncpa [#allocation3], 1 }

</bundles_post_ra>
